<compile_context>
chip_gen: v5e
topology: v5e:2x2
jax: 0.10.0
libtpu: 0.0.40
codegen_flags: <defaults>
</compile_context>

<pallas_src>
import functools

import jax
import jax.numpy as jnp
from jax import lax
from jax.experimental import pallas as pl
from jax.experimental.pallas import tpu as pltpu

MODEL_DIM = 64
BLOCK_SIZE = 32
N_HEAD = 2
N_LAYER = 4
HEAD_SIZE = MODEL_DIM // N_HEAD
LN_EPS = 1e-5


# ---------------------------------------------------------------------------
# In-kernel helpers (traced inside the Pallas kernel body)
# ---------------------------------------------------------------------------
def _layernorm(v, g, b):
    mu = jnp.mean(v, axis=-1, keepdims=True)
    var = jnp.mean((v - mu) ** 2, axis=-1, keepdims=True)
    return (v - mu) * lax.rsqrt(var + LN_EPS) * g + b


def _softmax(x, approx):
    m = jnp.max(x, axis=-1, keepdims=True)
    e = jnp.exp(x - m)
    denom = jnp.sum(e, axis=-1, keepdims=True)
    if approx:
        return e * pl.reciprocal(denom, approx=True)   # EUP slot
    return e / denom


# ---------------------------------------------------------------------------
# Fused whole-model kernel: grid = (B // b_tile,), all weights VMEM-resident.
# ---------------------------------------------------------------------------
def fused_model_kernel(
    # inputs
    x_ref, pos_ref,
    w_qkv_ref, w_qkp_ref, wproj_ref, w1_ref, w2_ref, vecs_ref,
    w_lm_ref, fvec_ref,
    # outputs
    logits_ref, attn_ref,
    *, b_tile, seq_len,
):
    T = seq_len
    C = MODEL_DIM
    hs = HEAD_SIZE
    scale = hs ** -0.5

    x = x_ref[...]                               # (b_tile*T, C) running activation
    pos = pos_ref[...]                           # (T, C)

    # Causal mask built in-kernel (saves one input + its DMA).
    row_id = lax.broadcasted_iota(jnp.int32, (T, T), 0)
    col_id = lax.broadcasted_iota(jnp.int32, (T, T), 1)
    future = col_id > row_id                     # True where masked

    for l in range(N_LAYER):                     # static unrolled layer loop
        vec = vecs_ref[l]                        # (8, 4C) packed row vectors
        ln1_g, ln1_b = vec[0:1, :C], vec[1:2, :C]
        b_proj = vec[2:3, :C]
        ln2_g, ln2_b = vec[3:4, :C], vec[4:5, :C]
        b_ff2 = vec[5:6, :C]
        b_ff1 = vec[6:7, :]                      # (1, 4C)

        # ---- disentangled multi-head attention --------------------------------
        xn = _layernorm(x, ln1_g, ln1_b)                                        # (M, C)
        qkv = jnp.dot(xn, w_qkv_ref[l], preferred_element_type=jnp.float32)     # (M, 3C)
        pqk = jnp.dot(pos, w_qkp_ref[l], preferred_element_type=jnp.float32)    # (T, 2C)

        seq_outs = []
        for s in range(b_tile):                  # per-sequence (T,T) score/AV products
            r0 = s * T
            proj = None
            for h in range(N_HEAD):
                lo, hi = h * hs, (h + 1) * hs
                q_c = qkv[r0:r0 + T, lo:hi]                       # (T, hs)
                k_c = qkv[r0:r0 + T, C + lo:C + hi]
                v = qkv[r0:r0 + T, 2 * C + lo:2 * C + hi]
                q_p = pqk[:, lo:hi]
                k_p = pqk[:, C + lo:C + hi]

                # cc + pp fused into ONE MXU push: [q_c|q_p] @ [k_c|k_p]^T
                qcat = jnp.concatenate([q_c, q_p], axis=-1)       # (T, 2hs)
                kcat = jnp.concatenate([k_c, k_p], axis=-1)       # (T, 2hs)
                scores = lax.dot_general(
                    qcat, kcat, (((1,), (1,)), ((), ())),
                    preferred_element_type=jnp.float32) * scale   # (T, T)

                att = _softmax(scores, approx=True)               # output-path softmax

                # Diagnostic map: masked_fill(-inf) + second softmax (matches the
                # reference).  Direct slice store — no concatenate relayout.
                attn_ref[l * N_HEAD + h, s] = _softmax(
                    jnp.where(future, -jnp.inf, att), approx=False)

                # NOTE: output path intentionally uses the UNMASKED attention,
                # exactly as the PyTorch reference does.
                head_out = jnp.dot(att, v, preferred_element_type=jnp.float32)  # (T, hs)
                # proj(concat(heads)) == sum_h head_out_h @ Wproj[rows h]
                part = jnp.dot(head_out, wproj_ref[l, lo:hi, :],
                               preferred_element_type=jnp.float32)               # (T, C)
                proj = part if proj is None else proj + part
            seq_outs.append(proj)

        attn_out = seq_outs[0] if b_tile == 1 else jnp.concatenate(seq_outs, axis=0)
        x = x + attn_out + b_proj                                 # residual 1

        # ---- feed-forward -------------------------------------------------------
        xn2 = _layernorm(x, ln2_g, ln2_b)
        h1 = jnp.maximum(
            jnp.dot(xn2, w1_ref[l], preferred_element_type=jnp.float32) + b_ff1, 0.0)
        ff = jnp.dot(h1, w2_ref[l], preferred_element_type=jnp.float32) + b_ff2
        x = x + ff                                                # residual 2

    # ---- final LN + LM head (lane-dense logits store) ---------------------------
    V = w_lm_ref.shape[-1]
    fvec = fvec_ref[...]
    lnf_g, lnf_b = fvec[0:1, :C], fvec[1:2, :C]
    b_lm = fvec[2:3, :V]
    xf = _layernorm(x, lnf_g, lnf_b)
    logits_ref[...] = (jnp.dot(xf, w_lm_ref[...],
                               preferred_element_type=jnp.float32) + b_lm)


# ---------------------------------------------------------------------------
# Wrapper: single pallas_call for the whole model
# ---------------------------------------------------------------------------
def forward_fused(params, tok_emb, pos_emb, *, b_tile=None):
    B, T, C = tok_emb.shape
    V = params['w_lm'].shape[-1]
    if b_tile is None:
        b_tile = B          # fewest grid steps (v5e/v6e); use B//2 on v7x (2 TCs).
    assert B % b_tile == 0
    n_steps = B // b_tile
    m_tile = b_tile * T

    x_flat = tok_emb.reshape(B * T, C)           # glue: fold batch into matmul M dim

    def resident(*shape):
        zeros = (0,) * len(shape)
        return pl.BlockSpec(shape, lambda b, zeros=zeros: zeros)

    in_specs = [
        pl.BlockSpec((m_tile, C), lambda b: (b, 0)),     # token embeddings (batch tile)
        resident(T, C),                                   # positional embeddings
        resident(N_LAYER, C, 3 * C),                      # content q/k/v weights
        resident(N_LAYER, C, 2 * C),                      # positional q/k weights
        resident(N_LAYER, C, C),                          # attention out-projection
        resident(N_LAYER, C, 4 * C),                      # ffn w1
        resident(N_LAYER, 4 * C, C),                      # ffn w2
        resident(N_LAYER, 8, 4 * C),                      # packed per-layer ln/bias rows
        resident(C, V),                                   # lm head weight
        resident(8, max(C, V)),                           # packed final ln + lm bias
    ]
    out_specs = (
        pl.BlockSpec((m_tile, V), lambda b: (b, 0)),                              # logits
        pl.BlockSpec((N_LAYER * N_HEAD, b_tile, T, T), lambda b: (0, b, 0, 0)),   # maps
    )
    out_shape = (
        jax.ShapeDtypeStruct((B * T, V), jnp.float32),
        jax.ShapeDtypeStruct((N_LAYER * N_HEAD, B, T, T), jnp.float32),
    )

    kernel = functools.partial(fused_model_kernel, b_tile=b_tile, seq_len=T)

    logits_flat, attn_flat = pl.pallas_call(
        kernel,
        out_shape=out_shape,
        grid_spec=pltpu.PrefetchScalarGridSpec(
            num_scalar_prefetch=0,
            grid=(n_steps,),
            in_specs=in_specs,
            out_specs=out_specs,
        ),
        compiler_params=pltpu.CompilerParams(dimension_semantics=("parallel",)),
    )(x_flat, pos_emb,
      params['w_qkv'], params['w_qkp'], params['wproj'],
      params['w1'], params['w2'], params['vecs'],
      params['w_lm'], params['fvec'])

    logits = logits_flat.reshape(B, T, V)
    attn = attn_flat.reshape(N_LAYER, N_HEAD, B, T, T)     # glue reshape only
    return logits, attn


def init_params(key, vocab_size):
    C = MODEL_DIM
    V = vocab_size
    std = 0.02
    kit = iter(jax.random.split(key, 8))

    def normal(shape):
        return jax.random.normal(next(kit), shape, jnp.float32) * std

    # Packed per-layer row vectors: rows = [ln1_g, ln1_b, proj_b, ln2_g, ln2_b,
    #                                       ffn_b2, ffn_b1(full 4C), pad]
    vecs = jnp.zeros((N_LAYER, 8, 4 * C), jnp.float32)
    vecs = vecs.at[:, 0, :C].set(1.0)            # ln1 gamma
    vecs = vecs.at[:, 3, :C].set(1.0)            # ln2 gamma

    # Packed final rows: [lnf_g, lnf_b, lm_bias, pad...]
    fvec = jnp.zeros((8, max(C, V)), jnp.float32)
    fvec = fvec.at[0, :C].set(1.0)               # final LN gamma

    return {
        'tok_emb': normal((V, C)),
        'pos_emb': normal((BLOCK_SIZE, C)),
        # per-layer weights stacked on a leading N_LAYER axis (input-major layout)
        'w_qkv': normal((N_LAYER, C, 3 * C)),    # cols [q_c | k_c | v], heads packed
        'w_qkp': normal((N_LAYER, C, 2 * C)),    # cols [q_p | k_p], heads packed
        'wproj': normal((N_LAYER, C, C)),        # out-projection (rows = concat head dims)
        'w1': normal((N_LAYER, C, 4 * C)),
        'w2': normal((N_LAYER, 4 * C, C)),
        'vecs': vecs,
        'w_lm': normal((C, V)),
        'fvec': fvec,
    }


@jax.jit
def forward(params, idx):
    B, T = idx.shape
    tok_emb = params['tok_emb'][idx]             # (B, T, C) embedding gather (glue)
    pos_emb = params['pos_emb'][:T]              # (T, C)

    logits, attn = forward_fused(params, tok_emb, pos_emb)
    attention_maps = [attn[l] for l in range(N_LAYER)]    # each (n_head, B, T, T)
    loss = None                                  # targets=None path of the reference
    return logits, loss, attention_maps


if __name__ == "__main__":
    vocab_size = 128
    B, T = 2, 8                                  # T <= block_size (32)

    root = jax.random.PRNGKey(0)
    k_params, k_idx = jax.random.split(root)
    params = init_params(k_params, vocab_size)
    idx = jax.random.randint(k_idx, (B, T), 0, vocab_size, dtype=jnp.int32)

    logits, loss, attention_maps = forward(params, idx)
    jax.block_until_ready(logits)
    for a in attention_maps:
        jax.block_until_ready(a)

    assert logits.shape == (B, T, vocab_size)
    assert loss is None
    assert len(attention_maps) == N_LAYER
    assert attention_maps[0].shape == (N_HEAD, B, T, T)
    assert bool(jnp.all(jnp.isfinite(logits)))
    for a in attention_maps:
        assert bool(jnp.all(jnp.isfinite(a)))
    print("KERNEL_OK")
</pallas_src>

<mosaic_0001>
module attributes {stable_mosaic.version = 11 : i64} {
  func.func @fused_model_kernel(%arg0: i32, %arg1: memref<16x64xf32, #tpu.memory_space<vmem>>, %arg2: memref<8x64xf32, #tpu.memory_space<vmem>>, %arg3: memref<4x64x192xf32, #tpu.memory_space<vmem>>, %arg4: memref<4x64x128xf32, #tpu.memory_space<vmem>>, %arg5: memref<4x64x64xf32, #tpu.memory_space<vmem>>, %arg6: memref<4x64x256xf32, #tpu.memory_space<vmem>>, %arg7: memref<4x256x64xf32, #tpu.memory_space<vmem>>, %arg8: memref<4x8x256xf32, #tpu.memory_space<vmem>>, %arg9: memref<64x128xf32, #tpu.memory_space<vmem>>, %arg10: memref<8x128xf32, #tpu.memory_space<vmem>>, %arg11: memref<16x128xf32, #tpu.memory_space<vmem>>, %arg12: memref<8x2x8x8xf32, #tpu.memory_space<vmem>>) attributes {dimension_semantics = [#tpu.dimension_semantics<parallel>], iteration_bounds = array<i64: 1>, scalar_prefetch = 0 : i64, scratch_operands = 0 : i64, tpu.core_type = #tpu.core_type<tc>, window_params = [{transform_indices = @transform_0, window_bounds = array<i64: 16, 64>}, {pipeline_mode = #tpu.pipeline_mode<synchronous>, transform_indices = @transform_1, window_bounds = array<i64: 8, 64>}, {pipeline_mode = #tpu.pipeline_mode<synchronous>, transform_indices = @transform_2, window_bounds = array<i64: 4, 64, 192>}, {pipeline_mode = #tpu.pipeline_mode<synchronous>, transform_indices = @transform_3, window_bounds = array<i64: 4, 64, 128>}, {pipeline_mode = #tpu.pipeline_mode<synchronous>, transform_indices = @transform_4, window_bounds = array<i64: 4, 64, 64>}, {pipeline_mode = #tpu.pipeline_mode<synchronous>, transform_indices = @transform_5, window_bounds = array<i64: 4, 64, 256>}, {pipeline_mode = #tpu.pipeline_mode<synchronous>, transform_indices = @transform_6, window_bounds = array<i64: 4, 256, 64>}, {pipeline_mode = #tpu.pipeline_mode<synchronous>, transform_indices = @transform_7, window_bounds = array<i64: 4, 8, 256>}, {pipeline_mode = #tpu.pipeline_mode<synchronous>, transform_indices = @transform_8, window_bounds = array<i64: 64, 128>}, {pipeline_mode = #tpu.pipeline_mode<synchronous>, transform_indices = @transform_9, window_bounds = array<i64: 8, 128>}, {transform_indices = @transform_10, window_bounds = array<i64: 16, 128>}, {transform_indices = @transform_11, window_bounds = array<i64: 8, 2, 8, 8>}]} {
    %c0 = arith.constant 0 : index
    %c0_0 = arith.constant 0 : index
    %0 = vector.load %arg1[%c0, %c0_0] : memref<16x64xf32, #tpu.memory_space<vmem>>, vector<16x64xf32>
    %c0_1 = arith.constant 0 : index
    %c0_2 = arith.constant 0 : index
    %1 = vector.load %arg2[%c0_1, %c0_2] : memref<8x64xf32, #tpu.memory_space<vmem>>, vector<8x64xf32>
    %2 = tpu.iota {dimensions = array<i32: 0>} : vector<8x8xi32>
    %3 = tpu.iota {dimensions = array<i32: 1>} : vector<8x8xi32>
    %4 = arith.cmpi sgt, %3, %2 : vector<8x8xi32>
    %c0_3 = arith.constant 0 : index
    %c0_4 = arith.constant 0 : index
    %c0_5 = arith.constant 0 : index
    %5 = vector.load %arg8[%c0_3, %c0_4, %c0_5] : memref<4x8x256xf32, #tpu.memory_space<vmem>>, vector<1x8x256xf32>
    %6 = vector.shape_cast %5 : vector<1x8x256xf32> to vector<8x256xf32>
    %7 = vector.extract_strided_slice %6 {offsets = [0, 0], sizes = [1, 64], strides = [1, 1]} : vector<8x256xf32> to vector<1x64xf32>
    %8 = vector.extract_strided_slice %6 {offsets = [1, 0], sizes = [1, 64], strides = [1, 1]} : vector<8x256xf32> to vector<1x64xf32>
    %9 = vector.extract_strided_slice %6 {offsets = [2, 0], sizes = [1, 64], strides = [1, 1]} : vector<8x256xf32> to vector<1x64xf32>
    %10 = vector.extract_strided_slice %6 {offsets = [3, 0], sizes = [1, 64], strides = [1, 1]} : vector<8x256xf32> to vector<1x64xf32>
    %11 = vector.extract_strided_slice %6 {offsets = [4, 0], sizes = [1, 64], strides = [1, 1]} : vector<8x256xf32> to vector<1x64xf32>
    %12 = vector.extract_strided_slice %6 {offsets = [5, 0], sizes = [1, 64], strides = [1, 1]} : vector<8x256xf32> to vector<1x64xf32>
    %13 = vector.extract_strided_slice %6 {offsets = [6, 0], sizes = [1, 256], strides = [1, 1]} : vector<8x256xf32> to vector<1x256xf32>
    %cst = arith.constant dense<0.000000e+00> : vector<16xf32>
    %14 = vector.multi_reduction <add>, %0, %cst [1] : vector<16x64xf32> to vector<16xf32>
    %15 = vector.shape_cast %14 : vector<16xf32> to vector<16x1xf32>
    %cst_6 = arith.constant 6.400000e+01 : f32
    %16 = vector.broadcast %cst_6 : f32 to vector<16x1xf32>
    %17 = arith.divf %15, %16 : vector<16x1xf32>
    %18 = vector.broadcast %17 : vector<16x1xf32> to vector<16x64xf32>
    %19 = arith.subf %0, %18 : vector<16x64xf32>
    %20 = arith.mulf %19, %19 : vector<16x64xf32>
    %cst_7 = arith.constant dense<0.000000e+00> : vector<16xf32>
    %21 = vector.multi_reduction <add>, %20, %cst_7 [1] : vector<16x64xf32> to vector<16xf32>
    %22 = vector.shape_cast %21 : vector<16xf32> to vector<16x1xf32>
    %cst_8 = arith.constant 6.400000e+01 : f32
    %23 = vector.broadcast %cst_8 : f32 to vector<16x1xf32>
    %24 = arith.divf %22, %23 : vector<16x1xf32>
    %25 = vector.broadcast %17 : vector<16x1xf32> to vector<16x64xf32>
    %26 = arith.subf %0, %25 : vector<16x64xf32>
    %cst_9 = arith.constant 9.99999974E-6 : f32
    %27 = vector.broadcast %cst_9 : f32 to vector<16x1xf32>
    %28 = arith.addf %24, %27 : vector<16x1xf32>
    %29 = math.rsqrt %28 : vector<16x1xf32>
    %30 = vector.broadcast %29 : vector<16x1xf32> to vector<16x64xf32>
    %31 = arith.mulf %26, %30 : vector<16x64xf32>
    %32 = vector.broadcast %7 : vector<1x64xf32> to vector<16x64xf32>
    %33 = arith.mulf %31, %32 : vector<16x64xf32>
    %34 = vector.broadcast %8 : vector<1x64xf32> to vector<16x64xf32>
    %35 = arith.addf %33, %34 : vector<16x64xf32>
    %c0_10 = arith.constant 0 : index
    %c0_11 = arith.constant 0 : index
    %c0_12 = arith.constant 0 : index
    %36 = vector.load %arg3[%c0_10, %c0_11, %c0_12] : memref<4x64x192xf32, #tpu.memory_space<vmem>>, vector<1x64x192xf32>
    %37 = vector.shape_cast %36 : vector<1x64x192xf32> to vector<64x192xf32>
    %cst_13 = arith.constant dense<0.000000e+00> : vector<16x192xf32>
    %38 = tpu.matmul %35, %37, %cst_13 {dimension_numbers = #tpu.dot_dimension_numbers<[1], [0], [0], [1], [0, 0, 1, 1], [], []>} : vector<16x64xf32>, vector<64x192xf32>, vector<16x192xf32> -> vector<16x192xf32>
    %c0_14 = arith.constant 0 : index
    %c0_15 = arith.constant 0 : index
    %c0_16 = arith.constant 0 : index
    %39 = vector.load %arg4[%c0_14, %c0_15, %c0_16] : memref<4x64x128xf32, #tpu.memory_space<vmem>>, vector<1x64x128xf32>
    %40 = vector.shape_cast %39 : vector<1x64x128xf32> to vector<64x128xf32>
    %cst_17 = arith.constant dense<0.000000e+00> : vector<8x128xf32>
    %41 = tpu.matmul %1, %40, %cst_17 {dimension_numbers = #tpu.dot_dimension_numbers<[1], [0], [0], [1], [0, 0, 1, 1], [], []>} : vector<8x64xf32>, vector<64x128xf32>, vector<8x128xf32> -> vector<8x128xf32>
    %42 = vector.extract_strided_slice %38 {offsets = [0, 0], sizes = [8, 32], strides = [1, 1]} : vector<16x192xf32> to vector<8x32xf32>
    %43 = vector.extract_strided_slice %38 {offsets = [0, 64], sizes = [8, 32], strides = [1, 1]} : vector<16x192xf32> to vector<8x32xf32>
    %44 = vector.extract_strided_slice %38 {offsets = [0, 128], sizes = [8, 32], strides = [1, 1]} : vector<16x192xf32> to vector<8x32xf32>
    %45 = vector.extract_strided_slice %41 {offsets = [0, 0], sizes = [8, 32], strides = [1, 1]} : vector<8x128xf32> to vector<8x32xf32>
    %46 = vector.extract_strided_slice %41 {offsets = [0, 64], sizes = [8, 32], strides = [1, 1]} : vector<8x128xf32> to vector<8x32xf32>
    %47 = tpu.concatenate %42, %45 in 1 : vector<8x32xf32>, vector<8x32xf32> -> vector<8x64xf32>
    %48 = tpu.concatenate %43, %46 in 1 : vector<8x32xf32>, vector<8x32xf32> -> vector<8x64xf32>
    %cst_18 = arith.constant dense<0.000000e+00> : vector<8x8xf32>
    %49 = tpu.matmul %47, %48, %cst_18 {dimension_numbers = #tpu.dot_dimension_numbers<[1], [1], [0], [0], [0, 0, 1, 0], [], []>} : vector<8x64xf32>, vector<8x64xf32>, vector<8x8xf32> -> vector<8x8xf32>
    %cst_19 = arith.constant 0.176776692 : f32
    %50 = vector.broadcast %cst_19 : f32 to vector<8x8xf32>
    %51 = arith.mulf %49, %50 : vector<8x8xf32>
    %cst_20 = arith.constant dense<0xFF800000> : vector<8xf32>
    %52 = vector.multi_reduction <maximumf>, %51, %cst_20 [1] : vector<8x8xf32> to vector<8xf32>
    %53 = vector.shape_cast %52 : vector<8xf32> to vector<8x1xf32>
    %54 = vector.broadcast %53 : vector<8x1xf32> to vector<8x8xf32>
    %55 = arith.subf %51, %54 : vector<8x8xf32>
    %56 = math.exp %55 : vector<8x8xf32>
    %cst_21 = arith.constant dense<0.000000e+00> : vector<8xf32>
    %57 = vector.multi_reduction <add>, %56, %cst_21 [1] : vector<8x8xf32> to vector<8xf32>
    %58 = vector.shape_cast %57 : vector<8xf32> to vector<8x1xf32>
    %59 = tpu.reciprocal %58 {approx = true} : vector<8x1xf32> -> vector<8x1xf32>
    %60 = vector.broadcast %59 : vector<8x1xf32> to vector<8x8xf32>
    %61 = arith.mulf %56, %60 : vector<8x8xf32>
    %cst_22 = arith.constant 0xFF800000 : f32
    %62 = vector.broadcast %cst_22 : f32 to vector<8x8xf32>
    %63 = arith.select %4, %62, %61 : vector<8x8xi1>, vector<8x8xf32>
    %cst_23 = arith.constant dense<0xFF800000> : vector<8xf32>
    %64 = vector.multi_reduction <maximumf>, %63, %cst_23 [1] : vector<8x8xf32> to vector<8xf32>
    %65 = vector.shape_cast %64 : vector<8xf32> to vector<8x1xf32>
    %66 = vector.broadcast %65 : vector<8x1xf32> to vector<8x8xf32>
    %67 = arith.subf %63, %66 : vector<8x8xf32>
    %68 = math.exp %67 : vector<8x8xf32>
    %cst_24 = arith.constant dense<0.000000e+00> : vector<8xf32>
    %69 = vector.multi_reduction <add>, %68, %cst_24 [1] : vector<8x8xf32> to vector<8xf32>
    %70 = vector.shape_cast %69 : vector<8xf32> to vector<8x1xf32>
    %71 = vector.broadcast %70 : vector<8x1xf32> to vector<8x8xf32>
    %72 = arith.divf %68, %71 : vector<8x8xf32>
    %c0_25 = arith.constant 0 : index
    %c0_26 = arith.constant 0 : index
    %c0_27 = arith.constant 0 : index
    %c0_28 = arith.constant 0 : index
    %73 = vector.load %arg12[%c0_25, %c0_26, %c0_27, %c0_28] : memref<8x2x8x8xf32, #tpu.memory_space<vmem>>, vector<1x1x8x8xf32>
    %74 = vector.shape_cast %73 : vector<1x1x8x8xf32> to vector<8x8xf32>
    %75 = vector.shape_cast %72 : vector<8x8xf32> to vector<1x1x8x8xf32>
    tpu.vector_store %arg12[%c0_25, %c0_26, %c0_27, %c0_28], %75 {strides = array<i32>} : memref<8x2x8x8xf32, #tpu.memory_space<vmem>>, vector<1x1x8x8xf32>,
    %cst_29 = arith.constant dense<0.000000e+00> : vector<8x32xf32>
    %76 = tpu.matmul %61, %44, %cst_29 {dimension_numbers = #tpu.dot_dimension_numbers<[1], [0], [0], [1], [0, 0, 1, 1], [], []>} : vector<8x8xf32>, vector<8x32xf32>, vector<8x32xf32> -> vector<8x32xf32>
    %c0_30 = arith.constant 0 : index
    %c0_31 = arith.constant 0 : index
    %c0_32 = arith.constant 0 : index
    %77 = vector.load %arg5[%c0_30, %c0_31, %c0_32] : memref<4x64x64xf32, #tpu.memory_space<vmem>>, vector<1x32x64xf32>
    %78 = vector.shape_cast %77 : vector<1x32x64xf32> to vector<32x64xf32>
    %cst_33 = arith.constant dense<0.000000e+00> : vector<8x64xf32>
    %79 = tpu.matmul %76, %78, %cst_33 {dimension_numbers = #tpu.dot_dimension_numbers<[1], [0], [0], [1], [0, 0, 1, 1], [], []>} : vector<8x32xf32>, vector<32x64xf32>, vector<8x64xf32> -> vector<8x64xf32>
    %80 = vector.extract_strided_slice %38 {offsets = [0, 32], sizes = [8, 32], strides = [1, 1]} : vector<16x192xf32> to vector<8x32xf32>
    %81 = vector.extract_strided_slice %38 {offsets = [0, 96], sizes = [8, 32], strides = [1, 1]} : vector<16x192xf32> to vector<8x32xf32>
    %82 = vector.extract_strided_slice %38 {offsets = [0, 160], sizes = [8, 32], strides = [1, 1]} : vector<16x192xf32> to vector<8x32xf32>
    %83 = vector.extract_strided_slice %41 {offsets = [0, 32], sizes = [8, 32], strides = [1, 1]} : vector<8x128xf32> to vector<8x32xf32>
    %84 = vector.extract_strided_slice %41 {offsets = [0, 96], sizes = [8, 32], strides = [1, 1]} : vector<8x128xf32> to vector<8x32xf32>
    %85 = tpu.concatenate %80, %83 in 1 : vector<8x32xf32>, vector<8x32xf32> -> vector<8x64xf32>
    %86 = tpu.concatenate %81, %84 in 1 : vector<8x32xf32>, vector<8x32xf32> -> vector<8x64xf32>
    %cst_34 = arith.constant dense<0.000000e+00> : vector<8x8xf32>
    %87 = tpu.matmul %85, %86, %cst_34 {dimension_numbers = #tpu.dot_dimension_numbers<[1], [1], [0], [0], [0, 0, 1, 0], [], []>} : vector<8x64xf32>, vector<8x64xf32>, vector<8x8xf32> -> vector<8x8xf32>
    %cst_35 = arith.constant 0.176776692 : f32
    %88 = vector.broadcast %cst_35 : f32 to vector<8x8xf32>
    %89 = arith.mulf %87, %88 : vector<8x8xf32>
    %cst_36 = arith.constant dense<0xFF800000> : vector<8xf32>
    %90 = vector.multi_reduction <maximumf>, %89, %cst_36 [1] : vector<8x8xf32> to vector<8xf32>
    %91 = vector.shape_cast %90 : vector<8xf32> to vector<8x1xf32>
    %92 = vector.broadcast %91 : vector<8x1xf32> to vector<8x8xf32>
    %93 = arith.subf %89, %92 : vector<8x8xf32>
    %94 = math.exp %93 : vector<8x8xf32>
    %cst_37 = arith.constant dense<0.000000e+00> : vector<8xf32>
    %95 = vector.multi_reduction <add>, %94, %cst_37 [1] : vector<8x8xf32> to vector<8xf32>
    %96 = vector.shape_cast %95 : vector<8xf32> to vector<8x1xf32>
    %97 = tpu.reciprocal %96 {approx = true} : vector<8x1xf32> -> vector<8x1xf32>
    %98 = vector.broadcast %97 : vector<8x1xf32> to vector<8x8xf32>
    %99 = arith.mulf %94, %98 : vector<8x8xf32>
    %cst_38 = arith.constant 0xFF800000 : f32
    %100 = vector.broadcast %cst_38 : f32 to vector<8x8xf32>
    %101 = arith.select %4, %100, %99 : vector<8x8xi1>, vector<8x8xf32>
    %cst_39 = arith.constant dense<0xFF800000> : vector<8xf32>
    %102 = vector.multi_reduction <maximumf>, %101, %cst_39 [1] : vector<8x8xf32> to vector<8xf32>
    %103 = vector.shape_cast %102 : vector<8xf32> to vector<8x1xf32>
    %104 = vector.broadcast %103 : vector<8x1xf32> to vector<8x8xf32>
    %105 = arith.subf %101, %104 : vector<8x8xf32>
    %106 = math.exp %105 : vector<8x8xf32>
    %cst_40 = arith.constant dense<0.000000e+00> : vector<8xf32>
    %107 = vector.multi_reduction <add>, %106, %cst_40 [1] : vector<8x8xf32> to vector<8xf32>
    %108 = vector.shape_cast %107 : vector<8xf32> to vector<8x1xf32>
    %109 = vector.broadcast %108 : vector<8x1xf32> to vector<8x8xf32>
    %110 = arith.divf %106, %109 : vector<8x8xf32>
    %c1 = arith.constant 1 : index
    %c0_41 = arith.constant 0 : index
    %c0_42 = arith.constant 0 : index
    %c0_43 = arith.constant 0 : index
    %111 = vector.load %arg12[%c1, %c0_41, %c0_42, %c0_43] : memref<8x2x8x8xf32, #tpu.memory_space<vmem>>, vector<1x1x8x8xf32>
    %112 = vector.shape_cast %111 : vector<1x1x8x8xf32> to vector<8x8xf32>
    %113 = vector.shape_cast %110 : vector<8x8xf32> to vector<1x1x8x8xf32>
    tpu.vector_store %arg12[%c1, %c0_41, %c0_42, %c0_43], %113 {strides = array<i32>} : memref<8x2x8x8xf32, #tpu.memory_space<vmem>>, vector<1x1x8x8xf32>,
    %cst_44 = arith.constant dense<0.000000e+00> : vector<8x32xf32>
    %114 = tpu.matmul %99, %82, %cst_44 {dimension_numbers = #tpu.dot_dimension_numbers<[1], [0], [0], [1], [0, 0, 1, 1], [], []>} : vector<8x8xf32>, vector<8x32xf32>, vector<8x32xf32> -> vector<8x32xf32>
    %c0_45 = arith.constant 0 : index
    %c32 = arith.constant 32 : index
    %c0_46 = arith.constant 0 : index
    %115 = vector.load %arg5[%c0_45, %c32, %c0_46] : memref<4x64x64xf32, #tpu.memory_space<vmem>>, vector<1x32x64xf32>
    %116 = vector.shape_cast %115 : vector<1x32x64xf32> to vector<32x64xf32>
    %cst_47 = arith.constant dense<0.000000e+00> : vector<8x64xf32>
    %117 = tpu.matmul %114, %116, %cst_47 {dimension_numbers = #tpu.dot_dimension_numbers<[1], [0], [0], [1], [0, 0, 1, 1], [], []>} : vector<8x32xf32>, vector<32x64xf32>, vector<8x64xf32> -> vector<8x64xf32>
    %118 = arith.addf %79, %117 : vector<8x64xf32>
    %119 = vector.extract_strided_slice %38 {offsets = [8, 0], sizes = [8, 32], strides = [1, 1]} : vector<16x192xf32> to vector<8x32xf32>
    %120 = vector.extract_strided_slice %38 {offsets = [8, 64], sizes = [8, 32], strides = [1, 1]} : vector<16x192xf32> to vector<8x32xf32>
    %121 = vector.extract_strided_slice %38 {offsets = [8, 128], sizes = [8, 32], strides = [1, 1]} : vector<16x192xf32> to vector<8x32xf32>
    %122 = vector.extract_strided_slice %41 {offsets = [0, 0], sizes = [8, 32], strides = [1, 1]} : vector<8x128xf32> to vector<8x32xf32>
    %123 = vector.extract_strided_slice %41 {offsets = [0, 64], sizes = [8, 32], strides = [1, 1]} : vector<8x128xf32> to vector<8x32xf32>
    %124 = tpu.concatenate %119, %122 in 1 : vector<8x32xf32>, vector<8x32xf32> -> vector<8x64xf32>
    %125 = tpu.concatenate %120, %123 in 1 : vector<8x32xf32>, vector<8x32xf32> -> vector<8x64xf32>
    %cst_48 = arith.constant dense<0.000000e+00> : vector<8x8xf32>
    %126 = tpu.matmul %124, %125, %cst_48 {dimension_numbers = #tpu.dot_dimension_numbers<[1], [1], [0], [0], [0, 0, 1, 0], [], []>} : vector<8x64xf32>, vector<8x64xf32>, vector<8x8xf32> -> vector<8x8xf32>
    %cst_49 = arith.constant 0.176776692 : f32
    %127 = vector.broadcast %cst_49 : f32 to vector<8x8xf32>
    %128 = arith.mulf %126, %127 : vector<8x8xf32>
    %cst_50 = arith.constant dense<0xFF800000> : vector<8xf32>
    %129 = vector.multi_reduction <maximumf>, %128, %cst_50 [1] : vector<8x8xf32> to vector<8xf32>
    %130 = vector.shape_cast %129 : vector<8xf32> to vector<8x1xf32>
    %131 = vector.broadcast %130 : vector<8x1xf32> to vector<8x8xf32>
    %132 = arith.subf %128, %131 : vector<8x8xf32>
    %133 = math.exp %132 : vector<8x8xf32>
    %cst_51 = arith.constant dense<0.000000e+00> : vector<8xf32>
    %134 = vector.multi_reduction <add>, %133, %cst_51 [1] : vector<8x8xf32> to vector<8xf32>
    %135 = vector.shape_cast %134 : vector<8xf32> to vector<8x1xf32>
    %136 = tpu.reciprocal %135 {approx = true} : vector<8x1xf32> -> vector<8x1xf32>
    %137 = vector.broadcast %136 : vector<8x1xf32> to vector<8x8xf32>
    %138 = arith.mulf %133, %137 : vector<8x8xf32>
    %cst_52 = arith.constant 0xFF800000 : f32
    %139 = vector.broadcast %cst_52 : f32 to vector<8x8xf32>
    %140 = arith.select %4, %139, %138 : vector<8x8xi1>, vector<8x8xf32>
    %cst_53 = arith.constant dense<0xFF800000> : vector<8xf32>
    %141 = vector.multi_reduction <maximumf>, %140, %cst_53 [1] : vector<8x8xf32> to vector<8xf32>
    %142 = vector.shape_cast %141 : vector<8xf32> to vector<8x1xf32>
    %143 = vector.broadcast %142 : vector<8x1xf32> to vector<8x8xf32>
    %144 = arith.subf %140, %143 : vector<8x8xf32>
    %145 = math.exp %144 : vector<8x8xf32>
    %cst_54 = arith.constant dense<0.000000e+00> : vector<8xf32>
    %146 = vector.multi_reduction <add>, %145, %cst_54 [1] : vector<8x8xf32> to vector<8xf32>
    %147 = vector.shape_cast %146 : vector<8xf32> to vector<8x1xf32>
    %148 = vector.broadcast %147 : vector<8x1xf32> to vector<8x8xf32>
    %149 = arith.divf %145, %148 : vector<8x8xf32>
    %c0_55 = arith.constant 0 : index
    %c1_56 = arith.constant 1 : index
    %c0_57 = arith.constant 0 : index
    %c0_58 = arith.constant 0 : index
    %150 = vector.load %arg12[%c0_55, %c1_56, %c0_57, %c0_58] : memref<8x2x8x8xf32, #tpu.memory_space<vmem>>, vector<1x1x8x8xf32>
    %151 = vector.shape_cast %150 : vector<1x1x8x8xf32> to vector<8x8xf32>
    %152 = vector.shape_cast %149 : vector<8x8xf32> to vector<1x1x8x8xf32>
    tpu.vector_store %arg12[%c0_55, %c1_56, %c0_57, %c0_58], %152 {strides = array<i32>} : memref<8x2x8x8xf32, #tpu.memory_space<vmem>>, vector<1x1x8x8xf32>,
    %cst_59 = arith.constant dense<0.000000e+00> : vector<8x32xf32>
    %153 = tpu.matmul %138, %121, %cst_59 {dimension_numbers = #tpu.dot_dimension_numbers<[1], [0], [0], [1], [0, 0, 1, 1], [], []>} : vector<8x8xf32>, vector<8x32xf32>, vector<8x32xf32> -> vector<8x32xf32>
    %c0_60 = arith.constant 0 : index
    %c0_61 = arith.constant 0 : index
    %c0_62 = arith.constant 0 : index
    %154 = vector.load %arg5[%c0_60, %c0_61, %c0_62] : memref<4x64x64xf32, #tpu.memory_space<vmem>>, vector<1x32x64xf32>
    %155 = vector.shape_cast %154 : vector<1x32x64xf32> to vector<32x64xf32>
    %cst_63 = arith.constant dense<0.000000e+00> : vector<8x64xf32>
    %156 = tpu.matmul %153, %155, %cst_63 {dimension_numbers = #tpu.dot_dimension_numbers<[1], [0], [0], [1], [0, 0, 1, 1], [], []>} : vector<8x32xf32>, vector<32x64xf32>, vector<8x64xf32> -> vector<8x64xf32>
    %157 = vector.extract_strided_slice %38 {offsets = [8, 32], sizes = [8, 32], strides = [1, 1]} : vector<16x192xf32> to vector<8x32xf32>
    %158 = vector.extract_strided_slice %38 {offsets = [8, 96], sizes = [8, 32], strides = [1, 1]} : vector<16x192xf32> to vector<8x32xf32>
    %159 = vector.extract_strided_slice %38 {offsets = [8, 160], sizes = [8, 32], strides = [1, 1]} : vector<16x192xf32> to vector<8x32xf32>
    %160 = vector.extract_strided_slice %41 {offsets = [0, 32], sizes = [8, 32], strides = [1, 1]} : vector<8x128xf32> to vector<8x32xf32>
    %161 = vector.extract_strided_slice %41 {offsets = [0, 96], sizes = [8, 32], strides = [1, 1]} : vector<8x128xf32> to vector<8x32xf32>
    %162 = tpu.concatenate %157, %160 in 1 : vector<8x32xf32>, vector<8x32xf32> -> vector<8x64xf32>
    %163 = tpu.concatenate %158, %161 in 1 : vector<8x32xf32>, vector<8x32xf32> -> vector<8x64xf32>
    %cst_64 = arith.constant dense<0.000000e+00> : vector<8x8xf32>
    %164 = tpu.matmul %162, %163, %cst_64 {dimension_numbers = #tpu.dot_dimension_numbers<[1], [1], [0], [0], [0, 0, 1, 0], [], []>} : vector<8x64xf32>, vector<8x64xf32>, vector<8x8xf32> -> vector<8x8xf32>
    %cst_65 = arith.constant 0.176776692 : f32
    %165 = vector.broadcast %cst_65 : f32 to vector<8x8xf32>
    %166 = arith.mulf %164, %165 : vector<8x8xf32>
    %cst_66 = arith.constant dense<0xFF800000> : vector<8xf32>
    %167 = vector.multi_reduction <maximumf>, %166, %cst_66 [1] : vector<8x8xf32> to vector<8xf32>
    %168 = vector.shape_cast %167 : vector<8xf32> to vector<8x1xf32>
    %169 = vector.broadcast %168 : vector<8x1xf32> to vector<8x8xf32>
    %170 = arith.subf %166, %169 : vector<8x8xf32>
    %171 = math.exp %170 : vector<8x8xf32>
    %cst_67 = arith.constant dense<0.000000e+00> : vector<8xf32>
    %172 = vector.multi_reduction <add>, %171, %cst_67 [1] : vector<8x8xf32> to vector<8xf32>
    %173 = vector.shape_cast %172 : vector<8xf32> to vector<8x1xf32>
    %174 = tpu.reciprocal %173 {approx = true} : vector<8x1xf32> -> vector<8x1xf32>
    %175 = vector.broadcast %174 : vector<8x1xf32> to vector<8x8xf32>
    %176 = arith.mulf %171, %175 : vector<8x8xf32>
    %cst_68 = arith.constant 0xFF800000 : f32
    %177 = vector.broadcast %cst_68 : f32 to vector<8x8xf32>
    %178 = arith.select %4, %177, %176 : vector<8x8xi1>, vector<8x8xf32>
    %cst_69 = arith.constant dense<0xFF800000> : vector<8xf32>
    %179 = vector.multi_reduction <maximumf>, %178, %cst_69 [1] : vector<8x8xf32> to vector<8xf32>
    %180 = vector.shape_cast %179 : vector<8xf32> to vector<8x1xf32>
    %181 = vector.broadcast %180 : vector<8x1xf32> to vector<8x8xf32>
    %182 = arith.subf %178, %181 : vector<8x8xf32>
    %183 = math.exp %182 : vector<8x8xf32>
    %cst_70 = arith.constant dense<0.000000e+00> : vector<8xf32>
    %184 = vector.multi_reduction <add>, %183, %cst_70 [1] : vector<8x8xf32> to vector<8xf32>
    %185 = vector.shape_cast %184 : vector<8xf32> to vector<8x1xf32>
    %186 = vector.broadcast %185 : vector<8x1xf32> to vector<8x8xf32>
    %187 = arith.divf %183, %186 : vector<8x8xf32>
    %c1_71 = arith.constant 1 : index
    %c1_72 = arith.constant 1 : index
    %c0_73 = arith.constant 0 : index
    %c0_74 = arith.constant 0 : index
    %188 = vector.load %arg12[%c1_71, %c1_72, %c0_73, %c0_74] : memref<8x2x8x8xf32, #tpu.memory_space<vmem>>, vector<1x1x8x8xf32>
    %189 = vector.shape_cast %188 : vector<1x1x8x8xf32> to vector<8x8xf32>
    %190 = vector.shape_cast %187 : vector<8x8xf32> to vector<1x1x8x8xf32>
    tpu.vector_store %arg12[%c1_71, %c1_72, %c0_73, %c0_74], %190 {strides = array<i32>} : memref<8x2x8x8xf32, #tpu.memory_space<vmem>>, vector<1x1x8x8xf32>,
    %cst_75 = arith.constant dense<0.000000e+00> : vector<8x32xf32>
    %191 = tpu.matmul %176, %159, %cst_75 {dimension_numbers = #tpu.dot_dimension_numbers<[1], [0], [0], [1], [0, 0, 1, 1], [], []>} : vector<8x8xf32>, vector<8x32xf32>, vector<8x32xf32> -> vector<8x32xf32>
    %c0_76 = arith.constant 0 : index
    %c32_77 = arith.constant 32 : index
    %c0_78 = arith.constant 0 : index
    %192 = vector.load %arg5[%c0_76, %c32_77, %c0_78] : memref<4x64x64xf32, #tpu.memory_space<vmem>>, vector<1x32x64xf32>
    %193 = vector.shape_cast %192 : vector<1x32x64xf32> to vector<32x64xf32>
    %cst_79 = arith.constant dense<0.000000e+00> : vector<8x64xf32>
    %194 = tpu.matmul %191, %193, %cst_79 {dimension_numbers = #tpu.dot_dimension_numbers<[1], [0], [0], [1], [0, 0, 1, 1], [], []>} : vector<8x32xf32>, vector<32x64xf32>, vector<8x64xf32> -> vector<8x64xf32>
    %195 = arith.addf %156, %194 : vector<8x64xf32>
    %196 = tpu.concatenate %118, %195 in 0 : vector<8x64xf32>, vector<8x64xf32> -> vector<16x64xf32>
    %197 = arith.addf %0, %196 : vector<16x64xf32>
    %198 = vector.broadcast %9 : vector<1x64xf32> to vector<16x64xf32>
    %199 = arith.addf %197, %198 : vector<16x64xf32>
    %cst_80 = arith.constant dense<0.000000e+00> : vector<16xf32>
    %200 = vector.multi_reduction <add>, %199, %cst_80 [1] : vector<16x64xf32> to vector<16xf32>
    %201 = vector.shape_cast %200 : vector<16xf32> to vector<16x1xf32>
    %cst_81 = arith.constant 6.400000e+01 : f32
    %202 = vector.broadcast %cst_81 : f32 to vector<16x1xf32>
    %203 = arith.divf %201, %202 : vector<16x1xf32>
    %204 = vector.broadcast %203 : vector<16x1xf32> to vector<16x64xf32>
    %205 = arith.subf %199, %204 : vector<16x64xf32>
    %206 = arith.mulf %205, %205 : vector<16x64xf32>
    %cst_82 = arith.constant dense<0.000000e+00> : vector<16xf32>
    %207 = vector.multi_reduction <add>, %206, %cst_82 [1] : vector<16x64xf32> to vector<16xf32>
    %208 = vector.shape_cast %207 : vector<16xf32> to vector<16x1xf32>
    %cst_83 = arith.constant 6.400000e+01 : f32
    %209 = vector.broadcast %cst_83 : f32 to vector<16x1xf32>
    %210 = arith.divf %208, %209 : vector<16x1xf32>
    %211 = vector.broadcast %203 : vector<16x1xf32> to vector<16x64xf32>
    %212 = arith.subf %199, %211 : vector<16x64xf32>
    %cst_84 = arith.constant 9.99999974E-6 : f32
    %213 = vector.broadcast %cst_84 : f32 to vector<16x1xf32>
    %214 = arith.addf %210, %213 : vector<16x1xf32>
    %215 = math.rsqrt %214 : vector<16x1xf32>
    %216 = vector.broadcast %215 : vector<16x1xf32> to vector<16x64xf32>
    %217 = arith.mulf %212, %216 : vector<16x64xf32>
    %218 = vector.broadcast %10 : vector<1x64xf32> to vector<16x64xf32>
    %219 = arith.mulf %217, %218 : vector<16x64xf32>
    %220 = vector.broadcast %11 : vector<1x64xf32> to vector<16x64xf32>
    %221 = arith.addf %219, %220 : vector<16x64xf32>
    %c0_85 = arith.constant 0 : index
    %c0_86 = arith.constant 0 : index
    %c0_87 = arith.constant 0 : index
    %222 = vector.load %arg6[%c0_85, %c0_86, %c0_87] : memref<4x64x256xf32, #tpu.memory_space<vmem>>, vector<1x64x256xf32>
    %223 = vector.shape_cast %222 : vector<1x64x256xf32> to vector<64x256xf32>
    %cst_88 = arith.constant dense<0.000000e+00> : vector<16x256xf32>
    %224 = tpu.matmul %221, %223, %cst_88 {dimension_numbers = #tpu.dot_dimension_numbers<[1], [0], [0], [1], [0, 0, 1, 1], [], []>} : vector<16x64xf32>, vector<64x256xf32>, vector<16x256xf32> -> vector<16x256xf32>
    %225 = vector.broadcast %13 : vector<1x256xf32> to vector<16x256xf32>
    %226 = arith.addf %224, %225 : vector<16x256xf32>
    %cst_89 = arith.constant 0.000000e+00 : f32
    %227 = vector.broadcast %cst_89 : f32 to vector<16x256xf32>
    %228 = arith.maximumf %226, %227 : vector<16x256xf32>
    %c0_90 = arith.constant 0 : index
    %c0_91 = arith.constant 0 : index
    %c0_92 = arith.constant 0 : index
    %229 = vector.load %arg7[%c0_90, %c0_91, %c0_92] : memref<4x256x64xf32, #tpu.memory_space<vmem>>, vector<1x256x64xf32>
    %230 = vector.shape_cast %229 : vector<1x256x64xf32> to vector<256x64xf32>
    %cst_93 = arith.constant dense<0.000000e+00> : vector<16x64xf32>
    %231 = tpu.matmul %228, %230, %cst_93 {dimension_numbers = #tpu.dot_dimension_numbers<[1], [0], [0], [1], [0, 0, 1, 1], [], []>} : vector<16x256xf32>, vector<256x64xf32>, vector<16x64xf32> -> vector<16x64xf32>
    %232 = vector.broadcast %12 : vector<1x64xf32> to vector<16x64xf32>
    %233 = arith.addf %231, %232 : vector<16x64xf32>
    %234 = arith.addf %199, %233 : vector<16x64xf32>
    %c1_94 = arith.constant 1 : index
    %c0_95 = arith.constant 0 : index
    %c0_96 = arith.constant 0 : index
    %235 = vector.load %arg8[%c1_94, %c0_95, %c0_96] : memref<4x8x256xf32, #tpu.memory_space<vmem>>, vector<1x8x256xf32>
    %236 = vector.shape_cast %235 : vector<1x8x256xf32> to vector<8x256xf32>
    %237 = vector.extract_strided_slice %236 {offsets = [0, 0], sizes = [1, 64], strides = [1, 1]} : vector<8x256xf32> to vector<1x64xf32>
    %238 = vector.extract_strided_slice %236 {offsets = [1, 0], sizes = [1, 64], strides = [1, 1]} : vector<8x256xf32> to vector<1x64xf32>
    %239 = vector.extract_strided_slice %236 {offsets = [2, 0], sizes = [1, 64], strides = [1, 1]} : vector<8x256xf32> to vector<1x64xf32>
    %240 = vector.extract_strided_slice %236 {offsets = [3, 0], sizes = [1, 64], strides = [1, 1]} : vector<8x256xf32> to vector<1x64xf32>
    %241 = vector.extract_strided_slice %236 {offsets = [4, 0], sizes = [1, 64], strides = [1, 1]} : vector<8x256xf32> to vector<1x64xf32>
    %242 = vector.extract_strided_slice %236 {offsets = [5, 0], sizes = [1, 64], strides = [1, 1]} : vector<8x256xf32> to vector<1x64xf32>
    %243 = vector.extract_strided_slice %236 {offsets = [6, 0], sizes = [1, 256], strides = [1, 1]} : vector<8x256xf32> to vector<1x256xf32>
    %cst_97 = arith.constant dense<0.000000e+00> : vector<16xf32>
    %244 = vector.multi_reduction <add>, %234, %cst_97 [1] : vector<16x64xf32> to vector<16xf32>
    %245 = vector.shape_cast %244 : vector<16xf32> to vector<16x1xf32>
    %cst_98 = arith.constant 6.400000e+01 : f32
    %246 = vector.broadcast %cst_98 : f32 to vector<16x1xf32>
    %247 = arith.divf %245, %246 : vector<16x1xf32>
    %248 = vector.broadcast %247 : vector<16x1xf32> to vector<16x64xf32>
    %249 = arith.subf %234, %248 : vector<16x64xf32>
    %250 = arith.mulf %249, %249 : vector<16x64xf32>
    %cst_99 = arith.constant dense<0.000000e+00> : vector<16xf32>
    %251 = vector.multi_reduction <add>, %250, %cst_99 [1] : vector<16x64xf32> to vector<16xf32>
    %252 = vector.shape_cast %251 : vector<16xf32> to vector<16x1xf32>
    %cst_100 = arith.constant 6.400000e+01 : f32
    %253 = vector.broadcast %cst_100 : f32 to vector<16x1xf32>
    %254 = arith.divf %252, %253 : vector<16x1xf32>
    %255 = vector.broadcast %247 : vector<16x1xf32> to vector<16x64xf32>
    %256 = arith.subf %234, %255 : vector<16x64xf32>
    %cst_101 = arith.constant 9.99999974E-6 : f32
    %257 = vector.broadcast %cst_101 : f32 to vector<16x1xf32>
    %258 = arith.addf %254, %257 : vector<16x1xf32>
    %259 = math.rsqrt %258 : vector<16x1xf32>
    %260 = vector.broadcast %259 : vector<16x1xf32> to vector<16x64xf32>
    %261 = arith.mulf %256, %260 : vector<16x64xf32>
    %262 = vector.broadcast %237 : vector<1x64xf32> to vector<16x64xf32>
    %263 = arith.mulf %261, %262 : vector<16x64xf32>
    %264 = vector.broadcast %238 : vector<1x64xf32> to vector<16x64xf32>
    %265 = arith.addf %263, %264 : vector<16x64xf32>
    %c1_102 = arith.constant 1 : index
    %c0_103 = arith.constant 0 : index
    %c0_104 = arith.constant 0 : index
    %266 = vector.load %arg3[%c1_102, %c0_103, %c0_104] : memref<4x64x192xf32, #tpu.memory_space<vmem>>, vector<1x64x192xf32>
    %267 = vector.shape_cast %266 : vector<1x64x192xf32> to vector<64x192xf32>
    %cst_105 = arith.constant dense<0.000000e+00> : vector<16x192xf32>
    %268 = tpu.matmul %265, %267, %cst_105 {dimension_numbers = #tpu.dot_dimension_numbers<[1], [0], [0], [1], [0, 0, 1, 1], [], []>} : vector<16x64xf32>, vector<64x192xf32>, vector<16x192xf32> -> vector<16x192xf32>
    %c1_106 = arith.constant 1 : index
    %c0_107 = arith.constant 0 : index
    %c0_108 = arith.constant 0 : index
    %269 = vector.load %arg4[%c1_106, %c0_107, %c0_108] : memref<4x64x128xf32, #tpu.memory_space<vmem>>, vector<1x64x128xf32>
    %270 = vector.shape_cast %269 : vector<1x64x128xf32> to vector<64x128xf32>
    %cst_109 = arith.constant dense<0.000000e+00> : vector<8x128xf32>
    %271 = tpu.matmul %1, %270, %cst_109 {dimension_numbers = #tpu.dot_dimension_numbers<[1], [0], [0], [1], [0, 0, 1, 1], [], []>} : vector<8x64xf32>, vector<64x128xf32>, vector<8x128xf32> -> vector<8x128xf32>
    %272 = vector.extract_strided_slice %268 {offsets = [0, 0], sizes = [8, 32], strides = [1, 1]} : vector<16x192xf32> to vector<8x32xf32>
    %273 = vector.extract_strided_slice %268 {offsets = [0, 64], sizes = [8, 32], strides = [1, 1]} : vector<16x192xf32> to vector<8x32xf32>
    %274 = vector.extract_strided_slice %268 {offsets = [0, 128], sizes = [8, 32], strides = [1, 1]} : vector<16x192xf32> to vector<8x32xf32>
    %275 = vector.extract_strided_slice %271 {offsets = [0, 0], sizes = [8, 32], strides = [1, 1]} : vector<8x128xf32> to vector<8x32xf32>
    %276 = vector.extract_strided_slice %271 {offsets = [0, 64], sizes = [8, 32], strides = [1, 1]} : vector<8x128xf32> to vector<8x32xf32>
    %277 = tpu.concatenate %272, %275 in 1 : vector<8x32xf32>, vector<8x32xf32> -> vector<8x64xf32>
    %278 = tpu.concatenate %273, %276 in 1 : vector<8x32xf32>, vector<8x32xf32> -> vector<8x64xf32>
    %cst_110 = arith.constant dense<0.000000e+00> : vector<8x8xf32>
    %279 = tpu.matmul %277, %278, %cst_110 {dimension_numbers = #tpu.dot_dimension_numbers<[1], [1], [0], [0], [0, 0, 1, 0], [], []>} : vector<8x64xf32>, vector<8x64xf32>, vector<8x8xf32> -> vector<8x8xf32>
    %cst_111 = arith.constant 0.176776692 : f32
    %280 = vector.broadcast %cst_111 : f32 to vector<8x8xf32>
    %281 = arith.mulf %279, %280 : vector<8x8xf32>
    %cst_112 = arith.constant dense<0xFF800000> : vector<8xf32>
    %282 = vector.multi_reduction <maximumf>, %281, %cst_112 [1] : vector<8x8xf32> to vector<8xf32>
    %283 = vector.shape_cast %282 : vector<8xf32> to vector<8x1xf32>
    %284 = vector.broadcast %283 : vector<8x1xf32> to vector<8x8xf32>
    %285 = arith.subf %281, %284 : vector<8x8xf32>
    %286 = math.exp %285 : vector<8x8xf32>
    %cst_113 = arith.constant dense<0.000000e+00> : vector<8xf32>
    %287 = vector.multi_reduction <add>, %286, %cst_113 [1] : vector<8x8xf32> to vector<8xf32>
    %288 = vector.shape_cast %287 : vector<8xf32> to vector<8x1xf32>
    %289 = tpu.reciprocal %288 {approx = true} : vector<8x1xf32> -> vector<8x1xf32>
    %290 = vector.broadcast %289 : vector<8x1xf32> to vector<8x8xf32>
    %291 = arith.mulf %286, %290 : vector<8x8xf32>
    %cst_114 = arith.constant 0xFF800000 : f32
    %292 = vector.broadcast %cst_114 : f32 to vector<8x8xf32>
    %293 = arith.select %4, %292, %291 : vector<8x8xi1>, vector<8x8xf32>
    %cst_115 = arith.constant dense<0xFF800000> : vector<8xf32>
    %294 = vector.multi_reduction <maximumf>, %293, %cst_115 [1] : vector<8x8xf32> to vector<8xf32>
    %295 = vector.shape_cast %294 : vector<8xf32> to vector<8x1xf32>
    %296 = vector.broadcast %295 : vector<8x1xf32> to vector<8x8xf32>
    %297 = arith.subf %293, %296 : vector<8x8xf32>
    %298 = math.exp %297 : vector<8x8xf32>
    %cst_116 = arith.constant dense<0.000000e+00> : vector<8xf32>
    %299 = vector.multi_reduction <add>, %298, %cst_116 [1] : vector<8x8xf32> to vector<8xf32>
    %300 = vector.shape_cast %299 : vector<8xf32> to vector<8x1xf32>
    %301 = vector.broadcast %300 : vector<8x1xf32> to vector<8x8xf32>
    %302 = arith.divf %298, %301 : vector<8x8xf32>
    %c2 = arith.constant 2 : index
    %c0_117 = arith.constant 0 : index
    %c0_118 = arith.constant 0 : index
    %c0_119 = arith.constant 0 : index
    %303 = vector.load %arg12[%c2, %c0_117, %c0_118, %c0_119] : memref<8x2x8x8xf32, #tpu.memory_space<vmem>>, vector<1x1x8x8xf32>
    %304 = vector.shape_cast %303 : vector<1x1x8x8xf32> to vector<8x8xf32>
    %305 = vector.shape_cast %302 : vector<8x8xf32> to vector<1x1x8x8xf32>
    tpu.vector_store %arg12[%c2, %c0_117, %c0_118, %c0_119], %305 {strides = array<i32>} : memref<8x2x8x8xf32, #tpu.memory_space<vmem>>, vector<1x1x8x8xf32>,
    %cst_120 = arith.constant dense<0.000000e+00> : vector<8x32xf32>
    %306 = tpu.matmul %291, %274, %cst_120 {dimension_numbers = #tpu.dot_dimension_numbers<[1], [0], [0], [1], [0, 0, 1, 1], [], []>} : vector<8x8xf32>, vector<8x32xf32>, vector<8x32xf32> -> vector<8x32xf32>
    %c1_121 = arith.constant 1 : index
    %c0_122 = arith.constant 0 : index
    %c0_123 = arith.constant 0 : index
    %307 = vector.load %arg5[%c1_121, %c0_122, %c0_123] : memref<4x64x64xf32, #tpu.memory_space<vmem>>, vector<1x32x64xf32>
    %308 = vector.shape_cast %307 : vector<1x32x64xf32> to vector<32x64xf32>
    %cst_124 = arith.constant dense<0.000000e+00> : vector<8x64xf32>
    %309 = tpu.matmul %306, %308, %cst_124 {dimension_numbers = #tpu.dot_dimension_numbers<[1], [0], [0], [1], [0, 0, 1, 1], [], []>} : vector<8x32xf32>, vector<32x64xf32>, vector<8x64xf32> -> vector<8x64xf32>
    %310 = vector.extract_strided_slice %268 {offsets = [0, 32], sizes = [8, 32], strides = [1, 1]} : vector<16x192xf32> to vector<8x32xf32>
    %311 = vector.extract_strided_slice %268 {offsets = [0, 96], sizes = [8, 32], strides = [1, 1]} : vector<16x192xf32> to vector<8x32xf32>
    %312 = vector.extract_strided_slice %268 {offsets = [0, 160], sizes = [8, 32], strides = [1, 1]} : vector<16x192xf32> to vector<8x32xf32>
    %313 = vector.extract_strided_slice %271 {offsets = [0, 32], sizes = [8, 32], strides = [1, 1]} : vector<8x128xf32> to vector<8x32xf32>
    %314 = vector.extract_strided_slice %271 {offsets = [0, 96], sizes = [8, 32], strides = [1, 1]} : vector<8x128xf32> to vector<8x32xf32>
    %315 = tpu.concatenate %310, %313 in 1 : vector<8x32xf32>, vector<8x32xf32> -> vector<8x64xf32>
    %316 = tpu.concatenate %311, %314 in 1 : vector<8x32xf32>, vector<8x32xf32> -> vector<8x64xf32>
    %cst_125 = arith.constant dense<0.000000e+00> : vector<8x8xf32>
    %317 = tpu.matmul %315, %316, %cst_125 {dimension_numbers = #tpu.dot_dimension_numbers<[1], [1], [0], [0], [0, 0, 1, 0], [], []>} : vector<8x64xf32>, vector<8x64xf32>, vector<8x8xf32> -> vector<8x8xf32>
    %cst_126 = arith.constant 0.176776692 : f32
    %318 = vector.broadcast %cst_126 : f32 to vector<8x8xf32>
    %319 = arith.mulf %317, %318 : vector<8x8xf32>
    %cst_127 = arith.constant dense<0xFF800000> : vector<8xf32>
    %320 = vector.multi_reduction <maximumf>, %319, %cst_127 [1] : vector<8x8xf32> to vector<8xf32>
    %321 = vector.shape_cast %320 : vector<8xf32> to vector<8x1xf32>
    %322 = vector.broadcast %321 : vector<8x1xf32> to vector<8x8xf32>
    %323 = arith.subf %319, %322 : vector<8x8xf32>
    %324 = math.exp %323 : vector<8x8xf32>
    %cst_128 = arith.constant dense<0.000000e+00> : vector<8xf32>
    %325 = vector.multi_reduction <add>, %324, %cst_128 [1] : vector<8x8xf32> to vector<8xf32>
    %326 = vector.shape_cast %325 : vector<8xf32> to vector<8x1xf32>
    %327 = tpu.reciprocal %326 {approx = true} : vector<8x1xf32> -> vector<8x1xf32>
    %328 = vector.broadcast %327 : vector<8x1xf32> to vector<8x8xf32>
    %329 = arith.mulf %324, %328 : vector<8x8xf32>
    %cst_129 = arith.constant 0xFF800000 : f32
    %330 = vector.broadcast %cst_129 : f32 to vector<8x8xf32>
    %331 = arith.select %4, %330, %329 : vector<8x8xi1>, vector<8x8xf32>
    %cst_130 = arith.constant dense<0xFF800000> : vector<8xf32>
    %332 = vector.multi_reduction <maximumf>, %331, %cst_130 [1] : vector<8x8xf32> to vector<8xf32>
    %333 = vector.shape_cast %332 : vector<8xf32> to vector<8x1xf32>
    %334 = vector.broadcast %333 : vector<8x1xf32> to vector<8x8xf32>
    %335 = arith.subf %331, %334 : vector<8x8xf32>
    %336 = math.exp %335 : vector<8x8xf32>
    %cst_131 = arith.constant dense<0.000000e+00> : vector<8xf32>
    %337 = vector.multi_reduction <add>, %336, %cst_131 [1] : vector<8x8xf32> to vector<8xf32>
    %338 = vector.shape_cast %337 : vector<8xf32> to vector<8x1xf32>
    %339 = vector.broadcast %338 : vector<8x1xf32> to vector<8x8xf32>
    %340 = arith.divf %336, %339 : vector<8x8xf32>
    %c3 = arith.constant 3 : index
    %c0_132 = arith.constant 0 : index
    %c0_133 = arith.constant 0 : index
    %c0_134 = arith.constant 0 : index
    %341 = vector.load %arg12[%c3, %c0_132, %c0_133, %c0_134] : memref<8x2x8x8xf32, #tpu.memory_space<vmem>>, vector<1x1x8x8xf32>
    %342 = vector.shape_cast %341 : vector<1x1x8x8xf32> to vector<8x8xf32>
    %343 = vector.shape_cast %340 : vector<8x8xf32> to vector<1x1x8x8xf32>
    tpu.vector_store %arg12[%c3, %c0_132, %c0_133, %c0_134], %343 {strides = array<i32>} : memref<8x2x8x8xf32, #tpu.memory_space<vmem>>, vector<1x1x8x8xf32>,
    %cst_135 = arith.constant dense<0.000000e+00> : vector<8x32xf32>
    %344 = tpu.matmul %329, %312, %cst_135 {dimension_numbers = #tpu.dot_dimension_numbers<[1], [0], [0], [1], [0, 0, 1, 1], [], []>} : vector<8x8xf32>, vector<8x32xf32>, vector<8x32xf32> -> vector<8x32xf32>
    %c1_136 = arith.constant 1 : index
    %c32_137 = arith.constant 32 : index
    %c0_138 = arith.constant 0 : index
    %345 = vector.load %arg5[%c1_136, %c32_137, %c0_138] : memref<4x64x64xf32, #tpu.memory_space<vmem>>, vector<1x32x64xf32>
    %346 = vector.shape_cast %345 : vector<1x32x64xf32> to vector<32x64xf32>
    %cst_139 = arith.constant dense<0.000000e+00> : vector<8x64xf32>
    %347 = tpu.matmul %344, %346, %cst_139 {dimension_numbers = #tpu.dot_dimension_numbers<[1], [0], [0], [1], [0, 0, 1, 1], [], []>} : vector<8x32xf32>, vector<32x64xf32>, vector<8x64xf32> -> vector<8x64xf32>
    %348 = arith.addf %309, %347 : vector<8x64xf32>
    %349 = vector.extract_strided_slice %268 {offsets = [8, 0], sizes = [8, 32], strides = [1, 1]} : vector<16x192xf32> to vector<8x32xf32>
    %350 = vector.extract_strided_slice %268 {offsets = [8, 64], sizes = [8, 32], strides = [1, 1]} : vector<16x192xf32> to vector<8x32xf32>
    %351 = vector.extract_strided_slice %268 {offsets = [8, 128], sizes = [8, 32], strides = [1, 1]} : vector<16x192xf32> to vector<8x32xf32>
    %352 = vector.extract_strided_slice %271 {offsets = [0, 0], sizes = [8, 32], strides = [1, 1]} : vector<8x128xf32> to vector<8x32xf32>
    %353 = vector.extract_strided_slice %271 {offsets = [0, 64], sizes = [8, 32], strides = [1, 1]} : vector<8x128xf32> to vector<8x32xf32>
    %354 = tpu.concatenate %349, %352 in 1 : vector<8x32xf32>, vector<8x32xf32> -> vector<8x64xf32>
    %355 = tpu.concatenate %350, %353 in 1 : vector<8x32xf32>, vector<8x32xf32> -> vector<8x64xf32>
    %cst_140 = arith.constant dense<0.000000e+00> : vector<8x8xf32>
    %356 = tpu.matmul %354, %355, %cst_140 {dimension_numbers = #tpu.dot_dimension_numbers<[1], [1], [0], [0], [0, 0, 1, 0], [], []>} : vector<8x64xf32>, vector<8x64xf32>, vector<8x8xf32> -> vector<8x8xf32>
    %cst_141 = arith.constant 0.176776692 : f32
    %357 = vector.broadcast %cst_141 : f32 to vector<8x8xf32>
    %358 = arith.mulf %356, %357 : vector<8x8xf32>
    %cst_142 = arith.constant dense<0xFF800000> : vector<8xf32>
    %359 = vector.multi_reduction <maximumf>, %358, %cst_142 [1] : vector<8x8xf32> to vector<8xf32>
    %360 = vector.shape_cast %359 : vector<8xf32> to vector<8x1xf32>
    %361 = vector.broadcast %360 : vector<8x1xf32> to vector<8x8xf32>
    %362 = arith.subf %358, %361 : vector<8x8xf32>
    %363 = math.exp %362 : vector<8x8xf32>
    %cst_143 = arith.constant dense<0.000000e+00> : vector<8xf32>
    %364 = vector.multi_reduction <add>, %363, %cst_143 [1] : vector<8x8xf32> to vector<8xf32>
    %365 = vector.shape_cast %364 : vector<8xf32> to vector<8x1xf32>
    %366 = tpu.reciprocal %365 {approx = true} : vector<8x1xf32> -> vector<8x1xf32>
    %367 = vector.broadcast %366 : vector<8x1xf32> to vector<8x8xf32>
    %368 = arith.mulf %363, %367 : vector<8x8xf32>
    %cst_144 = arith.constant 0xFF800000 : f32
    %369 = vector.broadcast %cst_144 : f32 to vector<8x8xf32>
    %370 = arith.select %4, %369, %368 : vector<8x8xi1>, vector<8x8xf32>
    %cst_145 = arith.constant dense<0xFF800000> : vector<8xf32>
    %371 = vector.multi_reduction <maximumf>, %370, %cst_145 [1] : vector<8x8xf32> to vector<8xf32>
    %372 = vector.shape_cast %371 : vector<8xf32> to vector<8x1xf32>
    %373 = vector.broadcast %372 : vector<8x1xf32> to vector<8x8xf32>
    %374 = arith.subf %370, %373 : vector<8x8xf32>
    %375 = math.exp %374 : vector<8x8xf32>
    %cst_146 = arith.constant dense<0.000000e+00> : vector<8xf32>
    %376 = vector.multi_reduction <add>, %375, %cst_146 [1] : vector<8x8xf32> to vector<8xf32>
    %377 = vector.shape_cast %376 : vector<8xf32> to vector<8x1xf32>
    %378 = vector.broadcast %377 : vector<8x1xf32> to vector<8x8xf32>
    %379 = arith.divf %375, %378 : vector<8x8xf32>
    %c2_147 = arith.constant 2 : index
    %c1_148 = arith.constant 1 : index
    %c0_149 = arith.constant 0 : index
    %c0_150 = arith.constant 0 : index
    %380 = vector.load %arg12[%c2_147, %c1_148, %c0_149, %c0_150] : memref<8x2x8x8xf32, #tpu.memory_space<vmem>>, vector<1x1x8x8xf32>
    %381 = vector.shape_cast %380 : vector<1x1x8x8xf32> to vector<8x8xf32>
    %382 = vector.shape_cast %379 : vector<8x8xf32> to vector<1x1x8x8xf32>
    tpu.vector_store %arg12[%c2_147, %c1_148, %c0_149, %c0_150], %382 {strides = array<i32>} : memref<8x2x8x8xf32, #tpu.memory_space<vmem>>, vector<1x1x8x8xf32>,
    %cst_151 = arith.constant dense<0.000000e+00> : vector<8x32xf32>
    %383 = tpu.matmul %368, %351, %cst_151 {dimension_numbers = #tpu.dot_dimension_numbers<[1], [0], [0], [1], [0, 0, 1, 1], [], []>} : vector<8x8xf32>, vector<8x32xf32>, vector<8x32xf32> -> vector<8x32xf32>
    %c1_152 = arith.constant 1 : index
    %c0_153 = arith.constant 0 : index
    %c0_154 = arith.constant 0 : index
    %384 = vector.load %arg5[%c1_152, %c0_153, %c0_154] : memref<4x64x64xf32, #tpu.memory_space<vmem>>, vector<1x32x64xf32>
    %385 = vector.shape_cast %384 : vector<1x32x64xf32> to vector<32x64xf32>
    %cst_155 = arith.constant dense<0.000000e+00> : vector<8x64xf32>
    %386 = tpu.matmul %383, %385, %cst_155 {dimension_numbers = #tpu.dot_dimension_numbers<[1], [0], [0], [1], [0, 0, 1, 1], [], []>} : vector<8x32xf32>, vector<32x64xf32>, vector<8x64xf32> -> vector<8x64xf32>
    %387 = vector.extract_strided_slice %268 {offsets = [8, 32], sizes = [8, 32], strides = [1, 1]} : vector<16x192xf32> to vector<8x32xf32>
    %388 = vector.extract_strided_slice %268 {offsets = [8, 96], sizes = [8, 32], strides = [1, 1]} : vector<16x192xf32> to vector<8x32xf32>
    %389 = vector.extract_strided_slice %268 {offsets = [8, 160], sizes = [8, 32], strides = [1, 1]} : vector<16x192xf32> to vector<8x32xf32>
    %390 = vector.extract_strided_slice %271 {offsets = [0, 32], sizes = [8, 32], strides = [1, 1]} : vector<8x128xf32> to vector<8x32xf32>
    %391 = vector.extract_strided_slice %271 {offsets = [0, 96], sizes = [8, 32], strides = [1, 1]} : vector<8x128xf32> to vector<8x32xf32>
    %392 = tpu.concatenate %387, %390 in 1 : vector<8x32xf32>, vector<8x32xf32> -> vector<8x64xf32>
    %393 = tpu.concatenate %388, %391 in 1 : vector<8x32xf32>, vector<8x32xf32> -> vector<8x64xf32>
    %cst_156 = arith.constant dense<0.000000e+00> : vector<8x8xf32>
    %394 = tpu.matmul %392, %393, %cst_156 {dimension_numbers = #tpu.dot_dimension_numbers<[1], [1], [0], [0], [0, 0, 1, 0], [], []>} : vector<8x64xf32>, vector<8x64xf32>, vector<8x8xf32> -> vector<8x8xf32>
    %cst_157 = arith.constant 0.176776692 : f32
    %395 = vector.broadcast %cst_157 : f32 to vector<8x8xf32>
    %396 = arith.mulf %394, %395 : vector<8x8xf32>
    %cst_158 = arith.constant dense<0xFF800000> : vector<8xf32>
    %397 = vector.multi_reduction <maximumf>, %396, %cst_158 [1] : vector<8x8xf32> to vector<8xf32>
    %398 = vector.shape_cast %397 : vector<8xf32> to vector<8x1xf32>
    %399 = vector.broadcast %398 : vector<8x1xf32> to vector<8x8xf32>
    %400 = arith.subf %396, %399 : vector<8x8xf32>
    %401 = math.exp %400 : vector<8x8xf32>
    %cst_159 = arith.constant dense<0.000000e+00> : vector<8xf32>
    %402 = vector.multi_reduction <add>, %401, %cst_159 [1] : vector<8x8xf32> to vector<8xf32>
    %403 = vector.shape_cast %402 : vector<8xf32> to vector<8x1xf32>
    %404 = tpu.reciprocal %403 {approx = true} : vector<8x1xf32> -> vector<8x1xf32>
    %405 = vector.broadcast %404 : vector<8x1xf32> to vector<8x8xf32>
    %406 = arith.mulf %401, %405 : vector<8x8xf32>
    %cst_160 = arith.constant 0xFF800000 : f32
    %407 = vector.broadcast %cst_160 : f32 to vector<8x8xf32>
    %408 = arith.select %4, %407, %406 : vector<8x8xi1>, vector<8x8xf32>
    %cst_161 = arith.constant dense<0xFF800000> : vector<8xf32>
    %409 = vector.multi_reduction <maximumf>, %408, %cst_161 [1] : vector<8x8xf32> to vector<8xf32>
    %410 = vector.shape_cast %409 : vector<8xf32> to vector<8x1xf32>
    %411 = vector.broadcast %410 : vector<8x1xf32> to vector<8x8xf32>
    %412 = arith.subf %408, %411 : vector<8x8xf32>
    %413 = math.exp %412 : vector<8x8xf32>
    %cst_162 = arith.constant dense<0.000000e+00> : vector<8xf32>
    %414 = vector.multi_reduction <add>, %413, %cst_162 [1] : vector<8x8xf32> to vector<8xf32>
    %415 = vector.shape_cast %414 : vector<8xf32> to vector<8x1xf32>
    %416 = vector.broadcast %415 : vector<8x1xf32> to vector<8x8xf32>
    %417 = arith.divf %413, %416 : vector<8x8xf32>
    %c3_163 = arith.constant 3 : index
    %c1_164 = arith.constant 1 : index
    %c0_165 = arith.constant 0 : index
    %c0_166 = arith.constant 0 : index
    %418 = vector.load %arg12[%c3_163, %c1_164, %c0_165, %c0_166] : memref<8x2x8x8xf32, #tpu.memory_space<vmem>>, vector<1x1x8x8xf32>
    %419 = vector.shape_cast %418 : vector<1x1x8x8xf32> to vector<8x8xf32>
    %420 = vector.shape_cast %417 : vector<8x8xf32> to vector<1x1x8x8xf32>
    tpu.vector_store %arg12[%c3_163, %c1_164, %c0_165, %c0_166], %420 {strides = array<i32>} : memref<8x2x8x8xf32, #tpu.memory_space<vmem>>, vector<1x1x8x8xf32>,
    %cst_167 = arith.constant dense<0.000000e+00> : vector<8x32xf32>
    %421 = tpu.matmul %406, %389, %cst_167 {dimension_numbers = #tpu.dot_dimension_numbers<[1], [0], [0], [1], [0, 0, 1, 1], [], []>} : vector<8x8xf32>, vector<8x32xf32>, vector<8x32xf32> -> vector<8x32xf32>
    %c1_168 = arith.constant 1 : index
    %c32_169 = arith.constant 32 : index
    %c0_170 = arith.constant 0 : index
    %422 = vector.load %arg5[%c1_168, %c32_169, %c0_170] : memref<4x64x64xf32, #tpu.memory_space<vmem>>, vector<1x32x64xf32>
    %423 = vector.shape_cast %422 : vector<1x32x64xf32> to vector<32x64xf32>
    %cst_171 = arith.constant dense<0.000000e+00> : vector<8x64xf32>
    %424 = tpu.matmul %421, %423, %cst_171 {dimension_numbers = #tpu.dot_dimension_numbers<[1], [0], [0], [1], [0, 0, 1, 1], [], []>} : vector<8x32xf32>, vector<32x64xf32>, vector<8x64xf32> -> vector<8x64xf32>
    %425 = arith.addf %386, %424 : vector<8x64xf32>
    %426 = tpu.concatenate %348, %425 in 0 : vector<8x64xf32>, vector<8x64xf32> -> vector<16x64xf32>
    %427 = arith.addf %234, %426 : vector<16x64xf32>
    %428 = vector.broadcast %239 : vector<1x64xf32> to vector<16x64xf32>
    %429 = arith.addf %427, %428 : vector<16x64xf32>
    %cst_172 = arith.constant dense<0.000000e+00> : vector<16xf32>
    %430 = vector.multi_reduction <add>, %429, %cst_172 [1] : vector<16x64xf32> to vector<16xf32>
    %431 = vector.shape_cast %430 : vector<16xf32> to vector<16x1xf32>
    %cst_173 = arith.constant 6.400000e+01 : f32
    %432 = vector.broadcast %cst_173 : f32 to vector<16x1xf32>
    %433 = arith.divf %431, %432 : vector<16x1xf32>
    %434 = vector.broadcast %433 : vector<16x1xf32> to vector<16x64xf32>
    %435 = arith.subf %429, %434 : vector<16x64xf32>
    %436 = arith.mulf %435, %435 : vector<16x64xf32>
    %cst_174 = arith.constant dense<0.000000e+00> : vector<16xf32>
    %437 = vector.multi_reduction <add>, %436, %cst_174 [1] : vector<16x64xf32> to vector<16xf32>
    %438 = vector.shape_cast %437 : vector<16xf32> to vector<16x1xf32>
    %cst_175 = arith.constant 6.400000e+01 : f32
    %439 = vector.broadcast %cst_175 : f32 to vector<16x1xf32>
    %440 = arith.divf %438, %439 : vector<16x1xf32>
    %441 = vector.broadcast %433 : vector<16x1xf32> to vector<16x64xf32>
    %442 = arith.subf %429, %441 : vector<16x64xf32>
    %cst_176 = arith.constant 9.99999974E-6 : f32
    %443 = vector.broadcast %cst_176 : f32 to vector<16x1xf32>
    %444 = arith.addf %440, %443 : vector<16x1xf32>
    %445 = math.rsqrt %444 : vector<16x1xf32>
    %446 = vector.broadcast %445 : vector<16x1xf32> to vector<16x64xf32>
    %447 = arith.mulf %442, %446 : vector<16x64xf32>
    %448 = vector.broadcast %240 : vector<1x64xf32> to vector<16x64xf32>
    %449 = arith.mulf %447, %448 : vector<16x64xf32>
    %450 = vector.broadcast %241 : vector<1x64xf32> to vector<16x64xf32>
    %451 = arith.addf %449, %450 : vector<16x64xf32>
    %c1_177 = arith.constant 1 : index
    %c0_178 = arith.constant 0 : index
    %c0_179 = arith.constant 0 : index
    %452 = vector.load %arg6[%c1_177, %c0_178, %c0_179] : memref<4x64x256xf32, #tpu.memory_space<vmem>>, vector<1x64x256xf32>
    %453 = vector.shape_cast %452 : vector<1x64x256xf32> to vector<64x256xf32>
    %cst_180 = arith.constant dense<0.000000e+00> : vector<16x256xf32>
    %454 = tpu.matmul %451, %453, %cst_180 {dimension_numbers = #tpu.dot_dimension_numbers<[1], [0], [0], [1], [0, 0, 1, 1], [], []>} : vector<16x64xf32>, vector<64x256xf32>, vector<16x256xf32> -> vector<16x256xf32>
    %455 = vector.broadcast %243 : vector<1x256xf32> to vector<16x256xf32>
    %456 = arith.addf %454, %455 : vector<16x256xf32>
    %cst_181 = arith.constant 0.000000e+00 : f32
    %457 = vector.broadcast %cst_181 : f32 to vector<16x256xf32>
    %458 = arith.maximumf %456, %457 : vector<16x256xf32>
    %c1_182 = arith.constant 1 : index
    %c0_183 = arith.constant 0 : index
    %c0_184 = arith.constant 0 : index
    %459 = vector.load %arg7[%c1_182, %c0_183, %c0_184] : memref<4x256x64xf32, #tpu.memory_space<vmem>>, vector<1x256x64xf32>
    %460 = vector.shape_cast %459 : vector<1x256x64xf32> to vector<256x64xf32>
    %cst_185 = arith.constant dense<0.000000e+00> : vector<16x64xf32>
    %461 = tpu.matmul %458, %460, %cst_185 {dimension_numbers = #tpu.dot_dimension_numbers<[1], [0], [0], [1], [0, 0, 1, 1], [], []>} : vector<16x256xf32>, vector<256x64xf32>, vector<16x64xf32> -> vector<16x64xf32>
    %462 = vector.broadcast %242 : vector<1x64xf32> to vector<16x64xf32>
    %463 = arith.addf %461, %462 : vector<16x64xf32>
    %464 = arith.addf %429, %463 : vector<16x64xf32>
    %c2_186 = arith.constant 2 : index
    %c0_187 = arith.constant 0 : index
    %c0_188 = arith.constant 0 : index
    %465 = vector.load %arg8[%c2_186, %c0_187, %c0_188] : memref<4x8x256xf32, #tpu.memory_space<vmem>>, vector<1x8x256xf32>
    %466 = vector.shape_cast %465 : vector<1x8x256xf32> to vector<8x256xf32>
    %467 = vector.extract_strided_slice %466 {offsets = [0, 0], sizes = [1, 64], strides = [1, 1]} : vector<8x256xf32> to vector<1x64xf32>
    %468 = vector.extract_strided_slice %466 {offsets = [1, 0], sizes = [1, 64], strides = [1, 1]} : vector<8x256xf32> to vector<1x64xf32>
    %469 = vector.extract_strided_slice %466 {offsets = [2, 0], sizes = [1, 64], strides = [1, 1]} : vector<8x256xf32> to vector<1x64xf32>
    %470 = vector.extract_strided_slice %466 {offsets = [3, 0], sizes = [1, 64], strides = [1, 1]} : vector<8x256xf32> to vector<1x64xf32>
    %471 = vector.extract_strided_slice %466 {offsets = [4, 0], sizes = [1, 64], strides = [1, 1]} : vector<8x256xf32> to vector<1x64xf32>
    %472 = vector.extract_strided_slice %466 {offsets = [5, 0], sizes = [1, 64], strides = [1, 1]} : vector<8x256xf32> to vector<1x64xf32>
    %473 = vector.extract_strided_slice %466 {offsets = [6, 0], sizes = [1, 256], strides = [1, 1]} : vector<8x256xf32> to vector<1x256xf32>
    %cst_189 = arith.constant dense<0.000000e+00> : vector<16xf32>
    %474 = vector.multi_reduction <add>, %464, %cst_189 [1] : vector<16x64xf32> to vector<16xf32>
    %475 = vector.shape_cast %474 : vector<16xf32> to vector<16x1xf32>
    %cst_190 = arith.constant 6.400000e+01 : f32
    %476 = vector.broadcast %cst_190 : f32 to vector<16x1xf32>
    %477 = arith.divf %475, %476 : vector<16x1xf32>
    %478 = vector.broadcast %477 : vector<16x1xf32> to vector<16x64xf32>
    %479 = arith.subf %464, %478 : vector<16x64xf32>
    %480 = arith.mulf %479, %479 : vector<16x64xf32>
    %cst_191 = arith.constant dense<0.000000e+00> : vector<16xf32>
    %481 = vector.multi_reduction <add>, %480, %cst_191 [1] : vector<16x64xf32> to vector<16xf32>
    %482 = vector.shape_cast %481 : vector<16xf32> to vector<16x1xf32>
    %cst_192 = arith.constant 6.400000e+01 : f32
    %483 = vector.broadcast %cst_192 : f32 to vector<16x1xf32>
    %484 = arith.divf %482, %483 : vector<16x1xf32>
    %485 = vector.broadcast %477 : vector<16x1xf32> to vector<16x64xf32>
    %486 = arith.subf %464, %485 : vector<16x64xf32>
    %cst_193 = arith.constant 9.99999974E-6 : f32
    %487 = vector.broadcast %cst_193 : f32 to vector<16x1xf32>
    %488 = arith.addf %484, %487 : vector<16x1xf32>
    %489 = math.rsqrt %488 : vector<16x1xf32>
    %490 = vector.broadcast %489 : vector<16x1xf32> to vector<16x64xf32>
    %491 = arith.mulf %486, %490 : vector<16x64xf32>
    %492 = vector.broadcast %467 : vector<1x64xf32> to vector<16x64xf32>
    %493 = arith.mulf %491, %492 : vector<16x64xf32>
    %494 = vector.broadcast %468 : vector<1x64xf32> to vector<16x64xf32>
    %495 = arith.addf %493, %494 : vector<16x64xf32>
    %c2_194 = arith.constant 2 : index
    %c0_195 = arith.constant 0 : index
    %c0_196 = arith.constant 0 : index
    %496 = vector.load %arg3[%c2_194, %c0_195, %c0_196] : memref<4x64x192xf32, #tpu.memory_space<vmem>>, vector<1x64x192xf32>
    %497 = vector.shape_cast %496 : vector<1x64x192xf32> to vector<64x192xf32>
    %cst_197 = arith.constant dense<0.000000e+00> : vector<16x192xf32>
    %498 = tpu.matmul %495, %497, %cst_197 {dimension_numbers = #tpu.dot_dimension_numbers<[1], [0], [0], [1], [0, 0, 1, 1], [], []>} : vector<16x64xf32>, vector<64x192xf32>, vector<16x192xf32> -> vector<16x192xf32>
    %c2_198 = arith.constant 2 : index
    %c0_199 = arith.constant 0 : index
    %c0_200 = arith.constant 0 : index
    %499 = vector.load %arg4[%c2_198, %c0_199, %c0_200] : memref<4x64x128xf32, #tpu.memory_space<vmem>>, vector<1x64x128xf32>
    %500 = vector.shape_cast %499 : vector<1x64x128xf32> to vector<64x128xf32>
    %cst_201 = arith.constant dense<0.000000e+00> : vector<8x128xf32>
    %501 = tpu.matmul %1, %500, %cst_201 {dimension_numbers = #tpu.dot_dimension_numbers<[1], [0], [0], [1], [0, 0, 1, 1], [], []>} : vector<8x64xf32>, vector<64x128xf32>, vector<8x128xf32> -> vector<8x128xf32>
    %502 = vector.extract_strided_slice %498 {offsets = [0, 0], sizes = [8, 32], strides = [1, 1]} : vector<16x192xf32> to vector<8x32xf32>
    %503 = vector.extract_strided_slice %498 {offsets = [0, 64], sizes = [8, 32], strides = [1, 1]} : vector<16x192xf32> to vector<8x32xf32>
    %504 = vector.extract_strided_slice %498 {offsets = [0, 128], sizes = [8, 32], strides = [1, 1]} : vector<16x192xf32> to vector<8x32xf32>
    %505 = vector.extract_strided_slice %501 {offsets = [0, 0], sizes = [8, 32], strides = [1, 1]} : vector<8x128xf32> to vector<8x32xf32>
    %506 = vector.extract_strided_slice %501 {offsets = [0, 64], sizes = [8, 32], strides = [1, 1]} : vector<8x128xf32> to vector<8x32xf32>
    %507 = tpu.concatenate %502, %505 in 1 : vector<8x32xf32>, vector<8x32xf32> -> vector<8x64xf32>
    %508 = tpu.concatenate %503, %506 in 1 : vector<8x32xf32>, vector<8x32xf32> -> vector<8x64xf32>
    %cst_202 = arith.constant dense<0.000000e+00> : vector<8x8xf32>
    %509 = tpu.matmul %507, %508, %cst_202 {dimension_numbers = #tpu.dot_dimension_numbers<[1], [1], [0], [0], [0, 0, 1, 0], [], []>} : vector<8x64xf32>, vector<8x64xf32>, vector<8x8xf32> -> vector<8x8xf32>
    %cst_203 = arith.constant 0.176776692 : f32
    %510 = vector.broadcast %cst_203 : f32 to vector<8x8xf32>
    %511 = arith.mulf %509, %510 : vector<8x8xf32>
    %cst_204 = arith.constant dense<0xFF800000> : vector<8xf32>
    %512 = vector.multi_reduction <maximumf>, %511, %cst_204 [1] : vector<8x8xf32> to vector<8xf32>
    %513 = vector.shape_cast %512 : vector<8xf32> to vector<8x1xf32>
    %514 = vector.broadcast %513 : vector<8x1xf32> to vector<8x8xf32>
    %515 = arith.subf %511, %514 : vector<8x8xf32>
    %516 = math.exp %515 : vector<8x8xf32>
    %cst_205 = arith.constant dense<0.000000e+00> : vector<8xf32>
    %517 = vector.multi_reduction <add>, %516, %cst_205 [1] : vector<8x8xf32> to vector<8xf32>
    %518 = vector.shape_cast %517 : vector<8xf32> to vector<8x1xf32>
    %519 = tpu.reciprocal %518 {approx = true} : vector<8x1xf32> -> vector<8x1xf32>
    %520 = vector.broadcast %519 : vector<8x1xf32> to vector<8x8xf32>
    %521 = arith.mulf %516, %520 : vector<8x8xf32>
    %cst_206 = arith.constant 0xFF800000 : f32
    %522 = vector.broadcast %cst_206 : f32 to vector<8x8xf32>
    %523 = arith.select %4, %522, %521 : vector<8x8xi1>, vector<8x8xf32>
    %cst_207 = arith.constant dense<0xFF800000> : vector<8xf32>
    %524 = vector.multi_reduction <maximumf>, %523, %cst_207 [1] : vector<8x8xf32> to vector<8xf32>
    %525 = vector.shape_cast %524 : vector<8xf32> to vector<8x1xf32>
    %526 = vector.broadcast %525 : vector<8x1xf32> to vector<8x8xf32>
    %527 = arith.subf %523, %526 : vector<8x8xf32>
    %528 = math.exp %527 : vector<8x8xf32>
    %cst_208 = arith.constant dense<0.000000e+00> : vector<8xf32>
    %529 = vector.multi_reduction <add>, %528, %cst_208 [1] : vector<8x8xf32> to vector<8xf32>
    %530 = vector.shape_cast %529 : vector<8xf32> to vector<8x1xf32>
    %531 = vector.broadcast %530 : vector<8x1xf32> to vector<8x8xf32>
    %532 = arith.divf %528, %531 : vector<8x8xf32>
    %c4 = arith.constant 4 : index
    %c0_209 = arith.constant 0 : index
    %c0_210 = arith.constant 0 : index
    %c0_211 = arith.constant 0 : index
    %533 = vector.load %arg12[%c4, %c0_209, %c0_210, %c0_211] : memref<8x2x8x8xf32, #tpu.memory_space<vmem>>, vector<1x1x8x8xf32>
    %534 = vector.shape_cast %533 : vector<1x1x8x8xf32> to vector<8x8xf32>
    %535 = vector.shape_cast %532 : vector<8x8xf32> to vector<1x1x8x8xf32>
    tpu.vector_store %arg12[%c4, %c0_209, %c0_210, %c0_211], %535 {strides = array<i32>} : memref<8x2x8x8xf32, #tpu.memory_space<vmem>>, vector<1x1x8x8xf32>,
    %cst_212 = arith.constant dense<0.000000e+00> : vector<8x32xf32>
    %536 = tpu.matmul %521, %504, %cst_212 {dimension_numbers = #tpu.dot_dimension_numbers<[1], [0], [0], [1], [0, 0, 1, 1], [], []>} : vector<8x8xf32>, vector<8x32xf32>, vector<8x32xf32> -> vector<8x32xf32>
    %c2_213 = arith.constant 2 : index
    %c0_214 = arith.constant 0 : index
    %c0_215 = arith.constant 0 : index
    %537 = vector.load %arg5[%c2_213, %c0_214, %c0_215] : memref<4x64x64xf32, #tpu.memory_space<vmem>>, vector<1x32x64xf32>
    %538 = vector.shape_cast %537 : vector<1x32x64xf32> to vector<32x64xf32>
    %cst_216 = arith.constant dense<0.000000e+00> : vector<8x64xf32>
    %539 = tpu.matmul %536, %538, %cst_216 {dimension_numbers = #tpu.dot_dimension_numbers<[1], [0], [0], [1], [0, 0, 1, 1], [], []>} : vector<8x32xf32>, vector<32x64xf32>, vector<8x64xf32> -> vector<8x64xf32>
    %540 = vector.extract_strided_slice %498 {offsets = [0, 32], sizes = [8, 32], strides = [1, 1]} : vector<16x192xf32> to vector<8x32xf32>
    %541 = vector.extract_strided_slice %498 {offsets = [0, 96], sizes = [8, 32], strides = [1, 1]} : vector<16x192xf32> to vector<8x32xf32>
    %542 = vector.extract_strided_slice %498 {offsets = [0, 160], sizes = [8, 32], strides = [1, 1]} : vector<16x192xf32> to vector<8x32xf32>
    %543 = vector.extract_strided_slice %501 {offsets = [0, 32], sizes = [8, 32], strides = [1, 1]} : vector<8x128xf32> to vector<8x32xf32>
    %544 = vector.extract_strided_slice %501 {offsets = [0, 96], sizes = [8, 32], strides = [1, 1]} : vector<8x128xf32> to vector<8x32xf32>
    %545 = tpu.concatenate %540, %543 in 1 : vector<8x32xf32>, vector<8x32xf32> -> vector<8x64xf32>
    %546 = tpu.concatenate %541, %544 in 1 : vector<8x32xf32>, vector<8x32xf32> -> vector<8x64xf32>
    %cst_217 = arith.constant dense<0.000000e+00> : vector<8x8xf32>
    %547 = tpu.matmul %545, %546, %cst_217 {dimension_numbers = #tpu.dot_dimension_numbers<[1], [1], [0], [0], [0, 0, 1, 0], [], []>} : vector<8x64xf32>, vector<8x64xf32>, vector<8x8xf32> -> vector<8x8xf32>
    %cst_218 = arith.constant 0.176776692 : f32
    %548 = vector.broadcast %cst_218 : f32 to vector<8x8xf32>
    %549 = arith.mulf %547, %548 : vector<8x8xf32>
    %cst_219 = arith.constant dense<0xFF800000> : vector<8xf32>
    %550 = vector.multi_reduction <maximumf>, %549, %cst_219 [1] : vector<8x8xf32> to vector<8xf32>
    %551 = vector.shape_cast %550 : vector<8xf32> to vector<8x1xf32>
    %552 = vector.broadcast %551 : vector<8x1xf32> to vector<8x8xf32>
    %553 = arith.subf %549, %552 : vector<8x8xf32>
    %554 = math.exp %553 : vector<8x8xf32>
    %cst_220 = arith.constant dense<0.000000e+00> : vector<8xf32>
    %555 = vector.multi_reduction <add>, %554, %cst_220 [1] : vector<8x8xf32> to vector<8xf32>
    %556 = vector.shape_cast %555 : vector<8xf32> to vector<8x1xf32>
    %557 = tpu.reciprocal %556 {approx = true} : vector<8x1xf32> -> vector<8x1xf32>
    %558 = vector.broadcast %557 : vector<8x1xf32> to vector<8x8xf32>
    %559 = arith.mulf %554, %558 : vector<8x8xf32>
    %cst_221 = arith.constant 0xFF800000 : f32
    %560 = vector.broadcast %cst_221 : f32 to vector<8x8xf32>
    %561 = arith.select %4, %560, %559 : vector<8x8xi1>, vector<8x8xf32>
    %cst_222 = arith.constant dense<0xFF800000> : vector<8xf32>
    %562 = vector.multi_reduction <maximumf>, %561, %cst_222 [1] : vector<8x8xf32> to vector<8xf32>
    %563 = vector.shape_cast %562 : vector<8xf32> to vector<8x1xf32>
    %564 = vector.broadcast %563 : vector<8x1xf32> to vector<8x8xf32>
    %565 = arith.subf %561, %564 : vector<8x8xf32>
    %566 = math.exp %565 : vector<8x8xf32>
    %cst_223 = arith.constant dense<0.000000e+00> : vector<8xf32>
    %567 = vector.multi_reduction <add>, %566, %cst_223 [1] : vector<8x8xf32> to vector<8xf32>
    %568 = vector.shape_cast %567 : vector<8xf32> to vector<8x1xf32>
    %569 = vector.broadcast %568 : vector<8x1xf32> to vector<8x8xf32>
    %570 = arith.divf %566, %569 : vector<8x8xf32>
    %c5 = arith.constant 5 : index
    %c0_224 = arith.constant 0 : index
    %c0_225 = arith.constant 0 : index
    %c0_226 = arith.constant 0 : index
    %571 = vector.load %arg12[%c5, %c0_224, %c0_225, %c0_226] : memref<8x2x8x8xf32, #tpu.memory_space<vmem>>, vector<1x1x8x8xf32>
    %572 = vector.shape_cast %571 : vector<1x1x8x8xf32> to vector<8x8xf32>
    %573 = vector.shape_cast %570 : vector<8x8xf32> to vector<1x1x8x8xf32>
    tpu.vector_store %arg12[%c5, %c0_224, %c0_225, %c0_226], %573 {strides = array<i32>} : memref<8x2x8x8xf32, #tpu.memory_space<vmem>>, vector<1x1x8x8xf32>,
    %cst_227 = arith.constant dense<0.000000e+00> : vector<8x32xf32>
    %574 = tpu.matmul %559, %542, %cst_227 {dimension_numbers = #tpu.dot_dimension_numbers<[1], [0], [0], [1], [0, 0, 1, 1], [], []>} : vector<8x8xf32>, vector<8x32xf32>, vector<8x32xf32> -> vector<8x32xf32>
    %c2_228 = arith.constant 2 : index
    %c32_229 = arith.constant 32 : index
    %c0_230 = arith.constant 0 : index
    %575 = vector.load %arg5[%c2_228, %c32_229, %c0_230] : memref<4x64x64xf32, #tpu.memory_space<vmem>>, vector<1x32x64xf32>
    %576 = vector.shape_cast %575 : vector<1x32x64xf32> to vector<32x64xf32>
    %cst_231 = arith.constant dense<0.000000e+00> : vector<8x64xf32>
    %577 = tpu.matmul %574, %576, %cst_231 {dimension_numbers = #tpu.dot_dimension_numbers<[1], [0], [0], [1], [0, 0, 1, 1], [], []>} : vector<8x32xf32>, vector<32x64xf32>, vector<8x64xf32> -> vector<8x64xf32>
    %578 = arith.addf %539, %577 : vector<8x64xf32>
    %579 = vector.extract_strided_slice %498 {offsets = [8, 0], sizes = [8, 32], strides = [1, 1]} : vector<16x192xf32> to vector<8x32xf32>
    %580 = vector.extract_strided_slice %498 {offsets = [8, 64], sizes = [8, 32], strides = [1, 1]} : vector<16x192xf32> to vector<8x32xf32>
    %581 = vector.extract_strided_slice %498 {offsets = [8, 128], sizes = [8, 32], strides = [1, 1]} : vector<16x192xf32> to vector<8x32xf32>
    %582 = vector.extract_strided_slice %501 {offsets = [0, 0], sizes = [8, 32], strides = [1, 1]} : vector<8x128xf32> to vector<8x32xf32>
    %583 = vector.extract_strided_slice %501 {offsets = [0, 64], sizes = [8, 32], strides = [1, 1]} : vector<8x128xf32> to vector<8x32xf32>
    %584 = tpu.concatenate %579, %582 in 1 : vector<8x32xf32>, vector<8x32xf32> -> vector<8x64xf32>
    %585 = tpu.concatenate %580, %583 in 1 : vector<8x32xf32>, vector<8x32xf32> -> vector<8x64xf32>
    %cst_232 = arith.constant dense<0.000000e+00> : vector<8x8xf32>
    %586 = tpu.matmul %584, %585, %cst_232 {dimension_numbers = #tpu.dot_dimension_numbers<[1], [1], [0], [0], [0, 0, 1, 0], [], []>} : vector<8x64xf32>, vector<8x64xf32>, vector<8x8xf32> -> vector<8x8xf32>
    %cst_233 = arith.constant 0.176776692 : f32
    %587 = vector.broadcast %cst_233 : f32 to vector<8x8xf32>
    %588 = arith.mulf %586, %587 : vector<8x8xf32>
    %cst_234 = arith.constant dense<0xFF800000> : vector<8xf32>
    %589 = vector.multi_reduction <maximumf>, %588, %cst_234 [1] : vector<8x8xf32> to vector<8xf32>
    %590 = vector.shape_cast %589 : vector<8xf32> to vector<8x1xf32>
    %591 = vector.broadcast %590 : vector<8x1xf32> to vector<8x8xf32>
    %592 = arith.subf %588, %591 : vector<8x8xf32>
    %593 = math.exp %592 : vector<8x8xf32>
    %cst_235 = arith.constant dense<0.000000e+00> : vector<8xf32>
    %594 = vector.multi_reduction <add>, %593, %cst_235 [1] : vector<8x8xf32> to vector<8xf32>
    %595 = vector.shape_cast %594 : vector<8xf32> to vector<8x1xf32>
    %596 = tpu.reciprocal %595 {approx = true} : vector<8x1xf32> -> vector<8x1xf32>
    %597 = vector.broadcast %596 : vector<8x1xf32> to vector<8x8xf32>
    %598 = arith.mulf %593, %597 : vector<8x8xf32>
    %cst_236 = arith.constant 0xFF800000 : f32
    %599 = vector.broadcast %cst_236 : f32 to vector<8x8xf32>
    %600 = arith.select %4, %599, %598 : vector<8x8xi1>, vector<8x8xf32>
    %cst_237 = arith.constant dense<0xFF800000> : vector<8xf32>
    %601 = vector.multi_reduction <maximumf>, %600, %cst_237 [1] : vector<8x8xf32> to vector<8xf32>
    %602 = vector.shape_cast %601 : vector<8xf32> to vector<8x1xf32>
    %603 = vector.broadcast %602 : vector<8x1xf32> to vector<8x8xf32>
    %604 = arith.subf %600, %603 : vector<8x8xf32>
    %605 = math.exp %604 : vector<8x8xf32>
    %cst_238 = arith.constant dense<0.000000e+00> : vector<8xf32>
    %606 = vector.multi_reduction <add>, %605, %cst_238 [1] : vector<8x8xf32> to vector<8xf32>
    %607 = vector.shape_cast %606 : vector<8xf32> to vector<8x1xf32>
    %608 = vector.broadcast %607 : vector<8x1xf32> to vector<8x8xf32>
    %609 = arith.divf %605, %608 : vector<8x8xf32>
    %c4_239 = arith.constant 4 : index
    %c1_240 = arith.constant 1 : index
    %c0_241 = arith.constant 0 : index
    %c0_242 = arith.constant 0 : index
    %610 = vector.load %arg12[%c4_239, %c1_240, %c0_241, %c0_242] : memref<8x2x8x8xf32, #tpu.memory_space<vmem>>, vector<1x1x8x8xf32>
    %611 = vector.shape_cast %610 : vector<1x1x8x8xf32> to vector<8x8xf32>
    %612 = vector.shape_cast %609 : vector<8x8xf32> to vector<1x1x8x8xf32>
    tpu.vector_store %arg12[%c4_239, %c1_240, %c0_241, %c0_242], %612 {strides = array<i32>} : memref<8x2x8x8xf32, #tpu.memory_space<vmem>>, vector<1x1x8x8xf32>,
    %cst_243 = arith.constant dense<0.000000e+00> : vector<8x32xf32>
    %613 = tpu.matmul %598, %581, %cst_243 {dimension_numbers = #tpu.dot_dimension_numbers<[1], [0], [0], [1], [0, 0, 1, 1], [], []>} : vector<8x8xf32>, vector<8x32xf32>, vector<8x32xf32> -> vector<8x32xf32>
    %c2_244 = arith.constant 2 : index
    %c0_245 = arith.constant 0 : index
    %c0_246 = arith.constant 0 : index
    %614 = vector.load %arg5[%c2_244, %c0_245, %c0_246] : memref<4x64x64xf32, #tpu.memory_space<vmem>>, vector<1x32x64xf32>
    %615 = vector.shape_cast %614 : vector<1x32x64xf32> to vector<32x64xf32>
    %cst_247 = arith.constant dense<0.000000e+00> : vector<8x64xf32>
    %616 = tpu.matmul %613, %615, %cst_247 {dimension_numbers = #tpu.dot_dimension_numbers<[1], [0], [0], [1], [0, 0, 1, 1], [], []>} : vector<8x32xf32>, vector<32x64xf32>, vector<8x64xf32> -> vector<8x64xf32>
    %617 = vector.extract_strided_slice %498 {offsets = [8, 32], sizes = [8, 32], strides = [1, 1]} : vector<16x192xf32> to vector<8x32xf32>
    %618 = vector.extract_strided_slice %498 {offsets = [8, 96], sizes = [8, 32], strides = [1, 1]} : vector<16x192xf32> to vector<8x32xf32>
    %619 = vector.extract_strided_slice %498 {offsets = [8, 160], sizes = [8, 32], strides = [1, 1]} : vector<16x192xf32> to vector<8x32xf32>
    %620 = vector.extract_strided_slice %501 {offsets = [0, 32], sizes = [8, 32], strides = [1, 1]} : vector<8x128xf32> to vector<8x32xf32>
    %621 = vector.extract_strided_slice %501 {offsets = [0, 96], sizes = [8, 32], strides = [1, 1]} : vector<8x128xf32> to vector<8x32xf32>
    %622 = tpu.concatenate %617, %620 in 1 : vector<8x32xf32>, vector<8x32xf32> -> vector<8x64xf32>
    %623 = tpu.concatenate %618, %621 in 1 : vector<8x32xf32>, vector<8x32xf32> -> vector<8x64xf32>
    %cst_248 = arith.constant dense<0.000000e+00> : vector<8x8xf32>
    %624 = tpu.matmul %622, %623, %cst_248 {dimension_numbers = #tpu.dot_dimension_numbers<[1], [1], [0], [0], [0, 0, 1, 0], [], []>} : vector<8x64xf32>, vector<8x64xf32>, vector<8x8xf32> -> vector<8x8xf32>
    %cst_249 = arith.constant 0.176776692 : f32
    %625 = vector.broadcast %cst_249 : f32 to vector<8x8xf32>
    %626 = arith.mulf %624, %625 : vector<8x8xf32>
    %cst_250 = arith.constant dense<0xFF800000> : vector<8xf32>
    %627 = vector.multi_reduction <maximumf>, %626, %cst_250 [1] : vector<8x8xf32> to vector<8xf32>
    %628 = vector.shape_cast %627 : vector<8xf32> to vector<8x1xf32>
    %629 = vector.broadcast %628 : vector<8x1xf32> to vector<8x8xf32>
    %630 = arith.subf %626, %629 : vector<8x8xf32>
    %631 = math.exp %630 : vector<8x8xf32>
    %cst_251 = arith.constant dense<0.000000e+00> : vector<8xf32>
    %632 = vector.multi_reduction <add>, %631, %cst_251 [1] : vector<8x8xf32> to vector<8xf32>
    %633 = vector.shape_cast %632 : vector<8xf32> to vector<8x1xf32>
    %634 = tpu.reciprocal %633 {approx = true} : vector<8x1xf32> -> vector<8x1xf32>
    %635 = vector.broadcast %634 : vector<8x1xf32> to vector<8x8xf32>
    %636 = arith.mulf %631, %635 : vector<8x8xf32>
    %cst_252 = arith.constant 0xFF800000 : f32
    %637 = vector.broadcast %cst_252 : f32 to vector<8x8xf32>
    %638 = arith.select %4, %637, %636 : vector<8x8xi1>, vector<8x8xf32>
    %cst_253 = arith.constant dense<0xFF800000> : vector<8xf32>
    %639 = vector.multi_reduction <maximumf>, %638, %cst_253 [1] : vector<8x8xf32> to vector<8xf32>
    %640 = vector.shape_cast %639 : vector<8xf32> to vector<8x1xf32>
    %641 = vector.broadcast %640 : vector<8x1xf32> to vector<8x8xf32>
    %642 = arith.subf %638, %641 : vector<8x8xf32>
    %643 = math.exp %642 : vector<8x8xf32>
    %cst_254 = arith.constant dense<0.000000e+00> : vector<8xf32>
    %644 = vector.multi_reduction <add>, %643, %cst_254 [1] : vector<8x8xf32> to vector<8xf32>
    %645 = vector.shape_cast %644 : vector<8xf32> to vector<8x1xf32>
    %646 = vector.broadcast %645 : vector<8x1xf32> to vector<8x8xf32>
    %647 = arith.divf %643, %646 : vector<8x8xf32>
    %c5_255 = arith.constant 5 : index
    %c1_256 = arith.constant 1 : index
    %c0_257 = arith.constant 0 : index
    %c0_258 = arith.constant 0 : index
    %648 = vector.load %arg12[%c5_255, %c1_256, %c0_257, %c0_258] : memref<8x2x8x8xf32, #tpu.memory_space<vmem>>, vector<1x1x8x8xf32>
    %649 = vector.shape_cast %648 : vector<1x1x8x8xf32> to vector<8x8xf32>
    %650 = vector.shape_cast %647 : vector<8x8xf32> to vector<1x1x8x8xf32>
    tpu.vector_store %arg12[%c5_255, %c1_256, %c0_257, %c0_258], %650 {strides = array<i32>} : memref<8x2x8x8xf32, #tpu.memory_space<vmem>>, vector<1x1x8x8xf32>,
    %cst_259 = arith.constant dense<0.000000e+00> : vector<8x32xf32>
    %651 = tpu.matmul %636, %619, %cst_259 {dimension_numbers = #tpu.dot_dimension_numbers<[1], [0], [0], [1], [0, 0, 1, 1], [], []>} : vector<8x8xf32>, vector<8x32xf32>, vector<8x32xf32> -> vector<8x32xf32>
    %c2_260 = arith.constant 2 : index
    %c32_261 = arith.constant 32 : index
    %c0_262 = arith.constant 0 : index
    %652 = vector.load %arg5[%c2_260, %c32_261, %c0_262] : memref<4x64x64xf32, #tpu.memory_space<vmem>>, vector<1x32x64xf32>
    %653 = vector.shape_cast %652 : vector<1x32x64xf32> to vector<32x64xf32>
    %cst_263 = arith.constant dense<0.000000e+00> : vector<8x64xf32>
    %654 = tpu.matmul %651, %653, %cst_263 {dimension_numbers = #tpu.dot_dimension_numbers<[1], [0], [0], [1], [0, 0, 1, 1], [], []>} : vector<8x32xf32>, vector<32x64xf32>, vector<8x64xf32> -> vector<8x64xf32>
    %655 = arith.addf %616, %654 : vector<8x64xf32>
    %656 = tpu.concatenate %578, %655 in 0 : vector<8x64xf32>, vector<8x64xf32> -> vector<16x64xf32>
    %657 = arith.addf %464, %656 : vector<16x64xf32>
    %658 = vector.broadcast %469 : vector<1x64xf32> to vector<16x64xf32>
    %659 = arith.addf %657, %658 : vector<16x64xf32>
    %cst_264 = arith.constant dense<0.000000e+00> : vector<16xf32>
    %660 = vector.multi_reduction <add>, %659, %cst_264 [1] : vector<16x64xf32> to vector<16xf32>
    %661 = vector.shape_cast %660 : vector<16xf32> to vector<16x1xf32>
    %cst_265 = arith.constant 6.400000e+01 : f32
    %662 = vector.broadcast %cst_265 : f32 to vector<16x1xf32>
    %663 = arith.divf %661, %662 : vector<16x1xf32>
    %664 = vector.broadcast %663 : vector<16x1xf32> to vector<16x64xf32>
    %665 = arith.subf %659, %664 : vector<16x64xf32>
    %666 = arith.mulf %665, %665 : vector<16x64xf32>
    %cst_266 = arith.constant dense<0.000000e+00> : vector<16xf32>
    %667 = vector.multi_reduction <add>, %666, %cst_266 [1] : vector<16x64xf32> to vector<16xf32>
    %668 = vector.shape_cast %667 : vector<16xf32> to vector<16x1xf32>
    %cst_267 = arith.constant 6.400000e+01 : f32
    %669 = vector.broadcast %cst_267 : f32 to vector<16x1xf32>
    %670 = arith.divf %668, %669 : vector<16x1xf32>
    %671 = vector.broadcast %663 : vector<16x1xf32> to vector<16x64xf32>
    %672 = arith.subf %659, %671 : vector<16x64xf32>
    %cst_268 = arith.constant 9.99999974E-6 : f32
    %673 = vector.broadcast %cst_268 : f32 to vector<16x1xf32>
    %674 = arith.addf %670, %673 : vector<16x1xf32>
    %675 = math.rsqrt %674 : vector<16x1xf32>
    %676 = vector.broadcast %675 : vector<16x1xf32> to vector<16x64xf32>
    %677 = arith.mulf %672, %676 : vector<16x64xf32>
    %678 = vector.broadcast %470 : vector<1x64xf32> to vector<16x64xf32>
    %679 = arith.mulf %677, %678 : vector<16x64xf32>
    %680 = vector.broadcast %471 : vector<1x64xf32> to vector<16x64xf32>
    %681 = arith.addf %679, %680 : vector<16x64xf32>
    %c2_269 = arith.constant 2 : index
    %c0_270 = arith.constant 0 : index
    %c0_271 = arith.constant 0 : index
    %682 = vector.load %arg6[%c2_269, %c0_270, %c0_271] : memref<4x64x256xf32, #tpu.memory_space<vmem>>, vector<1x64x256xf32>
    %683 = vector.shape_cast %682 : vector<1x64x256xf32> to vector<64x256xf32>
    %cst_272 = arith.constant dense<0.000000e+00> : vector<16x256xf32>
    %684 = tpu.matmul %681, %683, %cst_272 {dimension_numbers = #tpu.dot_dimension_numbers<[1], [0], [0], [1], [0, 0, 1, 1], [], []>} : vector<16x64xf32>, vector<64x256xf32>, vector<16x256xf32> -> vector<16x256xf32>
    %685 = vector.broadcast %473 : vector<1x256xf32> to vector<16x256xf32>
    %686 = arith.addf %684, %685 : vector<16x256xf32>
    %cst_273 = arith.constant 0.000000e+00 : f32
    %687 = vector.broadcast %cst_273 : f32 to vector<16x256xf32>
    %688 = arith.maximumf %686, %687 : vector<16x256xf32>
    %c2_274 = arith.constant 2 : index
    %c0_275 = arith.constant 0 : index
    %c0_276 = arith.constant 0 : index
    %689 = vector.load %arg7[%c2_274, %c0_275, %c0_276] : memref<4x256x64xf32, #tpu.memory_space<vmem>>, vector<1x256x64xf32>
    %690 = vector.shape_cast %689 : vector<1x256x64xf32> to vector<256x64xf32>
    %cst_277 = arith.constant dense<0.000000e+00> : vector<16x64xf32>
    %691 = tpu.matmul %688, %690, %cst_277 {dimension_numbers = #tpu.dot_dimension_numbers<[1], [0], [0], [1], [0, 0, 1, 1], [], []>} : vector<16x256xf32>, vector<256x64xf32>, vector<16x64xf32> -> vector<16x64xf32>
    %692 = vector.broadcast %472 : vector<1x64xf32> to vector<16x64xf32>
    %693 = arith.addf %691, %692 : vector<16x64xf32>
    %694 = arith.addf %659, %693 : vector<16x64xf32>
    %c3_278 = arith.constant 3 : index
    %c0_279 = arith.constant 0 : index
    %c0_280 = arith.constant 0 : index
    %695 = vector.load %arg8[%c3_278, %c0_279, %c0_280] : memref<4x8x256xf32, #tpu.memory_space<vmem>>, vector<1x8x256xf32>
    %696 = vector.shape_cast %695 : vector<1x8x256xf32> to vector<8x256xf32>
    %697 = vector.extract_strided_slice %696 {offsets = [0, 0], sizes = [1, 64], strides = [1, 1]} : vector<8x256xf32> to vector<1x64xf32>
    %698 = vector.extract_strided_slice %696 {offsets = [1, 0], sizes = [1, 64], strides = [1, 1]} : vector<8x256xf32> to vector<1x64xf32>
    %699 = vector.extract_strided_slice %696 {offsets = [2, 0], sizes = [1, 64], strides = [1, 1]} : vector<8x256xf32> to vector<1x64xf32>
    %700 = vector.extract_strided_slice %696 {offsets = [3, 0], sizes = [1, 64], strides = [1, 1]} : vector<8x256xf32> to vector<1x64xf32>
    %701 = vector.extract_strided_slice %696 {offsets = [4, 0], sizes = [1, 64], strides = [1, 1]} : vector<8x256xf32> to vector<1x64xf32>
    %702 = vector.extract_strided_slice %696 {offsets = [5, 0], sizes = [1, 64], strides = [1, 1]} : vector<8x256xf32> to vector<1x64xf32>
    %703 = vector.extract_strided_slice %696 {offsets = [6, 0], sizes = [1, 256], strides = [1, 1]} : vector<8x256xf32> to vector<1x256xf32>
    %cst_281 = arith.constant dense<0.000000e+00> : vector<16xf32>
    %704 = vector.multi_reduction <add>, %694, %cst_281 [1] : vector<16x64xf32> to vector<16xf32>
    %705 = vector.shape_cast %704 : vector<16xf32> to vector<16x1xf32>
    %cst_282 = arith.constant 6.400000e+01 : f32
    %706 = vector.broadcast %cst_282 : f32 to vector<16x1xf32>
    %707 = arith.divf %705, %706 : vector<16x1xf32>
    %708 = vector.broadcast %707 : vector<16x1xf32> to vector<16x64xf32>
    %709 = arith.subf %694, %708 : vector<16x64xf32>
    %710 = arith.mulf %709, %709 : vector<16x64xf32>
    %cst_283 = arith.constant dense<0.000000e+00> : vector<16xf32>
    %711 = vector.multi_reduction <add>, %710, %cst_283 [1] : vector<16x64xf32> to vector<16xf32>
    %712 = vector.shape_cast %711 : vector<16xf32> to vector<16x1xf32>
    %cst_284 = arith.constant 6.400000e+01 : f32
    %713 = vector.broadcast %cst_284 : f32 to vector<16x1xf32>
    %714 = arith.divf %712, %713 : vector<16x1xf32>
    %715 = vector.broadcast %707 : vector<16x1xf32> to vector<16x64xf32>
    %716 = arith.subf %694, %715 : vector<16x64xf32>
    %cst_285 = arith.constant 9.99999974E-6 : f32
    %717 = vector.broadcast %cst_285 : f32 to vector<16x1xf32>
    %718 = arith.addf %714, %717 : vector<16x1xf32>
    %719 = math.rsqrt %718 : vector<16x1xf32>
    %720 = vector.broadcast %719 : vector<16x1xf32> to vector<16x64xf32>
    %721 = arith.mulf %716, %720 : vector<16x64xf32>
    %722 = vector.broadcast %697 : vector<1x64xf32> to vector<16x64xf32>
    %723 = arith.mulf %721, %722 : vector<16x64xf32>
    %724 = vector.broadcast %698 : vector<1x64xf32> to vector<16x64xf32>
    %725 = arith.addf %723, %724 : vector<16x64xf32>
    %c3_286 = arith.constant 3 : index
    %c0_287 = arith.constant 0 : index
    %c0_288 = arith.constant 0 : index
    %726 = vector.load %arg3[%c3_286, %c0_287, %c0_288] : memref<4x64x192xf32, #tpu.memory_space<vmem>>, vector<1x64x192xf32>
    %727 = vector.shape_cast %726 : vector<1x64x192xf32> to vector<64x192xf32>
    %cst_289 = arith.constant dense<0.000000e+00> : vector<16x192xf32>
    %728 = tpu.matmul %725, %727, %cst_289 {dimension_numbers = #tpu.dot_dimension_numbers<[1], [0], [0], [1], [0, 0, 1, 1], [], []>} : vector<16x64xf32>, vector<64x192xf32>, vector<16x192xf32> -> vector<16x192xf32>
    %c3_290 = arith.constant 3 : index
    %c0_291 = arith.constant 0 : index
    %c0_292 = arith.constant 0 : index
    %729 = vector.load %arg4[%c3_290, %c0_291, %c0_292] : memref<4x64x128xf32, #tpu.memory_space<vmem>>, vector<1x64x128xf32>
    %730 = vector.shape_cast %729 : vector<1x64x128xf32> to vector<64x128xf32>
    %cst_293 = arith.constant dense<0.000000e+00> : vector<8x128xf32>
    %731 = tpu.matmul %1, %730, %cst_293 {dimension_numbers = #tpu.dot_dimension_numbers<[1], [0], [0], [1], [0, 0, 1, 1], [], []>} : vector<8x64xf32>, vector<64x128xf32>, vector<8x128xf32> -> vector<8x128xf32>
    %732 = vector.extract_strided_slice %728 {offsets = [0, 0], sizes = [8, 32], strides = [1, 1]} : vector<16x192xf32> to vector<8x32xf32>
    %733 = vector.extract_strided_slice %728 {offsets = [0, 64], sizes = [8, 32], strides = [1, 1]} : vector<16x192xf32> to vector<8x32xf32>
    %734 = vector.extract_strided_slice %728 {offsets = [0, 128], sizes = [8, 32], strides = [1, 1]} : vector<16x192xf32> to vector<8x32xf32>
    %735 = vector.extract_strided_slice %731 {offsets = [0, 0], sizes = [8, 32], strides = [1, 1]} : vector<8x128xf32> to vector<8x32xf32>
    %736 = vector.extract_strided_slice %731 {offsets = [0, 64], sizes = [8, 32], strides = [1, 1]} : vector<8x128xf32> to vector<8x32xf32>
    %737 = tpu.concatenate %732, %735 in 1 : vector<8x32xf32>, vector<8x32xf32> -> vector<8x64xf32>
    %738 = tpu.concatenate %733, %736 in 1 : vector<8x32xf32>, vector<8x32xf32> -> vector<8x64xf32>
    %cst_294 = arith.constant dense<0.000000e+00> : vector<8x8xf32>
    %739 = tpu.matmul %737, %738, %cst_294 {dimension_numbers = #tpu.dot_dimension_numbers<[1], [1], [0], [0], [0, 0, 1, 0], [], []>} : vector<8x64xf32>, vector<8x64xf32>, vector<8x8xf32> -> vector<8x8xf32>
    %cst_295 = arith.constant 0.176776692 : f32
    %740 = vector.broadcast %cst_295 : f32 to vector<8x8xf32>
    %741 = arith.mulf %739, %740 : vector<8x8xf32>
    %cst_296 = arith.constant dense<0xFF800000> : vector<8xf32>
    %742 = vector.multi_reduction <maximumf>, %741, %cst_296 [1] : vector<8x8xf32> to vector<8xf32>
    %743 = vector.shape_cast %742 : vector<8xf32> to vector<8x1xf32>
    %744 = vector.broadcast %743 : vector<8x1xf32> to vector<8x8xf32>
    %745 = arith.subf %741, %744 : vector<8x8xf32>
    %746 = math.exp %745 : vector<8x8xf32>
    %cst_297 = arith.constant dense<0.000000e+00> : vector<8xf32>
    %747 = vector.multi_reduction <add>, %746, %cst_297 [1] : vector<8x8xf32> to vector<8xf32>
    %748 = vector.shape_cast %747 : vector<8xf32> to vector<8x1xf32>
    %749 = tpu.reciprocal %748 {approx = true} : vector<8x1xf32> -> vector<8x1xf32>
    %750 = vector.broadcast %749 : vector<8x1xf32> to vector<8x8xf32>
    %751 = arith.mulf %746, %750 : vector<8x8xf32>
    %cst_298 = arith.constant 0xFF800000 : f32
    %752 = vector.broadcast %cst_298 : f32 to vector<8x8xf32>
    %753 = arith.select %4, %752, %751 : vector<8x8xi1>, vector<8x8xf32>
    %cst_299 = arith.constant dense<0xFF800000> : vector<8xf32>
    %754 = vector.multi_reduction <maximumf>, %753, %cst_299 [1] : vector<8x8xf32> to vector<8xf32>
    %755 = vector.shape_cast %754 : vector<8xf32> to vector<8x1xf32>
    %756 = vector.broadcast %755 : vector<8x1xf32> to vector<8x8xf32>
    %757 = arith.subf %753, %756 : vector<8x8xf32>
    %758 = math.exp %757 : vector<8x8xf32>
    %cst_300 = arith.constant dense<0.000000e+00> : vector<8xf32>
    %759 = vector.multi_reduction <add>, %758, %cst_300 [1] : vector<8x8xf32> to vector<8xf32>
    %760 = vector.shape_cast %759 : vector<8xf32> to vector<8x1xf32>
    %761 = vector.broadcast %760 : vector<8x1xf32> to vector<8x8xf32>
    %762 = arith.divf %758, %761 : vector<8x8xf32>
    %c6 = arith.constant 6 : index
    %c0_301 = arith.constant 0 : index
    %c0_302 = arith.constant 0 : index
    %c0_303 = arith.constant 0 : index
    %763 = vector.load %arg12[%c6, %c0_301, %c0_302, %c0_303] : memref<8x2x8x8xf32, #tpu.memory_space<vmem>>, vector<1x1x8x8xf32>
    %764 = vector.shape_cast %763 : vector<1x1x8x8xf32> to vector<8x8xf32>
    %765 = vector.shape_cast %762 : vector<8x8xf32> to vector<1x1x8x8xf32>
    tpu.vector_store %arg12[%c6, %c0_301, %c0_302, %c0_303], %765 {strides = array<i32>} : memref<8x2x8x8xf32, #tpu.memory_space<vmem>>, vector<1x1x8x8xf32>,
    %cst_304 = arith.constant dense<0.000000e+00> : vector<8x32xf32>
    %766 = tpu.matmul %751, %734, %cst_304 {dimension_numbers = #tpu.dot_dimension_numbers<[1], [0], [0], [1], [0, 0, 1, 1], [], []>} : vector<8x8xf32>, vector<8x32xf32>, vector<8x32xf32> -> vector<8x32xf32>
    %c3_305 = arith.constant 3 : index
    %c0_306 = arith.constant 0 : index
    %c0_307 = arith.constant 0 : index
    %767 = vector.load %arg5[%c3_305, %c0_306, %c0_307] : memref<4x64x64xf32, #tpu.memory_space<vmem>>, vector<1x32x64xf32>
    %768 = vector.shape_cast %767 : vector<1x32x64xf32> to vector<32x64xf32>
    %cst_308 = arith.constant dense<0.000000e+00> : vector<8x64xf32>
    %769 = tpu.matmul %766, %768, %cst_308 {dimension_numbers = #tpu.dot_dimension_numbers<[1], [0], [0], [1], [0, 0, 1, 1], [], []>} : vector<8x32xf32>, vector<32x64xf32>, vector<8x64xf32> -> vector<8x64xf32>
    %770 = vector.extract_strided_slice %728 {offsets = [0, 32], sizes = [8, 32], strides = [1, 1]} : vector<16x192xf32> to vector<8x32xf32>
    %771 = vector.extract_strided_slice %728 {offsets = [0, 96], sizes = [8, 32], strides = [1, 1]} : vector<16x192xf32> to vector<8x32xf32>
    %772 = vector.extract_strided_slice %728 {offsets = [0, 160], sizes = [8, 32], strides = [1, 1]} : vector<16x192xf32> to vector<8x32xf32>
    %773 = vector.extract_strided_slice %731 {offsets = [0, 32], sizes = [8, 32], strides = [1, 1]} : vector<8x128xf32> to vector<8x32xf32>
    %774 = vector.extract_strided_slice %731 {offsets = [0, 96], sizes = [8, 32], strides = [1, 1]} : vector<8x128xf32> to vector<8x32xf32>
    %775 = tpu.concatenate %770, %773 in 1 : vector<8x32xf32>, vector<8x32xf32> -> vector<8x64xf32>
    %776 = tpu.concatenate %771, %774 in 1 : vector<8x32xf32>, vector<8x32xf32> -> vector<8x64xf32>
    %cst_309 = arith.constant dense<0.000000e+00> : vector<8x8xf32>
    %777 = tpu.matmul %775, %776, %cst_309 {dimension_numbers = #tpu.dot_dimension_numbers<[1], [1], [0], [0], [0, 0, 1, 0], [], []>} : vector<8x64xf32>, vector<8x64xf32>, vector<8x8xf32> -> vector<8x8xf32>
    %cst_310 = arith.constant 0.176776692 : f32
    %778 = vector.broadcast %cst_310 : f32 to vector<8x8xf32>
    %779 = arith.mulf %777, %778 : vector<8x8xf32>
    %cst_311 = arith.constant dense<0xFF800000> : vector<8xf32>
    %780 = vector.multi_reduction <maximumf>, %779, %cst_311 [1] : vector<8x8xf32> to vector<8xf32>
    %781 = vector.shape_cast %780 : vector<8xf32> to vector<8x1xf32>
    %782 = vector.broadcast %781 : vector<8x1xf32> to vector<8x8xf32>
    %783 = arith.subf %779, %782 : vector<8x8xf32>
    %784 = math.exp %783 : vector<8x8xf32>
    %cst_312 = arith.constant dense<0.000000e+00> : vector<8xf32>
    %785 = vector.multi_reduction <add>, %784, %cst_312 [1] : vector<8x8xf32> to vector<8xf32>
    %786 = vector.shape_cast %785 : vector<8xf32> to vector<8x1xf32>
    %787 = tpu.reciprocal %786 {approx = true} : vector<8x1xf32> -> vector<8x1xf32>
    %788 = vector.broadcast %787 : vector<8x1xf32> to vector<8x8xf32>
    %789 = arith.mulf %784, %788 : vector<8x8xf32>
    %cst_313 = arith.constant 0xFF800000 : f32
    %790 = vector.broadcast %cst_313 : f32 to vector<8x8xf32>
    %791 = arith.select %4, %790, %789 : vector<8x8xi1>, vector<8x8xf32>
    %cst_314 = arith.constant dense<0xFF800000> : vector<8xf32>
    %792 = vector.multi_reduction <maximumf>, %791, %cst_314 [1] : vector<8x8xf32> to vector<8xf32>
    %793 = vector.shape_cast %792 : vector<8xf32> to vector<8x1xf32>
    %794 = vector.broadcast %793 : vector<8x1xf32> to vector<8x8xf32>
    %795 = arith.subf %791, %794 : vector<8x8xf32>
    %796 = math.exp %795 : vector<8x8xf32>
    %cst_315 = arith.constant dense<0.000000e+00> : vector<8xf32>
    %797 = vector.multi_reduction <add>, %796, %cst_315 [1] : vector<8x8xf32> to vector<8xf32>
    %798 = vector.shape_cast %797 : vector<8xf32> to vector<8x1xf32>
    %799 = vector.broadcast %798 : vector<8x1xf32> to vector<8x8xf32>
    %800 = arith.divf %796, %799 : vector<8x8xf32>
    %c7 = arith.constant 7 : index
    %c0_316 = arith.constant 0 : index
    %c0_317 = arith.constant 0 : index
    %c0_318 = arith.constant 0 : index
    %801 = vector.load %arg12[%c7, %c0_316, %c0_317, %c0_318] : memref<8x2x8x8xf32, #tpu.memory_space<vmem>>, vector<1x1x8x8xf32>
    %802 = vector.shape_cast %801 : vector<1x1x8x8xf32> to vector<8x8xf32>
    %803 = vector.shape_cast %800 : vector<8x8xf32> to vector<1x1x8x8xf32>
    tpu.vector_store %arg12[%c7, %c0_316, %c0_317, %c0_318], %803 {strides = array<i32>} : memref<8x2x8x8xf32, #tpu.memory_space<vmem>>, vector<1x1x8x8xf32>,
    %cst_319 = arith.constant dense<0.000000e+00> : vector<8x32xf32>
    %804 = tpu.matmul %789, %772, %cst_319 {dimension_numbers = #tpu.dot_dimension_numbers<[1], [0], [0], [1], [0, 0, 1, 1], [], []>} : vector<8x8xf32>, vector<8x32xf32>, vector<8x32xf32> -> vector<8x32xf32>
    %c3_320 = arith.constant 3 : index
    %c32_321 = arith.constant 32 : index
    %c0_322 = arith.constant 0 : index
    %805 = vector.load %arg5[%c3_320, %c32_321, %c0_322] : memref<4x64x64xf32, #tpu.memory_space<vmem>>, vector<1x32x64xf32>
    %806 = vector.shape_cast %805 : vector<1x32x64xf32> to vector<32x64xf32>
    %cst_323 = arith.constant dense<0.000000e+00> : vector<8x64xf32>
    %807 = tpu.matmul %804, %806, %cst_323 {dimension_numbers = #tpu.dot_dimension_numbers<[1], [0], [0], [1], [0, 0, 1, 1], [], []>} : vector<8x32xf32>, vector<32x64xf32>, vector<8x64xf32> -> vector<8x64xf32>
    %808 = arith.addf %769, %807 : vector<8x64xf32>
    %809 = vector.extract_strided_slice %728 {offsets = [8, 0], sizes = [8, 32], strides = [1, 1]} : vector<16x192xf32> to vector<8x32xf32>
    %810 = vector.extract_strided_slice %728 {offsets = [8, 64], sizes = [8, 32], strides = [1, 1]} : vector<16x192xf32> to vector<8x32xf32>
    %811 = vector.extract_strided_slice %728 {offsets = [8, 128], sizes = [8, 32], strides = [1, 1]} : vector<16x192xf32> to vector<8x32xf32>
    %812 = vector.extract_strided_slice %731 {offsets = [0, 0], sizes = [8, 32], strides = [1, 1]} : vector<8x128xf32> to vector<8x32xf32>
    %813 = vector.extract_strided_slice %731 {offsets = [0, 64], sizes = [8, 32], strides = [1, 1]} : vector<8x128xf32> to vector<8x32xf32>
    %814 = tpu.concatenate %809, %812 in 1 : vector<8x32xf32>, vector<8x32xf32> -> vector<8x64xf32>
    %815 = tpu.concatenate %810, %813 in 1 : vector<8x32xf32>, vector<8x32xf32> -> vector<8x64xf32>
    %cst_324 = arith.constant dense<0.000000e+00> : vector<8x8xf32>
    %816 = tpu.matmul %814, %815, %cst_324 {dimension_numbers = #tpu.dot_dimension_numbers<[1], [1], [0], [0], [0, 0, 1, 0], [], []>} : vector<8x64xf32>, vector<8x64xf32>, vector<8x8xf32> -> vector<8x8xf32>
    %cst_325 = arith.constant 0.176776692 : f32
    %817 = vector.broadcast %cst_325 : f32 to vector<8x8xf32>
    %818 = arith.mulf %816, %817 : vector<8x8xf32>
    %cst_326 = arith.constant dense<0xFF800000> : vector<8xf32>
    %819 = vector.multi_reduction <maximumf>, %818, %cst_326 [1] : vector<8x8xf32> to vector<8xf32>
    %820 = vector.shape_cast %819 : vector<8xf32> to vector<8x1xf32>
    %821 = vector.broadcast %820 : vector<8x1xf32> to vector<8x8xf32>
    %822 = arith.subf %818, %821 : vector<8x8xf32>
    %823 = math.exp %822 : vector<8x8xf32>
    %cst_327 = arith.constant dense<0.000000e+00> : vector<8xf32>
    %824 = vector.multi_reduction <add>, %823, %cst_327 [1] : vector<8x8xf32> to vector<8xf32>
    %825 = vector.shape_cast %824 : vector<8xf32> to vector<8x1xf32>
    %826 = tpu.reciprocal %825 {approx = true} : vector<8x1xf32> -> vector<8x1xf32>
    %827 = vector.broadcast %826 : vector<8x1xf32> to vector<8x8xf32>
    %828 = arith.mulf %823, %827 : vector<8x8xf32>
    %cst_328 = arith.constant 0xFF800000 : f32
    %829 = vector.broadcast %cst_328 : f32 to vector<8x8xf32>
    %830 = arith.select %4, %829, %828 : vector<8x8xi1>, vector<8x8xf32>
    %cst_329 = arith.constant dense<0xFF800000> : vector<8xf32>
    %831 = vector.multi_reduction <maximumf>, %830, %cst_329 [1] : vector<8x8xf32> to vector<8xf32>
    %832 = vector.shape_cast %831 : vector<8xf32> to vector<8x1xf32>
    %833 = vector.broadcast %832 : vector<8x1xf32> to vector<8x8xf32>
    %834 = arith.subf %830, %833 : vector<8x8xf32>
    %835 = math.exp %834 : vector<8x8xf32>
    %cst_330 = arith.constant dense<0.000000e+00> : vector<8xf32>
    %836 = vector.multi_reduction <add>, %835, %cst_330 [1] : vector<8x8xf32> to vector<8xf32>
    %837 = vector.shape_cast %836 : vector<8xf32> to vector<8x1xf32>
    %838 = vector.broadcast %837 : vector<8x1xf32> to vector<8x8xf32>
    %839 = arith.divf %835, %838 : vector<8x8xf32>
    %c6_331 = arith.constant 6 : index
    %c1_332 = arith.constant 1 : index
    %c0_333 = arith.constant 0 : index
    %c0_334 = arith.constant 0 : index
    %840 = vector.load %arg12[%c6_331, %c1_332, %c0_333, %c0_334] : memref<8x2x8x8xf32, #tpu.memory_space<vmem>>, vector<1x1x8x8xf32>
    %841 = vector.shape_cast %840 : vector<1x1x8x8xf32> to vector<8x8xf32>
    %842 = vector.shape_cast %839 : vector<8x8xf32> to vector<1x1x8x8xf32>
    tpu.vector_store %arg12[%c6_331, %c1_332, %c0_333, %c0_334], %842 {strides = array<i32>} : memref<8x2x8x8xf32, #tpu.memory_space<vmem>>, vector<1x1x8x8xf32>,
    %cst_335 = arith.constant dense<0.000000e+00> : vector<8x32xf32>
    %843 = tpu.matmul %828, %811, %cst_335 {dimension_numbers = #tpu.dot_dimension_numbers<[1], [0], [0], [1], [0, 0, 1, 1], [], []>} : vector<8x8xf32>, vector<8x32xf32>, vector<8x32xf32> -> vector<8x32xf32>
    %c3_336 = arith.constant 3 : index
    %c0_337 = arith.constant 0 : index
    %c0_338 = arith.constant 0 : index
    %844 = vector.load %arg5[%c3_336, %c0_337, %c0_338] : memref<4x64x64xf32, #tpu.memory_space<vmem>>, vector<1x32x64xf32>
    %845 = vector.shape_cast %844 : vector<1x32x64xf32> to vector<32x64xf32>
    %cst_339 = arith.constant dense<0.000000e+00> : vector<8x64xf32>
    %846 = tpu.matmul %843, %845, %cst_339 {dimension_numbers = #tpu.dot_dimension_numbers<[1], [0], [0], [1], [0, 0, 1, 1], [], []>} : vector<8x32xf32>, vector<32x64xf32>, vector<8x64xf32> -> vector<8x64xf32>
    %847 = vector.extract_strided_slice %728 {offsets = [8, 32], sizes = [8, 32], strides = [1, 1]} : vector<16x192xf32> to vector<8x32xf32>
    %848 = vector.extract_strided_slice %728 {offsets = [8, 96], sizes = [8, 32], strides = [1, 1]} : vector<16x192xf32> to vector<8x32xf32>
    %849 = vector.extract_strided_slice %728 {offsets = [8, 160], sizes = [8, 32], strides = [1, 1]} : vector<16x192xf32> to vector<8x32xf32>
    %850 = vector.extract_strided_slice %731 {offsets = [0, 32], sizes = [8, 32], strides = [1, 1]} : vector<8x128xf32> to vector<8x32xf32>
    %851 = vector.extract_strided_slice %731 {offsets = [0, 96], sizes = [8, 32], strides = [1, 1]} : vector<8x128xf32> to vector<8x32xf32>
    %852 = tpu.concatenate %847, %850 in 1 : vector<8x32xf32>, vector<8x32xf32> -> vector<8x64xf32>
    %853 = tpu.concatenate %848, %851 in 1 : vector<8x32xf32>, vector<8x32xf32> -> vector<8x64xf32>
    %cst_340 = arith.constant dense<0.000000e+00> : vector<8x8xf32>
    %854 = tpu.matmul %852, %853, %cst_340 {dimension_numbers = #tpu.dot_dimension_numbers<[1], [1], [0], [0], [0, 0, 1, 0], [], []>} : vector<8x64xf32>, vector<8x64xf32>, vector<8x8xf32> -> vector<8x8xf32>
    %cst_341 = arith.constant 0.176776692 : f32
    %855 = vector.broadcast %cst_341 : f32 to vector<8x8xf32>
    %856 = arith.mulf %854, %855 : vector<8x8xf32>
    %cst_342 = arith.constant dense<0xFF800000> : vector<8xf32>
    %857 = vector.multi_reduction <maximumf>, %856, %cst_342 [1] : vector<8x8xf32> to vector<8xf32>
    %858 = vector.shape_cast %857 : vector<8xf32> to vector<8x1xf32>
    %859 = vector.broadcast %858 : vector<8x1xf32> to vector<8x8xf32>
    %860 = arith.subf %856, %859 : vector<8x8xf32>
    %861 = math.exp %860 : vector<8x8xf32>
    %cst_343 = arith.constant dense<0.000000e+00> : vector<8xf32>
    %862 = vector.multi_reduction <add>, %861, %cst_343 [1] : vector<8x8xf32> to vector<8xf32>
    %863 = vector.shape_cast %862 : vector<8xf32> to vector<8x1xf32>
    %864 = tpu.reciprocal %863 {approx = true} : vector<8x1xf32> -> vector<8x1xf32>
    %865 = vector.broadcast %864 : vector<8x1xf32> to vector<8x8xf32>
    %866 = arith.mulf %861, %865 : vector<8x8xf32>
    %cst_344 = arith.constant 0xFF800000 : f32
    %867 = vector.broadcast %cst_344 : f32 to vector<8x8xf32>
    %868 = arith.select %4, %867, %866 : vector<8x8xi1>, vector<8x8xf32>
    %cst_345 = arith.constant dense<0xFF800000> : vector<8xf32>
    %869 = vector.multi_reduction <maximumf>, %868, %cst_345 [1] : vector<8x8xf32> to vector<8xf32>
    %870 = vector.shape_cast %869 : vector<8xf32> to vector<8x1xf32>
    %871 = vector.broadcast %870 : vector<8x1xf32> to vector<8x8xf32>
    %872 = arith.subf %868, %871 : vector<8x8xf32>
    %873 = math.exp %872 : vector<8x8xf32>
    %cst_346 = arith.constant dense<0.000000e+00> : vector<8xf32>
    %874 = vector.multi_reduction <add>, %873, %cst_346 [1] : vector<8x8xf32> to vector<8xf32>
    %875 = vector.shape_cast %874 : vector<8xf32> to vector<8x1xf32>
    %876 = vector.broadcast %875 : vector<8x1xf32> to vector<8x8xf32>
    %877 = arith.divf %873, %876 : vector<8x8xf32>
    %c7_347 = arith.constant 7 : index
    %c1_348 = arith.constant 1 : index
    %c0_349 = arith.constant 0 : index
    %c0_350 = arith.constant 0 : index
    %878 = vector.load %arg12[%c7_347, %c1_348, %c0_349, %c0_350] : memref<8x2x8x8xf32, #tpu.memory_space<vmem>>, vector<1x1x8x8xf32>
    %879 = vector.shape_cast %878 : vector<1x1x8x8xf32> to vector<8x8xf32>
    %880 = vector.shape_cast %877 : vector<8x8xf32> to vector<1x1x8x8xf32>
    tpu.vector_store %arg12[%c7_347, %c1_348, %c0_349, %c0_350], %880 {strides = array<i32>} : memref<8x2x8x8xf32, #tpu.memory_space<vmem>>, vector<1x1x8x8xf32>,
    %cst_351 = arith.constant dense<0.000000e+00> : vector<8x32xf32>
    %881 = tpu.matmul %866, %849, %cst_351 {dimension_numbers = #tpu.dot_dimension_numbers<[1], [0], [0], [1], [0, 0, 1, 1], [], []>} : vector<8x8xf32>, vector<8x32xf32>, vector<8x32xf32> -> vector<8x32xf32>
    %c3_352 = arith.constant 3 : index
    %c32_353 = arith.constant 32 : index
    %c0_354 = arith.constant 0 : index
    %882 = vector.load %arg5[%c3_352, %c32_353, %c0_354] : memref<4x64x64xf32, #tpu.memory_space<vmem>>, vector<1x32x64xf32>
    %883 = vector.shape_cast %882 : vector<1x32x64xf32> to vector<32x64xf32>
    %cst_355 = arith.constant dense<0.000000e+00> : vector<8x64xf32>
    %884 = tpu.matmul %881, %883, %cst_355 {dimension_numbers = #tpu.dot_dimension_numbers<[1], [0], [0], [1], [0, 0, 1, 1], [], []>} : vector<8x32xf32>, vector<32x64xf32>, vector<8x64xf32> -> vector<8x64xf32>
    %885 = arith.addf %846, %884 : vector<8x64xf32>
    %886 = tpu.concatenate %808, %885 in 0 : vector<8x64xf32>, vector<8x64xf32> -> vector<16x64xf32>
    %887 = arith.addf %694, %886 : vector<16x64xf32>
    %888 = vector.broadcast %699 : vector<1x64xf32> to vector<16x64xf32>
    %889 = arith.addf %887, %888 : vector<16x64xf32>
    %cst_356 = arith.constant dense<0.000000e+00> : vector<16xf32>
    %890 = vector.multi_reduction <add>, %889, %cst_356 [1] : vector<16x64xf32> to vector<16xf32>
    %891 = vector.shape_cast %890 : vector<16xf32> to vector<16x1xf32>
    %cst_357 = arith.constant 6.400000e+01 : f32
    %892 = vector.broadcast %cst_357 : f32 to vector<16x1xf32>
    %893 = arith.divf %891, %892 : vector<16x1xf32>
    %894 = vector.broadcast %893 : vector<16x1xf32> to vector<16x64xf32>
    %895 = arith.subf %889, %894 : vector<16x64xf32>
    %896 = arith.mulf %895, %895 : vector<16x64xf32>
    %cst_358 = arith.constant dense<0.000000e+00> : vector<16xf32>
    %897 = vector.multi_reduction <add>, %896, %cst_358 [1] : vector<16x64xf32> to vector<16xf32>
    %898 = vector.shape_cast %897 : vector<16xf32> to vector<16x1xf32>
    %cst_359 = arith.constant 6.400000e+01 : f32
    %899 = vector.broadcast %cst_359 : f32 to vector<16x1xf32>
    %900 = arith.divf %898, %899 : vector<16x1xf32>
    %901 = vector.broadcast %893 : vector<16x1xf32> to vector<16x64xf32>
    %902 = arith.subf %889, %901 : vector<16x64xf32>
    %cst_360 = arith.constant 9.99999974E-6 : f32
    %903 = vector.broadcast %cst_360 : f32 to vector<16x1xf32>
    %904 = arith.addf %900, %903 : vector<16x1xf32>
    %905 = math.rsqrt %904 : vector<16x1xf32>
    %906 = vector.broadcast %905 : vector<16x1xf32> to vector<16x64xf32>
    %907 = arith.mulf %902, %906 : vector<16x64xf32>
    %908 = vector.broadcast %700 : vector<1x64xf32> to vector<16x64xf32>
    %909 = arith.mulf %907, %908 : vector<16x64xf32>
    %910 = vector.broadcast %701 : vector<1x64xf32> to vector<16x64xf32>
    %911 = arith.addf %909, %910 : vector<16x64xf32>
    %c3_361 = arith.constant 3 : index
    %c0_362 = arith.constant 0 : index
    %c0_363 = arith.constant 0 : index
    %912 = vector.load %arg6[%c3_361, %c0_362, %c0_363] : memref<4x64x256xf32, #tpu.memory_space<vmem>>, vector<1x64x256xf32>
    %913 = vector.shape_cast %912 : vector<1x64x256xf32> to vector<64x256xf32>
    %cst_364 = arith.constant dense<0.000000e+00> : vector<16x256xf32>
    %914 = tpu.matmul %911, %913, %cst_364 {dimension_numbers = #tpu.dot_dimension_numbers<[1], [0], [0], [1], [0, 0, 1, 1], [], []>} : vector<16x64xf32>, vector<64x256xf32>, vector<16x256xf32> -> vector<16x256xf32>
    %915 = vector.broadcast %703 : vector<1x256xf32> to vector<16x256xf32>
    %916 = arith.addf %914, %915 : vector<16x256xf32>
    %cst_365 = arith.constant 0.000000e+00 : f32
    %917 = vector.broadcast %cst_365 : f32 to vector<16x256xf32>
    %918 = arith.maximumf %916, %917 : vector<16x256xf32>
    %c3_366 = arith.constant 3 : index
    %c0_367 = arith.constant 0 : index
    %c0_368 = arith.constant 0 : index
    %919 = vector.load %arg7[%c3_366, %c0_367, %c0_368] : memref<4x256x64xf32, #tpu.memory_space<vmem>>, vector<1x256x64xf32>
    %920 = vector.shape_cast %919 : vector<1x256x64xf32> to vector<256x64xf32>
    %cst_369 = arith.constant dense<0.000000e+00> : vector<16x64xf32>
    %921 = tpu.matmul %918, %920, %cst_369 {dimension_numbers = #tpu.dot_dimension_numbers<[1], [0], [0], [1], [0, 0, 1, 1], [], []>} : vector<16x256xf32>, vector<256x64xf32>, vector<16x64xf32> -> vector<16x64xf32>
    %922 = vector.broadcast %702 : vector<1x64xf32> to vector<16x64xf32>
    %923 = arith.addf %921, %922 : vector<16x64xf32>
    %924 = arith.addf %889, %923 : vector<16x64xf32>
    %c0_370 = arith.constant 0 : index
    %c0_371 = arith.constant 0 : index
    %925 = vector.load %arg10[%c0_370, %c0_371] : memref<8x128xf32, #tpu.memory_space<vmem>>, vector<8x128xf32>
    %926 = vector.extract_strided_slice %925 {offsets = [0, 0], sizes = [1, 64], strides = [1, 1]} : vector<8x128xf32> to vector<1x64xf32>
    %927 = vector.extract_strided_slice %925 {offsets = [1, 0], sizes = [1, 64], strides = [1, 1]} : vector<8x128xf32> to vector<1x64xf32>
    %928 = vector.extract_strided_slice %925 {offsets = [2, 0], sizes = [1, 128], strides = [1, 1]} : vector<8x128xf32> to vector<1x128xf32>
    %cst_372 = arith.constant dense<0.000000e+00> : vector<16xf32>
    %929 = vector.multi_reduction <add>, %924, %cst_372 [1] : vector<16x64xf32> to vector<16xf32>
    %930 = vector.shape_cast %929 : vector<16xf32> to vector<16x1xf32>
    %cst_373 = arith.constant 6.400000e+01 : f32
    %931 = vector.broadcast %cst_373 : f32 to vector<16x1xf32>
    %932 = arith.divf %930, %931 : vector<16x1xf32>
    %933 = vector.broadcast %932 : vector<16x1xf32> to vector<16x64xf32>
    %934 = arith.subf %924, %933 : vector<16x64xf32>
    %935 = arith.mulf %934, %934 : vector<16x64xf32>
    %cst_374 = arith.constant dense<0.000000e+00> : vector<16xf32>
    %936 = vector.multi_reduction <add>, %935, %cst_374 [1] : vector<16x64xf32> to vector<16xf32>
    %937 = vector.shape_cast %936 : vector<16xf32> to vector<16x1xf32>
    %cst_375 = arith.constant 6.400000e+01 : f32
    %938 = vector.broadcast %cst_375 : f32 to vector<16x1xf32>
    %939 = arith.divf %937, %938 : vector<16x1xf32>
    %940 = vector.broadcast %932 : vector<16x1xf32> to vector<16x64xf32>
    %941 = arith.subf %924, %940 : vector<16x64xf32>
    %cst_376 = arith.constant 9.99999974E-6 : f32
    %942 = vector.broadcast %cst_376 : f32 to vector<16x1xf32>
    %943 = arith.addf %939, %942 : vector<16x1xf32>
    %944 = math.rsqrt %943 : vector<16x1xf32>
    %945 = vector.broadcast %944 : vector<16x1xf32> to vector<16x64xf32>
    %946 = arith.mulf %941, %945 : vector<16x64xf32>
    %947 = vector.broadcast %926 : vector<1x64xf32> to vector<16x64xf32>
    %948 = arith.mulf %946, %947 : vector<16x64xf32>
    %949 = vector.broadcast %927 : vector<1x64xf32> to vector<16x64xf32>
    %950 = arith.addf %948, %949 : vector<16x64xf32>
    %c0_377 = arith.constant 0 : index
    %c0_378 = arith.constant 0 : index
    %951 = vector.load %arg9[%c0_377, %c0_378] : memref<64x128xf32, #tpu.memory_space<vmem>>, vector<64x128xf32>
    %cst_379 = arith.constant dense<0.000000e+00> : vector<16x128xf32>
    %952 = tpu.matmul %950, %951, %cst_379 {dimension_numbers = #tpu.dot_dimension_numbers<[1], [0], [0], [1], [0, 0, 1, 1], [], []>} : vector<16x64xf32>, vector<64x128xf32>, vector<16x128xf32> -> vector<16x128xf32>
    %953 = vector.broadcast %928 : vector<1x128xf32> to vector<16x128xf32>
    %954 = arith.addf %952, %953 : vector<16x128xf32>
    %c0_380 = arith.constant 0 : index
    %c0_381 = arith.constant 0 : index
    %955 = vector.load %arg11[%c0_380, %c0_381] : memref<16x128xf32, #tpu.memory_space<vmem>>, vector<16x128xf32>
    tpu.vector_store %arg11[%c0_380, %c0_381], %954 {strides = array<i32>} : memref<16x128xf32, #tpu.memory_space<vmem>>, vector<16x128xf32>,
    return
  }
  func.func @transform_0(%arg0: i32) -> (i32, i32) {
    %c0_i32 = arith.constant 0 : i32
    %c0_i32_0 = arith.constant 0 : i32
    return %arg0, %c0_i32 : i32, i32
  }
  func.func @transform_1(%arg0: i32) -> (i32, i32) {
    %c0_i32 = arith.constant 0 : i32
    %c0_i32_0 = arith.constant 0 : i32
    %c0_i32_1 = arith.constant 0 : i32
    return %c0_i32, %c0_i32_0 : i32, i32
  }
  func.func @transform_2(%arg0: i32) -> (i32, i32, i32) {
    %c0_i32 = arith.constant 0 : i32
    %c0_i32_0 = arith.constant 0 : i32
    %c0_i32_1 = arith.constant 0 : i32
    %c0_i32_2 = arith.constant 0 : i32
    return %c0_i32, %c0_i32_0, %c0_i32_1 : i32, i32, i32
  }
  func.func @transform_3(%arg0: i32) -> (i32, i32, i32) {
    %c0_i32 = arith.constant 0 : i32
    %c0_i32_0 = arith.constant 0 : i32
    %c0_i32_1 = arith.constant 0 : i32
    %c0_i32_2 = arith.constant 0 : i32
    return %c0_i32, %c0_i32_0, %c0_i32_1 : i32, i32, i32
  }
  func.func @transform_4(%arg0: i32) -> (i32, i32, i32) {
    %c0_i32 = arith.constant 0 : i32
    %c0_i32_0 = arith.constant 0 : i32
    %c0_i32_1 = arith.constant 0 : i32
    %c0_i32_2 = arith.constant 0 : i32
    return %c0_i32, %c0_i32_0, %c0_i32_1 : i32, i32, i32
  }
  func.func @transform_5(%arg0: i32) -> (i32, i32, i32) {
    %c0_i32 = arith.constant 0 : i32
    %c0_i32_0 = arith.constant 0 : i32
    %c0_i32_1 = arith.constant 0 : i32
    %c0_i32_2 = arith.constant 0 : i32
    return %c0_i32, %c0_i32_0, %c0_i32_1 : i32, i32, i32
  }
  func.func @transform_6(%arg0: i32) -> (i32, i32, i32) {
    %c0_i32 = arith.constant 0 : i32
    %c0_i32_0 = arith.constant 0 : i32
    %c0_i32_1 = arith.constant 0 : i32
    %c0_i32_2 = arith.constant 0 : i32
    return %c0_i32, %c0_i32_0, %c0_i32_1 : i32, i32, i32
  }
  func.func @transform_7(%arg0: i32) -> (i32, i32, i32) {
    %c0_i32 = arith.constant 0 : i32
    %c0_i32_0 = arith.constant 0 : i32
    %c0_i32_1 = arith.constant 0 : i32
    %c0_i32_2 = arith.constant 0 : i32
    return %c0_i32, %c0_i32_0, %c0_i32_1 : i32, i32, i32
  }
  func.func @transform_8(%arg0: i32) -> (i32, i32) {
    %c0_i32 = arith.constant 0 : i32
    %c0_i32_0 = arith.constant 0 : i32
    %c0_i32_1 = arith.constant 0 : i32
    return %c0_i32, %c0_i32_0 : i32, i32
  }
  func.func @transform_9(%arg0: i32) -> (i32, i32) {
    %c0_i32 = arith.constant 0 : i32
    %c0_i32_0 = arith.constant 0 : i32
    %c0_i32_1 = arith.constant 0 : i32
    return %c0_i32, %c0_i32_0 : i32, i32
  }
  func.func @transform_10(%arg0: i32) -> (i32, i32) {
    %c0_i32 = arith.constant 0 : i32
    %c0_i32_0 = arith.constant 0 : i32
    return %arg0, %c0_i32 : i32, i32
  }
  func.func @transform_11(%arg0: i32) -> (i32, i32, i32, i32) {
    %c0_i32 = arith.constant 0 : i32
    %c0_i32_0 = arith.constant 0 : i32
    %c0_i32_1 = arith.constant 0 : i32
    %c0_i32_2 = arith.constant 0 : i32
    return %c0_i32, %arg0, %c0_i32_0, %c0_i32_1 : i32, i32, i32, i32
  }
}

</mosaic_0001>

<bundles_post_ra>
// kernel: forward.1
= control target key start
LH: loop header
LB: loop body
LE: loop exit
PB: predicated region body
PF: predicated region fallthrough
CT: control target
= control target key end

     0   :  { %vm48_vm0 = vcmask 523264   ;;  %s6193_s0 = inlined_call_operand.vmem [shape: f32[16,64], index: 0, kind: input, shape index: {}]   ;;  %s6194_s1 = inlined_call_operand.vmem [shape: f32[8,64], index: 1, kind: input, shape index: {}]   ;;  %s6195_s2 = inlined_call_operand.vmem [shape: f32[4,64,192], index: 2, kind: input, shape index: {}]   ;;  %s6196_s3 = inlined_call_operand.vmem [shape: f32[4,64,128], index: 3, kind: input, shape index: {}]   ;;  %s6197_s4 = inlined_call_operand.vmem [shape: f32[4,64,64], index: 4, kind: input, shape index: {}]   ;;  %s6198_s5 = inlined_call_operand.vmem [shape: f32[4,64,256], index: 5, kind: input, shape index: {}]   ;;  %s6199_s6 = inlined_call_operand.vmem [shape: f32[4,256,64], index: 6, kind: input, shape index: {}]   ;;  %s6200_s7 = inlined_call_operand.vmem [shape: f32[4,8,256], index: 7, kind: input, shape index: {}]   ;;  %s6201_s8 = inlined_call_operand.vmem [shape: f32[64,128], index: 8, kind: input, shape index: {}]   ;;  %s6202_s9 = inlined_call_operand.vmem [shape: f32[8,128], index: 9, kind: input, shape index: {}]   ;;  %s6203_s10 = inlined_call_operand.hbm [shape: f32[16,128], index: 10, kind: output, shape index: {0}]   ;;  %s6204_s11 = inlined_call_operand.vmem [shape: f32[8,2,8,8], index: 11, kind: output, shape index: {1}]  }
   0x1   :  { %v4303_v0 = vld [vmem:[%s6193_s0] sm:$0xff] }
   0x2   :  { %17 = vsyncpa [#allocation3], 0  ;;  %v49_v1 = vsel %vm48_vm0, %v4303_v0, 0.0  ;;  %v4233_v2 = vmov 64.0   ;;  %v181_v3 = vld [vmem:[%s6196_s3 + $0x38] sm:$0xff]  ;;  %v180_v4 = vld [vmem:[%s6196_s3 + $0x30] sm:$0xff] }
   0x3   :  { %50 = vadd.xlane.f32.xlu0 %v49_v1  ;;  %4039 = vrcp.f32 %v4233_v2  ;;  %193 = vmatpush.msra.mxu2 %v181_v3  ;;  %v179_v5 = vld [vmem:[%s6196_s3 + $0x28] sm:$0xff]  ;;  %v178_v7 = vld [vmem:[%s6196_s3 + $0x20] sm:$0xff]  ;;  %v177_v9 = vld [vmem:[%s6196_s3 + $0x18] sm:$0xff]  ;;  %s4234_s12 = smov 32   ;;  %s4235_s15 = smov 64   ;;  %vm209_vm5 = vcmask 261120  }
   0x4   :  { %v176_v10 = vld [vmem:[%s6196_s3 + $0x10] sm:$0xff]  ;;  %v175_v12 = vld [vmem:[%s6196_s3 + $0x8] sm:$0xff]  ;;  %v174_v13 = vld [vmem:[%s6196_s3] sm:$0xff]  ;;  %s4236_s16 = smov 96   ;;  %vm246_vm6 = vcmask 64512   ;;  %s3629_s20 = sshll.u32 %s6203_s10, 4  ;;  %s3630_s20 = int_to_ptr.hbm [resolvable:$true] %s3629_s20 }
   0x5   :  { %194 = vmatpush.msra.mxu2 %v180_v4  ;;  %v40_v14 = vld [vmem:[%s6194_s1] sm:$0xff]  ;;  %v120_v23 = vld [vmem:[%s6195_s2 + $0x70] sm:$0xff]  ;;  %v121_v24 = vld [vmem:[%s6195_s2 + $0x78] sm:$0xff]  ;;  %s4239_s21 = smov 8  }
   0x6   :  { %136 = vmatpush.msra.mxu0 %v120_v23  ;;  %159 = vmatpush.msra.mxu1 %v121_v24  ;;  %v118_v25 = vld [vmem:[%s6195_s2 + $0x60] sm:$0xff]  ;;  %v119_v26 = vld [vmem:[%s6195_s2 + $0x68] sm:$0xff]  ;;  %v116_v27 = vld [vmem:[%s6195_s2 + $0x50] sm:$0xff] }
   0x7   :  { %195 = vmatpush.msra.mxu2 %v179_v5  ;;  %v117_v28 = vld [vmem:[%s6195_s2 + $0x58] sm:$0xff]  ;;  %v114_v29 = vld [vmem:[%s6195_s2 + $0x40] sm:$0xff]  ;;  %v115_v30 = vld [vmem:[%s6195_s2 + $0x48] sm:$0xff] }
   0x8   :  { %137 = vmatpush.msra.mxu0 %v118_v25  ;;  %160 = vmatpush.msra.mxu1 %v119_v26  ;;  %v112_v31 = vld [vmem:[%s6195_s2 + $0x30] sm:$0xff]  ;;  %v113_v32 = vld [vmem:[%s6195_s2 + $0x38] sm:$0xff]  ;;  %v110_v33 = vld [vmem:[%s6195_s2 + $0x20] sm:$0xff] }
   0x9   :  { %v4040_v6 = vpop.eup %4039  ;;  %196 = vmatpush.msra.mxu2 %v178_v7  ;;  %v111_v34 = vld [vmem:[%s6195_s2 + $0x28] sm:$0xff]  ;;  %v108_v35 = vld [vmem:[%s6195_s2 + $0x10] sm:$0xff]  ;;  %v109_v36 = vld [vmem:[%s6195_s2 + $0x18] sm:$0xff] }
   0xa   :  { %v56_v8 = vmul.f32 64.0, %v4040_v6  ;;  %vm60_vm1 = vweird.f32 %v4040_v6  ;;  %138 = vmatpush.msra.mxu0 %v116_v27  ;;  %161 = vmatpush.msra.mxu1 %v117_v28  ;;  %v106_v37 = vld [vmem:[%s6195_s2] sm:$0xff]  ;;  %v107_v38 = vld [vmem:[%s6195_s2 + $0x8] sm:$0xff] }
   0xb   :  { %197 = vmatpush.msra.mxu2 %v177_v9  ;;  %v4396_v48 = vld [vmem:[%s6200_s7] sm:$0xff]  ;;  %v4412_v57 = vld [vmem:[%s6193_s0 + $0x8] sm:$0xff] }
   0xc   :  { %v57_v11 = vsub.f32 1.0, %v56_v8  ;;  %139 = vmatpush.msra.mxu0 %v114_v29  ;;  %162 = vmatpush.msra.mxu1 %v115_v30  ;;  %v100_v50 = vperm.slane %v4396_v48, 0  ;;  %v103_v53 = vperm.slane %v4396_v48, 1  ;;  %v52_v58 = vsel %vm48_vm0, %v4412_v57, 0.0 }
   0xd   :  { %198 = vmatpush.msra.mxu2 %v176_v10 }
   0xe   :  { %v58_v15 = vmul.f32 %v4040_v6, %v57_v11  ;;  %140 = vmatpush.msra.mxu0 %v112_v31  ;;  %163 = vmatpush.msra.mxu1 %v113_v32 }
   0xf   :  { %199 = vmatpush.msra.mxu2 %v175_v12 }
  0x10   :  { %v59_v16 = vadd.f32 %v4040_v6, %v58_v15  ;;  %141 = vmatpush.msra.mxu0 %v110_v33  ;;  %164 = vmatpush.msra.mxu1 %v111_v34 }
  0x11   :  { %200 = vmatpush.msra.mxu2 %v174_v13 }
  0x12   :  { %3649 = vmatmul.msk.f32.vlgmr.msra.gmra.mxu2 %vm48_vm0, %v40_v14  ;;  %v4335_v17 = vsel %vm60_vm1, %v4040_v6, %v59_v16  ;;  %142 = vmatpush.msra.mxu0 %v108_v35 }
  0x13   :  { %165 = vmatpush.msra.mxu1 %v109_v36 }
  0x14   :  { %143 = vmatpush.msra.mxu0 %v106_v37 }
  0x15   :  { %166 = vmatpush.msra.mxu1 %v107_v38 }
  0x76   :  { %v51_v18 = vpop.xlane.xlu0 %50 }
  0x77   :  { %v62_v19 = vmul.f32 %v4335_v17, %v51_v18 }
  0x79   :  { %v64_v20 = vsub.f32 %v4303_v0, %v62_v19 }
  0x7b   :  { %v66_v21 = vmul.f32 %v64_v20, %v64_v20 }
  0x7d   :  { %v68_v22 = vsel %vm48_vm0, %v66_v21, 0.0 }
  0x7e   :  { %69 = vadd.xlane.f32.xlu0 %v68_v22 }
  0x95   :  { %v4388_v40 = vpop.f32.mrf.mxu2 }
  0x96   :  { %206 = vrot.lane.b32.xlu2 %v4388_v40, %s4234_s12 }
  0xf0   :  { %v4418_v61 = vpop.permute.xlu2 %206 }
  0xf1   :  { %v70_v39 = vpop.xlane.xlu0 %69 }
  0xf2   :  { %v74_v41 = vmul.f32 %v70_v39, %v4335_v17 }
  0xf4   :  { %v76_v42 = vadd.f32 1e-05, %v74_v41 }
  0xf6   :  { %4041 = vrsqrt.f32 %v76_v42  ;;  %vm84_vm3 = vweird.f32 %v76_v42 }
  0xfc   :  { %v4042_v43 = vpop.eup %4041 }
  0xfd   :  { %v79_v44 = vmul.f32 %v4042_v43, %v76_v42  ;;  %vm85_vm2 = vweird.f32 %v4042_v43 }
  0xfe   :  { %vm86_vm4 = vmor %vm84_vm3, %vm85_vm2 }
  0xff   :  { %v80_v45 = vmul.f32 %v4042_v43, %v79_v44 }
 0x101   :  { %v81_v46 = vmul.f32 0.5, %v80_v45 }
 0x103   :  { %v82_v47 = vsub.f32 1.5, %v81_v46 }
 0x105   :  { %v83_v49 = vmul.f32 %v4042_v43, %v82_v47 }
 0x107   :  { %v87_v51 = vsel %vm86_vm4, %v4042_v43, %v83_v49  ;;  %v417_v49 = vld [vmem:[%s6197_s4 + $0x38] sm:$0xff] }
 0x108   :  { %v98_v52 = vmul.f32 %v87_v51, %v64_v20  ;;  %681 = vmatpush.msrb.mxu1 %v417_v49  ;;  %v415_v51 = vld [vmem:[%s6197_s4 + $0x28] sm:$0xff] }
 0x10a   :  { %v101_v54 = vmul.f32 %v100_v50, %v98_v52  ;;  %v414_v52 = vld [vmem:[%s6197_s4 + $0x20] sm:$0xff] }
 0x10c   :  { %v104_v55 = vadd.f32 %v103_v53, %v101_v54  ;;  %v309_v54 = vld [vmem:[%s6197_s4 + $0x10] sm:$0xff] }
 0x10e   :  { %3645 = vmatmul.msk.f32.vlgmr.msra.gmra.mxu0 %vm48_vm0, %v104_v55  ;;  %3647 = vmatmul.msk.f32.vlgmr.msra.gmra.mxu1 %vm48_vm0, %v104_v55  ;;  %v308_v55 = vld [vmem:[%s6197_s4 + $0x8] sm:$0xff] }
 0x18b   :  { %v145_v56 = vpop.f32.mrf.mxu0  ;;  %v4422_v63 = vpop.f32.mrf.mxu1 }
 0x18c   :  { %212 = vrot.lane.b32.xlu1 %v145_v56, %s4235_s15  ;;  %v210_v1 = vsel %vm209_vm5, %v145_v56, %v4418_v61 }
 0x194   :  { %215 = vrot.lane.b32.xlu1 %v4388_v40, %s4236_s16 }
 0x19c   :  { %315 = vrot.lane.b32.xlu1 %v145_v56, %s4234_s12 }
 0x1a4   :  { %311 = vrot.lane.b32.xlu1 %v145_v56, %s4236_s16 }
 0x1ce   :  { %53 = vadd.xlane.f32.xlu1 %v52_v58 }
 0x1fe   :  { %v213_v59 = vpop.permute.xlu1 %212 }
 0x206   :  { %v4416_v60 = vpop.permute.xlu1 %215 }
 0x207   :  { %v218_v62 = vsel %vm209_vm5, %v213_v59, %v4416_v60 }
 0x208   :  { %3650 = vmatpush.xpose.msk.msra.mxu3 %vm48_vm0, %v218_v62 }
 0x20b   :  { %3651 = vmatmul.msk.f32.vlgmr.msra.gmra.mxu3 %vm48_vm0, %v210_v1  ;;  %v307_v1 = vld [vmem:[%s6197_s4] sm:$0xff] }
 0x20c   :  { %302 = vmatpush.msrb.mxu3 %v4422_v63 }
 0x20e   :  { %v316_v2 = vpop.permute.xlu1 %315 }
 0x216   :  { %v312_v3 = vpop.permute.xlu1 %311 }
 0x217   :  { %v314_v36 = vsel %vm209_vm5, %v312_v3, %v4388_v40 }
 0x241   :  { %v54_v4 = vpop.xlane.xlu1 %53 }
 0x242   :  { %v63_v5 = vmul.f32 %v4335_v17, %v54_v4 }
 0x244   :  { %v65_v8 = vsub.f32 %v4412_v57, %v63_v5 }
 0x246   :  { %v67_v10 = vmul.f32 %v65_v8, %v65_v8 }
 0x248   :  { %v71_v11 = vsel %vm48_vm0, %v67_v10, 0.0 }
 0x28e   :  { %v242_v6 = vpop.f32.mrf.mxu3 }
 0x28f   :  { %v245_v7 = vmul.f32 0.17677669, %v242_v6 }
 0x291   :  { %v247_v9 = vsel %vm246_vm6, %v245_v7, -inf }
 0x292   :  { %248 = vmax.xlane.f32.xlu2 %v247_v9 }
 0x29a   :  { %72 = vadd.xlane.f32.xlu2 %v71_v11 }
 0x305   :  { %v249_v12 = vpop.xlane.xlu2 %248 }
 0x306   :  { %v250_v13 = vsub.f32 %v245_v7, %v249_v12 }
 0x308   :  { %v251_v14 = vmul.f32 1.442695, %v250_v13 }
 0x30a   :  { %4043 = vpow2.f32 %v251_v14 }
 0x30d   :  { %v73_v15 = vpop.xlane.xlu2 %72 }
 0x30e   :  { %v75_v16 = vmul.f32 %v73_v15, %v4335_v17 }
 0x310   :  { %v4044_v18 = vpop.eup %4043  ;;  %v77_v19 = vadd.f32 1e-05, %v75_v16 }
 0x311   :  { %v253_v20 = vsel %vm246_vm6, %v4044_v18, 0.0 }
 0x312   :  { %4045 = vrsqrt.f32 %v77_v19  ;;  %254 = vadd.xlane.f32.xlu0 %v253_v20  ;;  %vm94_vm7 = vweird.f32 %v77_v19 }
 0x318   :  { %v4046_v21 = vpop.eup %4045 }
 0x319   :  { %v89_v22 = vmul.f32 %v4046_v21, %v77_v19  ;;  %vm95_vm8 = vweird.f32 %v4046_v21 }
 0x31a   :  { %vm96_vm9 = vmor %vm94_vm7, %vm95_vm8 }
 0x31b   :  { %v90_v23 = vmul.f32 %v4046_v21, %v89_v22 }
 0x31d   :  { %v91_v24 = vmul.f32 0.5, %v90_v23 }
 0x31f   :  { %v92_v25 = vsub.f32 1.5, %v91_v24 }
 0x321   :  { %v93_v26 = vmul.f32 %v4046_v21, %v92_v25 }
 0x323   :  { %v97_v27 = vsel %vm96_vm9, %v4046_v21, %v93_v26 }
 0x324   :  { %v99_v28 = vmul.f32 %v97_v27, %v65_v8  ;;  %v714_v27 = vperm.slane %v4396_v48, 2 }
 0x326   :  { %318 = vrot.lane.b32.xlu0 %v4388_v40, %s4235_s15  ;;  %v102_v29 = vmul.f32 %v100_v50, %v99_v28  ;;  %v416_v50 = vld [vmem:[%s6197_s4 + $0x30] sm:$0xff] }
 0x327   :  { %682 = vmatpush.msrb.mxu1 %v416_v50 }
 0x328   :  { %v105_v30 = vadd.f32 %v103_v53, %v102_v29  ;;  %v310_v53 = vld [vmem:[%s6197_s4 + $0x18] sm:$0xff] }
 0x329   :  { %683 = vmatpush.msrb.mxu1 %v415_v51 }
 0x32a   :  { %3646 = vmatmul.msk.f32.gmra.mxu0 %vm48_vm0, %v105_v30  ;;  %3648 = vmatmul.msk.f32.gmra.mxu1 %vm48_vm0, %v105_v30 }
 0x32b   :  { %684 = vmatpush.msrb.mxu1 %v414_v52 }
 0x385   :  { %v255_v31 = vpop.xlane.xlu0 %254 }
 0x386   :  { %4047 = vrcp.f32 %v255_v31 }
 0x38c   :  { %v4048_v32 = vpop.eup %4047 }
 0x38d   :  { %v4441_v33 = vmul.f32 %v4048_v32, %v4044_v18 }
 0x38f   :  { %3652 = vmatmul.msk.f32.vlgmr.msrb.gmra.mxu3 %vm246_vm6, %v4441_v33 }
 0x398   :  { %v319_v34 = vpop.permute.xlu0 %318 }
 0x399   :  { %v321_v35 = vsel %vm209_vm5, %v316_v2, %v319_v34 }
 0x39a   :  { %3653 = vmatpush.xpose.msk.msra.mxu3 %vm48_vm0, %v321_v35 }
 0x39d   :  { %3654 = vmatmul.msk.f32.vlgmr.msra.gmra.mxu3 %vm48_vm0, %v314_v36 }
 0x39e   :  { %433 = vmatpush.msrb.mxu3 %v417_v49  ;;  %v777_v49 = vld [vmem:[%s6198_s5 + $0x50] sm:$0xff] }
 0x3a0   :  { %434 = vmatpush.msrb.mxu3 %v416_v50  ;;  %v778_v50 = vld [vmem:[%s6198_s5 + $0x58] sm:$0xff] }
 0x3a2   :  { %435 = vmatpush.msrb.mxu3 %v415_v51  ;;  %v775_v51 = vld [vmem:[%s6198_s5 + $0x40] sm:$0xff] }
 0x3a4   :  { %436 = vmatpush.msrb.mxu3 %v414_v52  ;;  %v776_v52 = vld [vmem:[%s6198_s5 + $0x48] sm:$0xff] }
 0x3a6   :  { %456 = vmatpush.msra.mxu3 %v310_v53 }
 0x3a7   :  { %v148_v37 = vpop.f32.mrf.mxu0 }
 0x3a8   :  { %466 = vrot.lane.b32.xlu1 %v148_v37, %s4235_s15  ;;  %457 = vmatpush.msra.mxu3 %v309_v54  ;;  %v464_v7 = vsel %vm209_vm5, %v148_v37, %v4418_v61 }
 0x3aa   :  { %458 = vmatpush.msra.mxu3 %v308_v55 }
 0x3ac   :  { %459 = vmatpush.msra.mxu3 %v307_v1 }
 0x412   :  { %v304_v38 = vpop.f32.mrf.mxu3 }
 0x41a   :  { %v467_v2 = vpop.permute.xlu1 %466 }
 0x41b   :  { %v469_v4 = vsel %vm209_vm5, %v467_v2, %v4416_v60  ;;  %v872_v2 = vld [vmem:[%s6199_s6 + $0xf8] sm:$0xff] }
 0x420   :  { %v345_v39 = vpop.f32.mrf.mxu3 }
 0x421   :  { %v348_v41 = vmul.f32 0.17677669, %v345_v39 }
 0x423   :  { %v349_v42 = vsel %vm246_vm6, %v348_v41, -inf }
 0x424   :  { %350 = vmax.xlane.f32.xlu0 %v349_v42 }
 0x438   :  { %566 = vrot.lane.b32.xlu0 %v148_v37, %s4234_s12 }
 0x497   :  { %v351_v43 = vpop.xlane.xlu0 %350 }
 0x498   :  { %v352_v44 = vsub.f32 %v348_v41, %v351_v43 }
 0x49a   :  { %v353_v45 = vmul.f32 1.442695, %v352_v44  ;;  %v781_v44 = vld [vmem:[%s6198_s5 + $0x70] sm:$0xff] }
 0x49c   :  { %4049 = vpow2.f32 %v353_v45  ;;  %v782_v45 = vld [vmem:[%s6198_s5 + $0x78] sm:$0xff] }
 0x4a2   :  { %v4050_v46 = vpop.eup %4049 }
 0x4a3   :  { %v355_v47 = vsel %vm246_vm6, %v4050_v46, 0.0 }
 0x4a4   :  { %356 = vadd.xlane.f32.xlu2 %v355_v47  ;;  %v780_v47 = vld [vmem:[%s6198_s5 + $0x68] sm:$0xff] }
 0x4aa   :  { %v567_v5 = vpop.permute.xlu0 %566 }
 0x4ab   :  { %v569_v6 = vsel %vm209_vm5, %v567_v5, %v319_v34 }
 0x4bc   :  { %388 = vrot.lane.b32.xlu2 %v4422_v63, %s4236_s16  ;;  %v171_v63 = vpop.f32.mrf.mxu1 }
 0x4c4   :  { %562 = vrot.lane.b32.xlu2 %v148_v37, %s4236_s16 }
 0x517   :  { %v357_v56 = vpop.xlane.xlu2 %356 }
 0x518   :  { %4051 = vrcp.f32 %v357_v56  ;;  %v772_v56 = vld [vmem:[%s6198_s5 + $0x28] sm:$0xff] }
 0x51e   :  { %v4052_v58 = vpop.eup %4051 }
 0x51f   :  { %v389_v59 = vpop.permute.xlu2 %388  ;;  %v4478_v62 = vmul.f32 %v4052_v58, %v4050_v46  ;;  %v779_v46 = vld [vmem:[%s6198_s5 + $0x60] sm:$0xff]  ;;  %v769_v58 = vld [vmem:[%s6198_s5 + $0x10] sm:$0xff] }
 0x520   :  { %409 = vmatpush.msrb.mxu2 %v389_v59  ;;  %v770_v59 = vld [vmem:[%s6198_s5 + $0x18] sm:$0xff] }
 0x521   :  { %3656 = vmatmul.msk.f32.vlgmr.msrb.gmra.mxu2 %vm246_vm6, %v4478_v62 }
 0x522   :  { %553 = vmatpush.msra.mxu2 %v171_v63 }
 0x524   :  { %704 = vmatpush.msrb.mxu2 %v310_v53  ;;  %v773_v53 = vld [vmem:[%s6198_s5 + $0x30] sm:$0xff] }
 0x526   :  { %705 = vmatpush.msrb.mxu2 %v309_v54  ;;  %v774_v54 = vld [vmem:[%s6198_s5 + $0x38] sm:$0xff] }
 0x527   :  { %v563_v8 = vpop.permute.xlu2 %562 }
 0x528   :  { %706 = vmatpush.msrb.mxu2 %v308_v55  ;;  %v565_v60 = vsel %vm209_vm5, %v563_v8, %v4388_v40  ;;  %v771_v55 = vld [vmem:[%s6198_s5 + $0x20] sm:$0xff] }
 0x52a   :  { %707 = vmatpush.msrb.mxu2 %v307_v1  ;;  %v768_v1 = vld [vmem:[%s6198_s5 + $0x8] sm:$0xff] }
 0x5a4   :  { %v411_v3 = vpop.f32.mrf.mxu2 }
 0x5a5   :  { %3657 = vmatmul.msk.f32.vlgmr.msrb.gmra.mxu3 %vm209_vm5, %v411_v3 }
 0x5a6   :  { %3659 = vmatpush.xpose.msk.msrb.mxu3 %vm48_vm0, %v469_v4 }
 0x5ad   :  { %3658 = vmatmul.msk.f32.vlgmr.msra.gmra.mxu3 %vm209_vm5, %v304_v38 }
 0x5ae   :  { %3663 = vmatpush.xpose.msk.msra.mxu3 %vm48_vm0, %v569_v6 }
 0x5b5   :  { %3660 = vmatmul.msk.f32.vlgmr.msrb.gmra.mxu3 %vm48_vm0, %v464_v7 }
 0x5b6   :  { %799 = vmatpush.msrb.mxu3 %v781_v44  ;;  %v860_v44 = vld [vmem:[%s6199_s6 + $0x98] sm:$0xff] }
 0x5b8   :  { %800 = vmatpush.msrb.mxu3 %v779_v46  ;;  %v859_v46 = vld [vmem:[%s6199_s6 + $0x90] sm:$0xff] }
 0x5ba   :  { %801 = vmatpush.msrb.mxu3 %v777_v49  ;;  %v858_v49 = vld [vmem:[%s6199_s6 + $0x88] sm:$0xff] }
 0x5bc   :  { %802 = vmatpush.msrb.mxu3 %v775_v51  ;;  %v857_v51 = vld [vmem:[%s6199_s6 + $0x80] sm:$0xff] }
 0x5bd   :  { %3664 = vmatmul.msk.f32.vlgmr.msra.gmra.mxu3 %vm48_vm0, %v565_v60 }
 0x5be   :  { %803 = vmatpush.msrb.mxu3 %v773_v53  ;;  %v842_v53 = vld [vmem:[%s6199_s6 + $0x8] sm:$0xff] }
 0x5c0   :  { %804 = vmatpush.msrb.mxu3 %v771_v55 }
 0x5c2   :  { %805 = vmatpush.msrb.mxu3 %v769_v58 }
 0x628   :  { %v438_v9 = vpop.f32.mrf.mxu3 }
 0x630   :  { %v461_v10 = vpop.f32.mrf.mxu3 }
 0x631   :  { %v462_v11 = vadd.f32 %v461_v10, %v438_v9 }
 0x633   :  { %v712_v26 = vadd.f32 %v462_v11, %v4303_v0 }
 0x635   :  { %v4507_v29 = vadd.f32 %v714_v27, %v712_v26  ;;  %v853_v26 = vld [vmem:[%s6199_s6 + $0x60] sm:$0xff] }
 0x637   :  { %v717_v30 = vsel %vm48_vm0, %v4507_v29, 0.0 }
 0x638   :  { %v493_v12 = vpop.f32.mrf.mxu3 }
 0x639   :  { %v496_v13 = vmul.f32 0.17677669, %v493_v12 }
 0x63b   :  { %v497_v14 = vsel %vm246_vm6, %v496_v13, -inf }
 0x63c   :  { %498 = vmax.xlane.f32.xlu2 %v497_v14 }
 0x640   :  { %v593_v15 = vpop.f32.mrf.mxu3 }
 0x641   :  { %v596_v16 = vmul.f32 0.17677669, %v593_v15 }
 0x643   :  { %v597_v61 = vsel %vm246_vm6, %v596_v16, -inf }
 0x644   :  { %598 = vmax.xlane.f32.xlu1 %v597_v61 }
 0x65d   :  { %636 = vrot.lane.b32.xlu1 %v171_v63, %s4236_s16  ;;  %v767_v63 = vld [vmem:[%s6198_s5] sm:$0xff] }
 0x65e   :  { %806 = vmatpush.msrb.mxu3 %v767_v63 }
 0x6af   :  { %v499_v18 = vpop.xlane.xlu2 %498 }
 0x6b0   :  { %v500_v19 = vsub.f32 %v496_v13, %v499_v18  ;;  %v761_v13 = vperm.slane %v4396_v48, 3 }
 0x6b2   :  { %v501_v40 = vmul.f32 1.442695, %v500_v19  ;;  %v871_v19 = vld [vmem:[%s6199_s6 + $0xf0] sm:$0xff] }
 0x6b4   :  { %4053 = vpow2.f32 %v501_v40  ;;  %v870_v40 = vld [vmem:[%s6199_s6 + $0xe8] sm:$0xff] }
 0x6b7   :  { %v599_v20 = vpop.xlane.xlu1 %598 }
 0x6b8   :  { %v600_v21 = vsub.f32 %v596_v16, %v599_v20  ;;  %v764_v16 = vperm.slane %v4396_v48, 4  ;;  %v856_v20 = vld [vmem:[%s6199_s6 + $0x78] sm:$0xff] }
 0x6b9   :  { %874 = vmatpush.msra.mxu1 %v856_v20 }
 0x6ba   :  { %v4054_v22 = vpop.eup %4053  ;;  %v601_v23 = vmul.f32 1.442695, %v600_v21  ;;  %v869_v21 = vld [vmem:[%s6199_s6 + $0xe0] sm:$0xff] }
 0x6bb   :  { %v503_v24 = vsel %vm246_vm6, %v4054_v22, 0.0 }
 0x6bc   :  { %4055 = vpow2.f32 %v601_v23  ;;  %504 = vadd.xlane.f32.xlu0 %v503_v24  ;;  %v868_v23 = vld [vmem:[%s6199_s6 + $0xd8] sm:$0xff]  ;;  %v854_v24 = vld [vmem:[%s6199_s6 + $0x68] sm:$0xff] }
 0x6c2   :  { %v4056_v25 = vpop.eup %4055 }
 0x6c3   :  { %v603_v28 = vsel %vm246_vm6, %v4056_v25, 0.0 }
 0x6c4   :  { %604 = vadd.xlane.f32.xlu2 %v603_v28  ;;  %v866_v28 = vld [vmem:[%s6199_s6 + $0xc8] sm:$0xff] }
 0x6cc   :  { %718 = vadd.xlane.f32.xlu2 %v717_v30  ;;  %v852_v30 = vld [vmem:[%s6199_s6 + $0x58] sm:$0xff] }
 0x6cf   :  { %v637_v31 = vpop.permute.xlu1 %636 }
 0x6d0   :  { %657 = vmatpush.msrb.mxu0 %v637_v31  ;;  %v865_v31 = vld [vmem:[%s6199_s6 + $0xc0] sm:$0xff] }
 0x6d2   :  { %822 = vmatpush.msra.mxu0 %v782_v45  ;;  %v846_v45 = vld [vmem:[%s6199_s6 + $0x28] sm:$0xff] }
 0x6d4   :  { %823 = vmatpush.msra.mxu0 %v780_v47  ;;  %v845_v47 = vld [vmem:[%s6199_s6 + $0x20] sm:$0xff] }
 0x6d6   :  { %824 = vmatpush.msra.mxu0 %v778_v50  ;;  %v844_v50 = vld [vmem:[%s6199_s6 + $0x18] sm:$0xff] }
 0x6d8   :  { %825 = vmatpush.msra.mxu0 %v776_v52  ;;  %v843_v52 = vld [vmem:[%s6199_s6 + $0x10] sm:$0xff] }
 0x6da   :  { %826 = vmatpush.msra.mxu0 %v774_v54  ;;  %v841_v54 = vld [vmem:[%s6199_s6] sm:$0xff] }
 0x6dc   :  { %827 = vmatpush.msra.mxu0 %v772_v56 }
 0x6de   :  { %828 = vmatpush.msra.mxu0 %v770_v59 }
 0x6e0   :  { %829 = vmatpush.msra.mxu0 %v768_v1 }
 0x72f   :  { %v505_v32 = vpop.xlane.xlu0 %504 }
 0x730   :  { %4057 = vrcp.f32 %v505_v32  ;;  %v851_v32 = vld [vmem:[%s6199_s6 + $0x50] sm:$0xff] }
 0x736   :  { %v4058_v34 = vpop.eup %4057 }
 0x737   :  { %v4511_v35 = vmul.f32 %v4058_v34, %v4054_v22  ;;  %v605_v0 = vpop.xlane.xlu2 %604  ;;  %v855_v22 = vld [vmem:[%s6199_s6 + $0x70] sm:$0xff]  ;;  %v864_v34 = vld [vmem:[%s6199_s6 + $0xb8] sm:$0xff] }
 0x738   :  { %4059 = vrcp.f32 %v605_v0  ;;  %875 = vmatpush.msra.mxu1 %v855_v22  ;;  %v850_v0 = vld [vmem:[%s6199_s6 + $0x48] sm:$0xff] }
 0x739   :  { %3662 = vmatmul.msk.f32.vlgmr.msra.gmra.mxu2 %vm246_vm6, %v4511_v35 }
 0x73a   :  { %897 = vmatpush.msra.mxu2 %v872_v2  ;;  %876 = vmatpush.msra.mxu1 %v854_v24  ;;  %v4687_v2 = vld [vmem:[%s6200_s7 + $0x8] sm:$0xff] }
 0x73c   :  { %898 = vmatpush.msra.mxu2 %v871_v19  ;;  %877 = vmatpush.msra.mxu1 %v853_v26 }
 0x73e   :  { %v4060_v36 = vpop.eup %4059  ;;  %899 = vmatpush.msra.mxu2 %v870_v40  ;;  %878 = vmatpush.msra.mxu1 %v852_v30 }
 0x73f   :  { %v719_v37 = vpop.xlane.xlu2 %718  ;;  %v4515_v38 = vmul.f32 %v4060_v36, %v4056_v25  ;;  %v867_v25 = vld [vmem:[%s6199_s6 + $0xd0] sm:$0xff] }
 0x740   :  { %v723_v39 = vmul.f32 %v719_v37, %v4335_v17  ;;  %900 = vmatpush.msra.mxu2 %v869_v21  ;;  %v863_v36 = vld [vmem:[%s6199_s6 + $0xb0] sm:$0xff]  ;;  %879 = vmatpush.msra.mxu1 %v851_v32  ;;  %v849_v37 = vld [vmem:[%s6199_s6 + $0x40] sm:$0xff] }
 0x741   :  { %3666 = vmatmul.msk.f32.vlgmr.msrb.gmra.mxu0 %vm246_vm6, %v4515_v38 }
 0x742   :  { %v725_v41 = vsub.f32 %v4507_v29, %v723_v39  ;;  %901 = vmatpush.msra.mxu2 %v868_v23  ;;  %v862_v39 = vld [vmem:[%s6199_s6 + $0xa8] sm:$0xff]  ;;  %880 = vmatpush.msra.mxu1 %v850_v0 }
 0x744   :  { %v727_v42 = vmul.f32 %v725_v41, %v725_v41  ;;  %902 = vmatpush.msra.mxu2 %v867_v25  ;;  %881 = vmatpush.msra.mxu1 %v849_v37 }
 0x746   :  { %v729_v43 = vsel %vm48_vm0, %v727_v42, 0.0  ;;  %903 = vmatpush.msra.mxu2 %v866_v28  ;;  %v861_v42 = vld [vmem:[%s6199_s6 + $0xa0] sm:$0xff] }
 0x747   :  { %730 = vadd.xlane.f32.xlu2 %v729_v43  ;;  %v847_v43 = vld [vmem:[%s6199_s6 + $0x30] sm:$0xff] }
 0x748   :  { %904 = vmatpush.msra.mxu2 %v865_v31 }
 0x74a   :  { %905 = vmatpush.msra.mxu2 %v864_v34 }
 0x74c   :  { %906 = vmatpush.msra.mxu2 %v863_v36 }
 0x74e   :  { %907 = vmatpush.msra.mxu2 %v862_v39 }
 0x750   :  { %908 = vmatpush.msra.mxu2 %v861_v42 }
 0x752   :  { %909 = vmatpush.msra.mxu2 %v860_v44  ;;  %v3688_v44 = vld [vmem:[%s6195_s2 + $0xe8] sm:$0xff] }
 0x754   :  { %910 = vmatpush.msra.mxu2 %v859_v46  ;;  %v3686_v46 = vld [vmem:[%s6195_s2 + $0xd8] sm:$0xff] }
 0x756   :  { %911 = vmatpush.msra.mxu2 %v858_v49  ;;  %v3684_v49 = vld [vmem:[%s6195_s2 + $0xc8] sm:$0xff] }
 0x758   :  { %912 = vmatpush.msra.mxu2 %v857_v51  ;;  %v3682_v51 = vld [vmem:[%s6195_s2 + $0xb8] sm:$0xff] }
 0x7ba   :  { %v731_v3 = vpop.xlane.xlu2 %730 }
 0x7bb   :  { %v735_v4 = vmul.f32 %v731_v3, %v4335_v17  ;;  %v784_v3 = vperm.slane %v4687_v2, 6  ;;  %v4772_v2 = vld [vmem:[%s6200_s7 + $0x10] sm:$0xff] }
 0x7bc   :  { %v555_v5 = vpop.f32.mrf.mxu2 }
 0x7bd   :  { %v737_v6 = vadd.f32 1e-05, %v735_v4  ;;  %3668 = vmatmul.msk.f32.vlgmr.msrb.gmra.mxu2 %vm209_vm5, %v555_v5 }
 0x7be   :  { %v659_v7 = vpop.f32.mrf.mxu0 }
 0x7bf   :  { %4061 = vrsqrt.f32 %v737_v6  ;;  %3667 = vmatmul.msk.f32.vlgmr.msrb.gmra.mxu1 %vm209_vm5, %v659_v7  ;;  %vm745_vm11 = vweird.f32 %v737_v6 }
 0x7c5   :  { %v4062_v8 = vpop.eup %4061 }
 0x7c6   :  { %v740_v60 = vmul.f32 %v4062_v8, %v737_v6  ;;  %vm746_vm10 = vweird.f32 %v4062_v8  ;;  %v783_v6 = vperm.slane %v4396_v48, 6 }
 0x7c7   :  { %vm747_vm12 = vmor %vm745_vm11, %vm746_vm10 }
 0x7c8   :  { %v741_v9 = vmul.f32 %v4062_v8, %v740_v60 }
 0x7ca   :  { %v742_v10 = vmul.f32 0.5, %v741_v9 }
 0x7cc   :  { %v743_v11 = vsub.f32 1.5, %v742_v10 }
 0x7ce   :  { %v744_v12 = vmul.f32 %v4062_v8, %v743_v11 }
 0x7d0   :  { %v748_v14 = vsel %vm747_vm12, %v4062_v8, %v744_v12 }
 0x7d1   :  { %v759_v15 = vmul.f32 %v748_v14, %v725_v41  ;;  %v848_v41 = vld [vmem:[%s6199_s6 + $0x38] sm:$0xff]  ;;  %v873_v14 = vperm.slane %v4396_v48, 5 }
 0x7d2   :  { %882 = vmatpush.msra.mxu1 %v848_v41 }
 0x7d3   :  { %v762_v61 = vmul.f32 %v761_v13, %v759_v15 }
 0x7d4   :  { %883 = vmatpush.msra.mxu1 %v847_v43  ;;  %v3687_v43 = vld [vmem:[%s6195_s2 + $0xe0] sm:$0xff] }
 0x7d5   :  { %v765_v18 = vadd.f32 %v764_v16, %v762_v61 }
 0x7d6   :  { %884 = vmatpush.msra.mxu1 %v846_v45  ;;  %v3685_v45 = vld [vmem:[%s6195_s2 + $0xd0] sm:$0xff] }
 0x7d7   :  { %3669 = vmatmul.msk.f32.vlgmr.msrb.gmra.mxu3 %vm48_vm0, %v765_v18  ;;  %3671 = vmatmul.msk.f32.vlgmr.msra.gmra.mxu0 %vm48_vm0, %v765_v18 }
 0x7d8   :  { %885 = vmatpush.msra.mxu1 %v845_v47  ;;  %v3683_v47 = vld [vmem:[%s6195_s2 + $0xc0] sm:$0xff] }
 0x7da   :  { %886 = vmatpush.msra.mxu1 %v844_v50  ;;  %v3681_v50 = vld [vmem:[%s6195_s2 + $0xb0] sm:$0xff] }
 0x7dc   :  { %887 = vmatpush.msra.mxu1 %v843_v52  ;;  %v3679_v52 = vld [vmem:[%s6195_s2 + $0xa0] sm:$0xff] }
 0x7de   :  { %888 = vmatpush.msra.mxu1 %v842_v53  ;;  %v3680_v53 = vld [vmem:[%s6195_s2 + $0xa8] sm:$0xff] }
 0x7e0   :  { %889 = vmatpush.msra.mxu1 %v841_v54  ;;  %v3677_v54 = vld [vmem:[%s6195_s2 + $0x90] sm:$0xff] }
 0x83c   :  { %v686_v55 = vpop.f32.mrf.mxu1 }
 0x840   :  { %v709_v56 = vpop.f32.mrf.mxu2 }
 0x841   :  { %v710_v58 = vadd.f32 %v709_v56, %v686_v55  ;;  %v3678_v55 = vld [vmem:[%s6195_s2 + $0x98] sm:$0xff]  ;;  %v3675_v56 = vld [vmem:[%s6195_s2 + $0x80] sm:$0xff] }
 0x843   :  { %v713_v59 = vadd.f32 %v710_v58, %v4412_v57  ;;  %v3676_v58 = vld [vmem:[%s6195_s2 + $0x88] sm:$0xff] }
 0x845   :  { %v4680_v63 = vadd.f32 %v714_v27, %v713_v59 }
 0x847   :  { %v720_v1 = vsel %vm48_vm0, %v4680_v63, 0.0 }
 0x848   :  { %721 = vadd.xlane.f32.xlu0 %v720_v1 }
 0x854   :  { %v831_v4 = vpop.f32.mrf.mxu0 }
 0x855   :  { %v832_v5 = vadd.f32 %v831_v4, %v784_v3 }
 0x857   :  { %v838_v57 = vmax.f32 %v832_v5, 0.0 }
 0x859   :  { %913 = vmatmul.f32.vlgmr.msra.gmra.mxu2 %v838_v57 }
 0x85a   :  { %v808_v27 = vpop.f32.mrf.mxu3 }
 0x85b   :  { %v809_v7 = vadd.f32 %v808_v27, %v783_v6 }
 0x85d   :  { %v837_v8 = vmax.f32 %v809_v7, 0.0 }
 0x85f   :  { %890 = vmatmul.f32.vlgmr.msra.gmra.mxu1 %v837_v8 }
 0x8bb   :  { %v722_v60 = vpop.xlane.xlu0 %721 }
 0x8bc   :  { %v724_v9 = vmul.f32 %v722_v60, %v4335_v17 }
 0x8be   :  { %v726_v10 = vsub.f32 %v4680_v63, %v724_v9 }
 0x8c0   :  { %v728_v11 = vmul.f32 %v726_v10, %v726_v10 }
 0x8c2   :  { %v732_v12 = vsel %vm48_vm0, %v728_v11, 0.0 }
 0x8c3   :  { %733 = vadd.xlane.f32.xlu0 %v732_v12 }
 0x8dc   :  { %v891_v15 = vpop.f32.mrf.mxu1  ;;  %v914_v18 = vpop.f32.mrf.mxu2 }
 0x8dd   :  { %v892_v61 = vadd.f32 %v891_v15, %v873_v14 }
 0x8df   :  { %v915_v19 = vadd.f32 %v914_v18, %v892_v61  ;;  %v969_v61 = vperm.slane %v4772_v2, 0 }
 0x8e1   :  { %v4702_v40 = vadd.f32 %v915_v19, %v4507_v29  ;;  %v972_v19 = vperm.slane %v4772_v2, 1 }
 0x8e3   :  { %v925_v20 = vsel %vm48_vm0, %v4702_v40, 0.0 }
 0x8e4   :  { %926 = vadd.xlane.f32.xlu2 %v925_v20 }
 0x936   :  { %v734_v21 = vpop.xlane.xlu0 %733 }
 0x937   :  { %v736_v22 = vmul.f32 %v734_v21, %v4335_v17 }
 0x939   :  { %v738_v23 = vadd.f32 1e-05, %v736_v22 }
 0x93b   :  { %4063 = vrsqrt.f32 %v738_v23  ;;  %vm755_vm14 = vweird.f32 %v738_v23 }
 0x941   :  { %v4064_v24 = vpop.eup %4063 }
 0x942   :  { %v750_v25 = vmul.f32 %v4064_v24, %v738_v23  ;;  %vm756_vm13 = vweird.f32 %v4064_v24 }
 0x943   :  { %vm757_vm15 = vmor %vm755_vm14, %vm756_vm13 }
 0x944   :  { %v751_v26 = vmul.f32 %v4064_v24, %v750_v25 }
 0x946   :  { %v752_v28 = vmul.f32 0.5, %v751_v26  ;;  %v3702_v26 = vld [vmem:[%s6196_s3 + $0x78] sm:$0xff] }
 0x948   :  { %v753_v30 = vsub.f32 1.5, %v752_v28  ;;  %v3701_v28 = vld [vmem:[%s6196_s3 + $0x70] sm:$0xff] }
 0x94a   :  { %v754_v31 = vmul.f32 %v4064_v24, %v753_v30 }
 0x94c   :  { %v758_v29 = vsel %vm757_vm15, %v4064_v24, %v754_v31 }
 0x94d   :  { %v760_v32 = vmul.f32 %v758_v29, %v726_v10  ;;  %v3699_v29 = vld [vmem:[%s6196_s3 + $0x60] sm:$0xff] }
 0x94f   :  { %v763_v34 = vmul.f32 %v761_v13, %v760_v32  ;;  %v3689_v13 = vld [vmem:[%s6195_s2 + $0xf0] sm:$0xff]  ;;  %v3698_v32 = vld [vmem:[%s6196_s3 + $0x58] sm:$0xff] }
 0x950   :  { %1006 = vmatpush.msra.mxu3 %v3689_v13 }
 0x951   :  { %v766_v0 = vadd.f32 %v764_v16, %v763_v34  ;;  %v3690_v16 = vld [vmem:[%s6195_s2 + $0xf8] sm:$0xff]  ;;  %v3697_v34 = vld [vmem:[%s6196_s3 + $0x50] sm:$0xff] }
 0x952   :  { %1029 = vmatpush.msrb.mxu0 %v3690_v16  ;;  %1007 = vmatpush.msra.mxu3 %v3687_v43 }
 0x953   :  { %3670 = vmatmul.msk.f32.gmra.mxu3 %vm48_vm0, %v766_v0  ;;  %3672 = vmatmul.msk.f32.gmra.mxu0 %vm48_vm0, %v766_v0  ;;  %v3696_v0 = vld [vmem:[%s6196_s3 + $0x48] sm:$0xff] }
 0x954   :  { %1030 = vmatpush.msrb.mxu0 %v3688_v44  ;;  %1008 = vmatpush.msra.mxu3 %v3685_v45 }
 0x956   :  { %1031 = vmatpush.msrb.mxu0 %v3686_v46  ;;  %1009 = vmatpush.msra.mxu3 %v3683_v47 }
 0x957   :  { %v927_v36 = vpop.xlane.xlu2 %926 }
 0x958   :  { %v931_v37 = vmul.f32 %v927_v36, %v4335_v17  ;;  %1032 = vmatpush.msrb.mxu0 %v3684_v49  ;;  %1010 = vmatpush.msra.mxu3 %v3681_v50  ;;  %v3695_v36 = vld [vmem:[%s6196_s3 + $0x40] sm:$0xff] }
 0x95a   :  { %v933_v39 = vsub.f32 %v4702_v40, %v931_v37  ;;  %1033 = vmatpush.msrb.mxu0 %v3682_v51  ;;  %1011 = vmatpush.msra.mxu3 %v3679_v52 }
 0x95c   :  { %v935_v41 = vmul.f32 %v933_v39, %v933_v39  ;;  %1034 = vmatpush.msrb.mxu0 %v3680_v53  ;;  %1012 = vmatpush.msra.mxu3 %v3677_v54 }
 0x95e   :  { %v937_v42 = vsel %vm48_vm0, %v935_v41, 0.0  ;;  %1035 = vmatpush.msrb.mxu0 %v3678_v55  ;;  %1013 = vmatpush.msra.mxu3 %v3675_v56 }
 0x95f   :  { %938 = vadd.xlane.f32.xlu1 %v937_v42 }
 0x960   :  { %1036 = vmatpush.msrb.mxu0 %v3676_v58  ;;  %1061 = vmatpush.msrb.mxu3 %v3702_v26  ;;  %v4827_v58 = vld [vmem:[%s6194_s1] sm:$0xff] }
 0x962   :  { %1062 = vmatpush.msrb.mxu3 %v3701_v28 }
 0x9d0   :  { %v834_v59 = vpop.f32.mrf.mxu0 }
 0x9d1   :  { %v835_v1 = vadd.f32 %v834_v59, %v784_v3 }
 0x9d2   :  { %v939_v4 = vpop.xlane.xlu1 %938 }
 0x9d3   :  { %v840_v5 = vmax.f32 %v835_v1, 0.0  ;;  %v943_v57 = vmul.f32 %v939_v4, %v4335_v17 }
 0x9d5   :  { %v945_v27 = vadd.f32 1e-05, %v943_v57  ;;  %916 = vmatmul.f32.gmra.mxu2 %v840_v5 }
 0x9d6   :  { %v811_v7 = vpop.f32.mrf.mxu3 }
 0x9d7   :  { %4065 = vrsqrt.f32 %v945_v27  ;;  %v812_v8 = vadd.f32 %v811_v7, %v783_v6  ;;  %vm953_vm2 = vweird.f32 %v945_v27 }
 0x9d9   :  { %v839_v60 = vmax.f32 %v812_v8, 0.0 }
 0x9db   :  { %893 = vmatmul.f32.gmra.mxu1 %v839_v60 }
 0x9dd   :  { %v4066_v9 = vpop.eup %4065 }
 0x9de   :  { %v948_v10 = vmul.f32 %v4066_v9, %v945_v27  ;;  %vm954_vm1 = vweird.f32 %v4066_v9 }
 0x9df   :  { %vm955_vm3 = vmor %vm953_vm2, %vm954_vm1 }
 0x9e0   :  { %v949_v11 = vmul.f32 %v4066_v9, %v948_v10 }
 0x9e2   :  { %v950_v12 = vmul.f32 0.5, %v949_v11 }
 0x9e4   :  { %v951_v3 = vsub.f32 1.5, %v950_v12 }
 0x9e6   :  { %v952_v15 = vmul.f32 %v4066_v9, %v951_v3 }
 0x9e8   :  { %v956_v18 = vsel %vm955_vm3, %v4066_v9, %v952_v15  ;;  %v3719_v15 = vld [vmem:[%s6197_s4 + $0x78] sm:$0xff] }
 0x9e9   :  { %v967_v6 = vmul.f32 %v956_v18, %v933_v39  ;;  %v3717_v18 = vld [vmem:[%s6197_s4 + $0x68] sm:$0xff] }
 0x9eb   :  { %v970_v20 = vmul.f32 %v969_v61, %v967_v6  ;;  %v3716_v6 = vld [vmem:[%s6197_s4 + $0x60] sm:$0xff] }
 0x9ed   :  { %v973_v21 = vadd.f32 %v972_v19, %v970_v20 }
 0x9ef   :  { %3691 = vmatmul.msk.f32.vlgmr.msra.gmra.mxu3 %vm48_vm0, %v973_v21  ;;  %3693 = vmatmul.msk.f32.vlgmr.msrb.gmra.mxu0 %vm48_vm0, %v973_v21 }
 0xa58   :  { %v894_v22 = vpop.f32.mrf.mxu1  ;;  %v917_v24 = vpop.f32.mrf.mxu2 }
 0xa59   :  { %v895_v23 = vadd.f32 %v894_v22, %v873_v14 }
 0xa5b   :  { %v918_v25 = vadd.f32 %v917_v24, %v895_v23 }
 0xa5d   :  { %v4787_v30 = vadd.f32 %v918_v25, %v4680_v63  ;;  %v3700_v63 = vld [vmem:[%s6196_s3 + $0x68] sm:$0xff] }
 0xa5e   :  { %1063 = vmatpush.msrb.mxu3 %v3700_v63 }
 0xa5f   :  { %v928_v31 = vsel %vm48_vm0, %v4787_v30, 0.0 }
 0xa60   :  { %929 = vadd.xlane.f32.xlu0 %v928_v31  ;;  %1064 = vmatpush.msrb.mxu3 %v3699_v29 }
 0xa62   :  { %1065 = vmatpush.msrb.mxu3 %v3698_v32 }
 0xa64   :  { %1066 = vmatpush.msrb.mxu3 %v3697_v34 }
 0xa66   :  { %1067 = vmatpush.msrb.mxu3 %v3696_v0 }
 0xa68   :  { %1068 = vmatpush.msrb.mxu3 %v3695_v36 }
 0xa6c   :  { %v1038_v48 = vpop.f32.mrf.mxu0 }
 0xa6d   :  { %1256 = vrot.lane.b32.xlu1 %v1038_v48, %s4236_s16  ;;  %1169 = vmatpush.msrb.mxu1 %v1038_v48 }
 0xa72   :  { %v4792_v14 = vpop.f32.mrf.mxu3 }
 0xa74   :  { %1183 = vrot.lane.b32.xlu0 %v4792_v14, %s4234_s12 }
 0xa75   :  { %1079 = vrot.lane.b32.xlu1 %v4792_v14, %s4235_s15 }
 0xa7c   :  { %1179 = vrot.lane.b32.xlu0 %v4792_v14, %s4236_s16 }
 0xad3   :  { %v930_v37 = vpop.xlane.xlu0 %929 }
 0xad4   :  { %v932_v39 = vmul.f32 %v930_v37, %v4335_v17 }
 0xad6   :  { %v934_v41 = vsub.f32 %v4787_v30, %v932_v39 }
 0xad8   :  { %v936_v42 = vmul.f32 %v934_v41, %v934_v41 }
 0xada   :  { %v940_v13 = vsel %vm48_vm0, %v936_v42, 0.0 }
 0xadb   :  { %941 = vadd.xlane.f32.xlu2 %v940_v13 }
 0xadf   :  { %v1257_v16 = vpop.permute.xlu1 %1256 }
 0xae0   :  { %1277 = vmatpush.msra.mxu3 %v1257_v16 }
 0xae6   :  { %v1184_v5 = vpop.permute.xlu0 %1183 }
 0xae7   :  { %v1080_v60 = vpop.permute.xlu1 %1079 }
 0xaee   :  { %v1180_v7 = vpop.permute.xlu0 %1179 }
 0xb4e   :  { %v942_v43 = vpop.xlane.xlu2 %941 }
 0xb4f   :  { %v944_v44 = vmul.f32 %v942_v43, %v4335_v17 }
 0xb51   :  { %v946_v45 = vadd.f32 1e-05, %v944_v44 }
 0xb53   :  { %4067 = vrsqrt.f32 %v946_v45  ;;  %vm963_vm7 = vweird.f32 %v946_v45 }
 0xb59   :  { %v4068_v46 = vpop.eup %4067 }
 0xb5a   :  { %v958_v47 = vmul.f32 %v4068_v46, %v946_v45  ;;  %vm964_vm4 = vweird.f32 %v4068_v46 }
 0xb5b   :  { %vm965_vm8 = vmor %vm963_vm7, %vm964_vm4 }
 0xb5c   :  { %v959_v49 = vmul.f32 %v4068_v46, %v958_v47 }
 0xb5e   :  { %v960_v50 = vmul.f32 0.5, %v959_v49 }
 0xb60   :  { %v961_v51 = vsub.f32 1.5, %v960_v50 }
 0xb62   :  { %v962_v52 = vmul.f32 %v4068_v46, %v961_v51 }
 0xb64   :  { %v966_v53 = vsel %vm965_vm8, %v4068_v46, %v962_v52 }
 0xb65   :  { %v968_v54 = vmul.f32 %v966_v53, %v934_v41 }
 0xb67   :  { %v971_v55 = vmul.f32 %v969_v61, %v968_v54  ;;  %v3718_v61 = vld [vmem:[%s6197_s4 + $0x70] sm:$0xff] }
 0xb69   :  { %v974_v56 = vadd.f32 %v972_v19, %v971_v55 }
 0xb6b   :  { %3692 = vmatmul.msk.f32.gmra.mxu3 %vm48_vm0, %v974_v56  ;;  %3694 = vmatmul.msk.f32.gmra.mxu0 %vm48_vm0, %v974_v56 }
 0xb73   :  { %3703 = vmatmul.msk.f32.vlgmr.msrb.gmra.mxu3 %vm48_vm0, %v4827_v58 }
 0xbe8   :  { %v4831_v59 = vpop.f32.mrf.mxu0 }
 0xbe9   :  { %1421 = vmatpush.msrb.mxu3 %v4831_v59 }
 0xbee   :  { %v1018_v1 = vpop.f32.mrf.mxu3 }
 0xbf6   :  { %v4834_v4 = vpop.f32.mrf.mxu3 }
 0xbf7   :  { %1082 = vrot.lane.b32.xlu1 %v4834_v4, %s4236_s16  ;;  %1186 = vrot.lane.b32.xlu2 %v4834_v4, %s4235_s15  ;;  %v1182_v8 = vsel %vm209_vm5, %v1180_v7, %v4834_v4  ;;  %v3710_v7 = vld [vmem:[%s6197_s4 + $0x50] sm:$0xff] }
 0xbff   :  { %1434 = vrot.lane.b32.xlu1 %v1018_v1, %s4234_s12 }
 0xc07   :  { %1430 = vrot.lane.b32.xlu1 %v1018_v1, %s4236_s16 }
 0xc51   :  { %v1187_v57 = vpop.permute.xlu2 %1186 }
 0xc52   :  { %v1189_v27 = vsel %vm209_vm5, %v1184_v5, %v1187_v57 }
 0xc53   :  { %3712 = vmatpush.xpose.msk.msrb.mxu2 %vm48_vm0, %v1189_v27  ;;  %v3711_v27 = vld [vmem:[%s6197_s4 + $0x58] sm:$0xff] }
 0xc54   :  { %1324 = vmatpush.msra.mxu1 %v3711_v27 }
 0xc56   :  { %3713 = vmatmul.msk.f32.vlgmr.msrb.gmra.mxu2 %vm48_vm0, %v1182_v8  ;;  %1325 = vmatpush.msra.mxu1 %v3710_v7  ;;  %v3709_v8 = vld [vmem:[%s6197_s4 + $0x48] sm:$0xff] }
 0xc58   :  { %1326 = vmatpush.msra.mxu1 %v3709_v8 }
 0xc69   :  { %v1083_v9 = vpop.permute.xlu1 %1082 }
 0xc6a   :  { %v1085_v10 = vsel %vm209_vm5, %v1080_v60, %v1083_v9 }
 0xc6b   :  { %3704 = vmatpush.xpose.msk.msra.mxu0 %vm48_vm0, %v1085_v10 }
 0xc6f   :  { %1301 = vmatpush.msrb.mxu0 %v3719_v15 }
 0xc71   :  { %1302 = vmatpush.msrb.mxu0 %v3718_v61  ;;  %v1435_v24 = vpop.permute.xlu1 %1434 }
 0xc72   :  { %v1437_v28 = vsel %vm209_vm5, %v1435_v24, %v1187_v57 }
 0xc73   :  { %1303 = vmatpush.msrb.mxu0 %v3717_v18 }
 0xc75   :  { %1304 = vmatpush.msrb.mxu0 %v3716_v6 }
 0xc79   :  { %v1431_v43 = vpop.permute.xlu1 %1430 }
 0xc7a   :  { %v1433_v46 = vsel %vm209_vm5, %v1431_v43, %v4834_v4  ;;  %v3746_v43 = vld [vmem:[%s6198_s5 + $0xb0] sm:$0xff] }
 0xcd9   :  { %v1213_v11 = vpop.f32.mrf.mxu2 }
 0xcda   :  { %v1216_v12 = vmul.f32 0.17677669, %v1213_v11 }
 0xcdc   :  { %v1217_v3 = vsel %vm246_vm6, %v1216_v12, -inf }
 0xcdd   :  { %1218 = vmax.xlane.f32.xlu0 %v1217_v3 }
 0xcf1   :  { %1074 = vrot.lane.b32.xlu0 %v4834_v4, %s4234_s12 }
 0xd50   :  { %v1219_v19 = vpop.xlane.xlu0 %1218 }
 0xd51   :  { %v1220_v20 = vsub.f32 %v1216_v12, %v1219_v19 }
 0xd53   :  { %v1221_v21 = vmul.f32 1.442695, %v1220_v20 }
 0xd55   :  { %4069 = vpow2.f32 %v1221_v21 }
 0xd5b   :  { %v4070_v22 = vpop.eup %4069 }
 0xd5c   :  { %v1223_v23 = vsel %vm246_vm6, %v4070_v22, 0.0 }
 0xd5d   :  { %1224 = vadd.xlane.f32.xlu2 %v1223_v23 }
 0xd63   :  { %v1075_v25 = vpop.permute.xlu0 %1074 }
 0xd64   :  { %v1077_v26 = vsel %vm209_vm5, %v4792_v14, %v1075_v25  ;;  %v1332_v14 = vsel %vm209_vm5, %v1018_v1, %v1075_v25 }
 0xd65   :  { %3705 = vmatmul.msk.f32.vlgmr.msra.gmra.mxu0 %vm48_vm0, %v1077_v26 }
 0xd66   :  { %3730 = vmatpush.xpose.msk.msra.mxu0 %vm48_vm0, %v1437_v28 }
 0xd75   :  { %1334 = vrot.lane.b32.xlu2 %v1018_v1, %s4235_s15 }
 0xdd0   :  { %v1225_v31 = vpop.xlane.xlu2 %1224 }
 0xdd1   :  { %4071 = vrcp.f32 %v1225_v31 }
 0xdd7   :  { %v4072_v48 = vpop.eup %4071 }
 0xdd8   :  { %v4871_v63 = vmul.f32 %v4072_v48, %v4070_v22  ;;  %v1335_v29 = vpop.permute.xlu2 %1334  ;;  %v1582_v22 = vperm.slane %v4772_v2, 2 }
 0xdd9   :  { %v1337_v32 = vsel %vm209_vm5, %v1335_v29, %v1083_v9 }
 0xdda   :  { %3715 = vmatmul.msk.f32.vlgmr.msra.gmra.mxu3 %vm246_vm6, %v4871_v63  ;;  %3722 = vmatpush.xpose.msk.msra.mxu2 %vm48_vm0, %v1337_v32 }
 0xddb   :  { %1572 = vmatpush.msra.mxu3 %v3711_v27  ;;  %v3772_v27 = vld [vmem:[%s6199_s6 + $0x160] sm:$0xff] }
 0xddd   :  { %3723 = vmatmul.msk.f32.vlgmr.msra.gmra.mxu2 %vm48_vm0, %v1332_v14  ;;  %1573 = vmatpush.msra.mxu3 %v3710_v7  ;;  %v3788_v7 = vld [vmem:[%s6199_s6 + $0x1e0] sm:$0xff] }
 0xdde   :  { %1549 = vmatpush.msrb.mxu2 %v3719_v15 }
 0xddf   :  { %1574 = vmatpush.msra.mxu3 %v3709_v8 }
 0xde0   :  { %1550 = vmatpush.msrb.mxu2 %v3718_v61 }
 0xde2   :  { %1551 = vmatpush.msrb.mxu2 %v3717_v18  ;;  %v1109_v34 = vpop.f32.mrf.mxu0 }
 0xde3   :  { %v1112_v0 = vmul.f32 0.17677669, %v1109_v34 }
 0xde4   :  { %1552 = vmatpush.msrb.mxu2 %v3716_v6 }
 0xde5   :  { %v1113_v36 = vsel %vm246_vm6, %v1112_v0, -inf }
 0xde6   :  { %1114 = vmax.xlane.f32.xlu0 %v1113_v36  ;;  %v3755_v36 = vld [vmem:[%s6198_s5 + $0xf8] sm:$0xff] }
 0xe59   :  { %v1115_v37 = vpop.xlane.xlu0 %1114 }
 0xe5a   :  { %v1116_v39 = vsub.f32 %v1112_v0, %v1115_v37  ;;  %v3754_v0 = vld [vmem:[%s6198_s5 + $0xf0] sm:$0xff]  ;;  %v3752_v37 = vld [vmem:[%s6198_s5 + $0xe0] sm:$0xff] }
 0xe5c   :  { %v1117_v41 = vmul.f32 1.442695, %v1116_v39  ;;  %v3753_v39 = vld [vmem:[%s6198_s5 + $0xe8] sm:$0xff] }
 0xe5d   :  { %v1279_v42 = vpop.f32.mrf.mxu3 }
 0xe5e   :  { %4073 = vpow2.f32 %v1117_v41  ;;  %3720 = vmatmul.msk.f32.vlgmr.msrb.gmra.mxu0 %vm209_vm5, %v1279_v42  ;;  %v3750_v41 = vld [vmem:[%s6198_s5 + $0xd0] sm:$0xff]  ;;  %v3751_v42 = vld [vmem:[%s6198_s5 + $0xd8] sm:$0xff] }
 0xe5f   :  { %1668 = vmatpush.msrb.mxu0 %v3754_v0 }
 0xe60   :  { %v1361_v13 = vpop.f32.mrf.mxu2 }
 0xe61   :  { %v1364_v16 = vmul.f32 0.17677669, %v1361_v13  ;;  %1669 = vmatpush.msrb.mxu0 %v3752_v37  ;;  %v3748_v13 = vld [vmem:[%s6198_s5 + $0xc0] sm:$0xff]  ;;  %v3783_v37 = vld [vmem:[%s6199_s6 + $0x1b8] sm:$0xff] }
 0xe63   :  { %v1365_v44 = vsel %vm246_vm6, %v1364_v16, -inf  ;;  %1670 = vmatpush.msrb.mxu0 %v3750_v41  ;;  %v3782_v41 = vld [vmem:[%s6199_s6 + $0x1b0] sm:$0xff] }
 0xe64   :  { %v4074_v45 = vpop.eup %4073  ;;  %1366 = vmax.xlane.f32.xlu2 %v1365_v44  ;;  %v3747_v44 = vld [vmem:[%s6198_s5 + $0xb8] sm:$0xff] }
 0xe65   :  { %v1119_v47 = vsel %vm246_vm6, %v4074_v45, 0.0  ;;  %1671 = vmatpush.msrb.mxu0 %v3748_v13  ;;  %v3781_v13 = vld [vmem:[%s6199_s6 + $0x1a8] sm:$0xff] }
 0xe66   :  { %3731 = vmatmul.msk.f32.vlgmr.msra.gmra.mxu0 %vm48_vm0, %v1433_v46  ;;  %1120 = vadd.xlane.f32.xlu1 %v1119_v47  ;;  %v3745_v46 = vld [vmem:[%s6198_s5 + $0xa8] sm:$0xff]  ;;  %v3742_v47 = vld [vmem:[%s6198_s5 + $0x90] sm:$0xff] }
 0xe67   :  { %1672 = vmatpush.msrb.mxu0 %v3746_v43  ;;  %v3780_v43 = vld [vmem:[%s6199_s6 + $0x1a0] sm:$0xff] }
 0xed7   :  { %v1367_v49 = vpop.xlane.xlu2 %1366 }
 0xed8   :  { %v1368_v50 = vsub.f32 %v1364_v16, %v1367_v49  ;;  %v3749_v16 = vld [vmem:[%s6198_s5 + $0xc8] sm:$0xff]  ;;  %v3743_v49 = vld [vmem:[%s6198_s5 + $0x98] sm:$0xff] }
 0xed9   :  { %v1121_v51 = vpop.xlane.xlu1 %1120 }
 0xeda   :  { %v1369_v52 = vmul.f32 1.442695, %v1368_v50  ;;  %4075 = vrcp.f32 %v1121_v51  ;;  %v3740_v50 = vld [vmem:[%s6198_s5 + $0x80] sm:$0xff]  ;;  %v3741_v51 = vld [vmem:[%s6198_s5 + $0x88] sm:$0xff] }
 0xedb   :  { %v1306_v53 = vpop.f32.mrf.mxu0 }
 0xedc   :  { %4077 = vpow2.f32 %v1369_v52  ;;  %v3775_v52 = vld [vmem:[%s6199_s6 + $0x178] sm:$0xff] }
 0xedd   :  { %1744 = vmatpush.msra.mxu2 %v3775_v52  ;;  %v3776_v52 = vld [vmem:[%s6199_s6 + $0x180] sm:$0xff] }
 0xee0   :  { %v4076_v54 = vpop.eup %4075 }
 0xee1   :  { %v4886_v55 = vmul.f32 %v4076_v54, %v4074_v45  ;;  %v3744_v45 = vld [vmem:[%s6198_s5 + $0xa0] sm:$0xff]  ;;  %v3774_v54 = vld [vmem:[%s6199_s6 + $0x170] sm:$0xff] }
 0xee2   :  { %v4078_v56 = vpop.eup %4077  ;;  %1673 = vmatpush.msrb.mxu0 %v3744_v45  ;;  %1745 = vmatpush.msra.mxu2 %v3774_v54  ;;  %v3779_v45 = vld [vmem:[%s6199_s6 + $0x198] sm:$0xff] }
 0xee3   :  { %3707 = vmatmul.msk.f32.vlgmr.msrb.gmra.mxu1 %vm246_vm6, %v4886_v55  ;;  %v1461_v1 = vpop.f32.mrf.mxu0  ;;  %v1371_v4 = vsel %vm246_vm6, %v4078_v56, 0.0 }
 0xee4   :  { %v1464_v5 = vmul.f32 0.17677669, %v1461_v1  ;;  %1372 = vadd.xlane.f32.xlu1 %v1371_v4  ;;  %1674 = vmatpush.msrb.mxu0 %v3742_v47  ;;  %v3773_v1 = vld [vmem:[%s6199_s6 + $0x168] sm:$0xff]  ;;  %v3778_v47 = vld [vmem:[%s6199_s6 + $0x190] sm:$0xff] }
 0xee5   :  { %v3789_v4 = vld [vmem:[%s6199_s6 + $0x1e8] sm:$0xff]  ;;  %1746 = vmatpush.msra.mxu2 %v3773_v1 }
 0xee6   :  { %v1465_v57 = vsel %vm246_vm6, %v1464_v5, -inf  ;;  %1675 = vmatpush.msrb.mxu0 %v3740_v50  ;;  %v3777_v50 = vld [vmem:[%s6199_s6 + $0x188] sm:$0xff] }
 0xee7   :  { %1466 = vmax.xlane.f32.xlu0 %v1465_v57  ;;  %1747 = vmatpush.msra.mxu2 %v3772_v27 }
 0xefb   :  { %1504 = vrot.lane.b32.xlu0 %v4831_v59, %s4236_s16  ;;  %v3708_v59 = vld [vmem:[%s6197_s4 + $0x40] sm:$0xff] }
 0xefc   :  { %1327 = vmatpush.msra.mxu1 %v3708_v59  ;;  %1575 = vmatpush.msra.mxu3 %v3708_v59  ;;  %v3771_v59 = vld [vmem:[%s6199_s6 + $0x158] sm:$0xff] }
 0xefd   :  { %1748 = vmatpush.msra.mxu2 %v3771_v59 }
 0xf57   :  { %v1373_v60 = vpop.xlane.xlu1 %1372 }
 0xf58   :  { %4079 = vrcp.f32 %v1373_v60  ;;  %v3787_v60 = vld [vmem:[%s6199_s6 + $0x1d8] sm:$0xff] }
 0xf5a   :  { %v1467_v9 = vpop.xlane.xlu0 %1466 }
 0xf5b   :  { %v1468_v10 = vsub.f32 %v1464_v5, %v1467_v9  ;;  %v3770_v9 = vld [vmem:[%s6199_s6 + $0x150] sm:$0xff] }
 0xf5c   :  { %1749 = vmatpush.msra.mxu2 %v3770_v9 }
 0xf5d   :  { %v1469_v11 = vmul.f32 1.442695, %v1468_v10  ;;  %v3786_v10 = vld [vmem:[%s6199_s6 + $0x1d0] sm:$0xff] }
 0xf5e   :  { %v4080_v12 = vpop.eup %4079 }
 0xf5f   :  { %v4906_v3 = vmul.f32 %v4080_v12, %v4078_v56  ;;  %4081 = vpow2.f32 %v1469_v11  ;;  %v3790_v56 = vld [vmem:[%s6199_s6 + $0x1f0] sm:$0xff]  ;;  %v3769_v11 = vld [vmem:[%s6199_s6 + $0x148] sm:$0xff] }
 0xf60   :  { %v1171_v15 = vpop.f32.mrf.mxu1  ;;  %v3785_v12 = vld [vmem:[%s6199_s6 + $0x1c8] sm:$0xff]  ;;  %1750 = vmatpush.msra.mxu2 %v3769_v11 }
 0xf61   :  { %3721 = vmatmul.msk.f32.vlgmr.msra.gmra.mxu1 %vm209_vm5, %v1171_v15  ;;  %3725 = vmatmul.msk.f32.vlgmr.msrb.gmra.mxu3 %vm246_vm6, %v4906_v3 }
 0xf65   :  { %v4082_v61 = vpop.eup %4081 }
 0xf66   :  { %v1471_v18 = vsel %vm246_vm6, %v4082_v61, 0.0 }
 0xf67   :  { %1472 = vadd.xlane.f32.xlu2 %v1471_v18 }
 0xf6d   :  { %v1505_v6 = vpop.permute.xlu0 %1504 }
 0xf6e   :  { %1525 = vmatpush.msrb.mxu1 %v1505_v6 }
 0xf70   :  { %1691 = vmatpush.msra.mxu1 %v3755_v36  ;;  %v3767_v36 = vld [vmem:[%s6199_s6 + $0x138] sm:$0xff] }
 0xf72   :  { %1692 = vmatpush.msra.mxu1 %v3753_v39  ;;  %v3766_v39 = vld [vmem:[%s6199_s6 + $0x130] sm:$0xff] }
 0xf74   :  { %1693 = vmatpush.msra.mxu1 %v3751_v42  ;;  %v3765_v42 = vld [vmem:[%s6199_s6 + $0x128] sm:$0xff] }
 0xf76   :  { %1694 = vmatpush.msra.mxu1 %v3749_v16  ;;  %v3764_v16 = vld [vmem:[%s6199_s6 + $0x120] sm:$0xff] }
 0xf78   :  { %1695 = vmatpush.msra.mxu1 %v3747_v44  ;;  %v3763_v44 = vld [vmem:[%s6199_s6 + $0x118] sm:$0xff] }
 0xf7a   :  { %1696 = vmatpush.msra.mxu1 %v3745_v46  ;;  %v3762_v46 = vld [vmem:[%s6199_s6 + $0x110] sm:$0xff] }
 0xf7c   :  { %1697 = vmatpush.msra.mxu1 %v3743_v49  ;;  %v3761_v49 = vld [vmem:[%s6199_s6 + $0x108] sm:$0xff] }
 0xf7e   :  { %1698 = vmatpush.msra.mxu1 %v3741_v51  ;;  %v3760_v51 = vld [vmem:[%s6199_s6 + $0x100] sm:$0xff] }
 0xfda   :  { %v1473_v19 = vpop.xlane.xlu2 %1472 }
 0xfdb   :  { %4083 = vrcp.f32 %v1473_v19 }
 0xfde   :  { %v1329_v20 = vpop.f32.mrf.mxu1 }
 0xfdf   :  { %v1330_v21 = vadd.f32 %v1329_v20, %v1306_v53  ;;  %v3791_v53 = vld [vmem:[%s6199_s6 + $0x1f8] sm:$0xff] }
 0xfe0   :  { %1767 = vmatpush.msrb.mxu3 %v3791_v53 }
 0xfe1   :  { %v4084_v23 = vpop.eup %4083  ;;  %v1580_v24 = vadd.f32 %v1330_v21, %v4702_v40 }
 0xfe2   :  { %v4914_v25 = vmul.f32 %v4084_v23, %v4082_v61  ;;  %1768 = vmatpush.msrb.mxu3 %v3790_v56 }
 0xfe3   :  { %v4918_v26 = vadd.f32 %v1582_v22, %v1580_v24 }
 0xfe4   :  { %v1423_v28 = vpop.f32.mrf.mxu3  ;;  %3733 = vmatmul.msk.f32.vlgmr.msrb.gmra.mxu1 %vm246_vm6, %v4914_v25  ;;  %1769 = vmatpush.msrb.mxu3 %v3789_v4 }
 0xfe5   :  { %3739 = vmatmul.msk.f32.vlgmr.msra.gmra.mxu3 %vm209_vm5, %v1423_v28  ;;  %v1585_v31 = vsel %vm48_vm0, %v4918_v26, 0.0 }
 0xfe6   :  { %1586 = vadd.xlane.f32.xlu1 %v1585_v31  ;;  %1770 = vmatpush.msrb.mxu3 %v3788_v7  ;;  %v1629_v31 = vperm.slane %v4772_v2, 3 }
 0xfe8   :  { %1771 = vmatpush.msrb.mxu3 %v3787_v60 }
 0xfea   :  { %1772 = vmatpush.msrb.mxu3 %v3786_v10 }
 0xfec   :  { %1773 = vmatpush.msrb.mxu3 %v3785_v12 }
0x1059   :  { %v1587_v48 = vpop.xlane.xlu1 %1586 }
0x105a   :  { %v1591_v29 = vmul.f32 %v1587_v48, %v4335_v17 }
0x105c   :  { %v4927_v40 = vsub.f32 %v4918_v26, %v1591_v29 }
0x105e   :  { %v1595_v32 = vmul.f32 %v4927_v40, %v4927_v40 }
0x1060   :  { %v1597_v14 = vsel %vm48_vm0, %v1595_v32, 0.0 }
0x1061   :  { %1598 = vadd.xlane.f32.xlu1 %v1597_v14  ;;  %v1527_v34 = vpop.f32.mrf.mxu1  ;;  %v1632_v14 = vperm.slane %v4772_v2, 4 }
0x1062   :  { %3738 = vmatmul.msk.f32.vlgmr.msrb.gmra.mxu2 %vm209_vm5, %v1527_v34 }
0x1068   :  { %v1577_v19 = vpop.f32.mrf.mxu3 }
0x10d4   :  { %v1599_v5 = vpop.xlane.xlu1 %1598 }
0x10d5   :  { %v1603_v57 = vmul.f32 %v1599_v5, %v4335_v17  ;;  %v3674_v5 = vld [vmem:[%s6200_s7 + $0x18] sm:$0xff] }
0x10d6   :  { %v1653_v27 = vperm.slane %v3674_v5, 6  ;;  %v3796_v5 = vld [vmem:[%s6195_s2 + $0x110] sm:$0xff] }
0x10d7   :  { %v1605_v8 = vadd.f32 1e-05, %v1603_v57  ;;  %v1652_v57 = vperm.slane %v4772_v2, 6 }
0x10d9   :  { %4085 = vrsqrt.f32 %v1605_v8  ;;  %vm1613_vm10 = vweird.f32 %v1605_v8 }
0x10df   :  { %v4086_v15 = vpop.eup %4085 }
0x10e0   :  { %v1608_v61 = vmul.f32 %v4086_v15, %v1605_v8  ;;  %vm1614_vm9 = vweird.f32 %v4086_v15 }
0x10e1   :  { %vm1615_vm11 = vmor %vm1613_vm10, %vm1614_vm9 }
0x10e2   :  { %v1609_v18 = vmul.f32 %v4086_v15, %v1608_v61 }
0x10e4   :  { %v1610_v6 = vmul.f32 0.5, %v1609_v18 }
0x10e5   :  { %v1554_v20 = vpop.f32.mrf.mxu2 }
0x10e6   :  { %v1611_v21 = vsub.f32 1.5, %v1610_v6  ;;  %v1578_v23 = vadd.f32 %v1577_v19, %v1554_v20 }
0x10e8   :  { %v1612_v24 = vmul.f32 %v4086_v15, %v1611_v21  ;;  %v1581_v28 = vadd.f32 %v1578_v23, %v4787_v30 }
0x10ea   :  { %v1616_v48 = vsel %vm1615_vm11, %v4086_v15, %v1612_v24  ;;  %v5028_v29 = vadd.f32 %v1582_v22, %v1581_v28  ;;  %v3768_v22 = vld [vmem:[%s6199_s6 + $0x140] sm:$0xff]  ;;  %v1743_v28 = vperm.slane %v4772_v2, 5 }
0x10eb   :  { %v1627_v32 = vmul.f32 %v1616_v48, %v4927_v40  ;;  %v3784_v40 = vld [vmem:[%s6199_s6 + $0x1c0] sm:$0xff]  ;;  %1751 = vmatpush.msra.mxu2 %v3768_v22 }
0x10ec   :  { %v1588_v34 = vsel %vm48_vm0, %v5028_v29, 0.0  ;;  %1774 = vmatpush.msrb.mxu3 %v3784_v40 }
0x10ed   :  { %v1630_v0 = vmul.f32 %v1629_v31, %v1627_v32  ;;  %1589 = vadd.xlane.f32.xlu2 %v1588_v34  ;;  %1752 = vmatpush.msra.mxu2 %v3767_v36 }
0x10ee   :  { %1775 = vmatpush.msrb.mxu3 %v3783_v37 }
0x10ef   :  { %v1633_v30 = vadd.f32 %v1632_v14, %v1630_v0  ;;  %1753 = vmatpush.msra.mxu2 %v3766_v39 }
0x10f0   :  { %1776 = vmatpush.msrb.mxu3 %v3782_v41 }
0x10f1   :  { %3756 = vmatmul.msk.f32.vlgmr.msrb.gmra.mxu0 %vm48_vm0, %v1633_v30  ;;  %3758 = vmatmul.msk.f32.vlgmr.msra.gmra.mxu1 %vm48_vm0, %v1633_v30 }
0x10f2   :  { %1754 = vmatpush.msra.mxu2 %v3765_v42  ;;  %1777 = vmatpush.msrb.mxu3 %v3781_v13 }
0x10f4   :  { %1755 = vmatpush.msra.mxu2 %v3764_v16  ;;  %1778 = vmatpush.msrb.mxu3 %v3780_v43 }
0x10f6   :  { %1756 = vmatpush.msra.mxu2 %v3763_v44  ;;  %1779 = vmatpush.msrb.mxu3 %v3779_v45  ;;  %v3808_v45 = vld [vmem:[%s6195_s2 + $0x170] sm:$0xff] }
0x10f7   :  { %1876 = vmatpush.msra.mxu0 %v3808_v45 }
0x10f8   :  { %1757 = vmatpush.msra.mxu2 %v3762_v46  ;;  %1780 = vmatpush.msrb.mxu3 %v3778_v47  ;;  %v3809_v46 = vld [vmem:[%s6195_s2 + $0x178] sm:$0xff]  ;;  %v3806_v47 = vld [vmem:[%s6195_s2 + $0x160] sm:$0xff] }
0x10f9   :  { %1899 = vmatpush.msrb.mxu1 %v3809_v46  ;;  %1877 = vmatpush.msra.mxu0 %v3806_v47  ;;  %v3814_v46 = vld [vmem:[%s6196_s3 + $0x80] sm:$0xff] }
0x10fa   :  { %1758 = vmatpush.msra.mxu2 %v3761_v49  ;;  %1781 = vmatpush.msrb.mxu3 %v3777_v50  ;;  %v3807_v49 = vld [vmem:[%s6195_s2 + $0x168] sm:$0xff]  ;;  %v3804_v50 = vld [vmem:[%s6195_s2 + $0x150] sm:$0xff] }
0x10fb   :  { %1900 = vmatpush.msrb.mxu1 %v3807_v49  ;;  %1878 = vmatpush.msra.mxu0 %v3804_v50 }
0x10fc   :  { %1759 = vmatpush.msra.mxu2 %v3760_v51  ;;  %1782 = vmatpush.msrb.mxu3 %v3776_v52  ;;  %v3805_v51 = vld [vmem:[%s6195_s2 + $0x158] sm:$0xff]  ;;  %v3802_v52 = vld [vmem:[%s6195_s2 + $0x140] sm:$0xff] }
0x10fd   :  { %1901 = vmatpush.msrb.mxu1 %v3805_v51  ;;  %1879 = vmatpush.msra.mxu0 %v3802_v52 }
0x1160   :  { %v1590_v53 = vpop.xlane.xlu2 %1589 }
0x1161   :  { %v1592_v54 = vmul.f32 %v1590_v53, %v4335_v17  ;;  %v3803_v53 = vld [vmem:[%s6195_s2 + $0x148] sm:$0xff] }
0x1162   :  { %1902 = vmatpush.msrb.mxu1 %v3803_v53 }
0x1163   :  { %v1594_v56 = vsub.f32 %v5028_v29, %v1592_v54  ;;  %v3800_v54 = vld [vmem:[%s6195_s2 + $0x130] sm:$0xff] }
0x1164   :  { %1880 = vmatpush.msra.mxu0 %v3800_v54 }
0x1165   :  { %v1596_v1 = vmul.f32 %v1594_v56, %v1594_v56 }
0x1167   :  { %v1600_v4 = vsel %vm48_vm0, %v1596_v1, 0.0  ;;  %v3798_v1 = vld [vmem:[%s6195_s2 + $0x120] sm:$0xff] }
0x1168   :  { %1601 = vadd.xlane.f32.xlu2 %v1600_v4  ;;  %v3799_v4 = vld [vmem:[%s6195_s2 + $0x128] sm:$0xff]  ;;  %1881 = vmatpush.msra.mxu0 %v3798_v1 }
0x116a   :  { %1882 = vmatpush.msra.mxu0 %v3796_v5 }
0x116e   :  { %v1677_v7 = vpop.f32.mrf.mxu0  ;;  %v1700_v8 = vpop.f32.mrf.mxu1 }
0x116f   :  { %v1678_v59 = vadd.f32 %v1677_v7, %v1652_v57  ;;  %v1701_v60 = vadd.f32 %v1700_v8, %v1653_v27  ;;  %v3795_v7 = vld [vmem:[%s6195_s2 + $0x108] sm:$0xff] }
0x1171   :  { %v1706_v9 = vmax.f32 %v1678_v59, 0.0  ;;  %v1707_v10 = vmax.f32 %v1701_v60, 0.0 }
0x1173   :  { %1760 = vmatmul.f32.vlgmr.msra.gmra.mxu2 %v1706_v9  ;;  %1783 = vmatmul.f32.vlgmr.msrb.gmra.mxu3 %v1707_v10 }
0x11db   :  { %v1602_v11 = vpop.xlane.xlu2 %1601 }
0x11dc   :  { %v1604_v12 = vmul.f32 %v1602_v11, %v4335_v17 }
0x11de   :  { %v1606_v15 = vadd.f32 1e-05, %v1604_v12 }
0x11e0   :  { %4087 = vrsqrt.f32 %v1606_v15  ;;  %vm1623_vm13 = vweird.f32 %v1606_v15 }
0x11e6   :  { %v4088_v61 = vpop.eup %4087 }
0x11e7   :  { %v1618_v18 = vmul.f32 %v4088_v61, %v1606_v15  ;;  %vm1624_vm12 = vweird.f32 %v4088_v61 }
0x11e8   :  { %vm1625_vm14 = vmor %vm1623_vm13, %vm1624_vm12 }
0x11e9   :  { %v1619_v6 = vmul.f32 %v4088_v61, %v1618_v18 }
0x11eb   :  { %v1620_v19 = vmul.f32 0.5, %v1619_v6 }
0x11ed   :  { %v1621_v20 = vsub.f32 1.5, %v1620_v19 }
0x11ef   :  { %v1622_v21 = vmul.f32 %v4088_v61, %v1621_v20 }
0x11f1   :  { %v1626_v23 = vsel %vm1625_vm14, %v4088_v61, %v1622_v21  ;;  %v5175_v61 = vld [vmem:[%s6200_s7 + $0x20] sm:$0xff] }
0x11f2   :  { %v1628_v24 = vmul.f32 %v1626_v23, %v1594_v56  ;;  %v3801_v56 = vld [vmem:[%s6195_s2 + $0x138] sm:$0xff]  ;;  %v1839_v23 = vperm.slane %v5175_v61, 0 }
0x11f3   :  { %1903 = vmatpush.msrb.mxu1 %v3801_v56 }
0x11f4   :  { %v1631_v48 = vmul.f32 %v1629_v31, %v1628_v24 }
0x11f5   :  { %1904 = vmatpush.msrb.mxu1 %v3799_v4 }
0x11f6   :  { %v1761_v32 = vpop.f32.mrf.mxu2  ;;  %v1634_v34 = vadd.f32 %v1632_v14, %v1631_v48  ;;  %v1784_v30 = vpop.f32.mrf.mxu3 }
0x11f7   :  { %v1762_v0 = vadd.f32 %v1761_v32, %v1743_v28 }
0x11f8   :  { %3757 = vmatmul.msk.f32.gmra.mxu0 %vm48_vm0, %v1634_v34  ;;  %3759 = vmatmul.msk.f32.gmra.mxu1 %vm48_vm0, %v1634_v34  ;;  %v1842_v34 = vperm.slane %v5175_v61, 1 }
0x11f9   :  { %v1785_v22 = vadd.f32 %v1784_v30, %v1762_v0 }
0x11fb   :  { %v5112_v40 = vadd.f32 %v1785_v22, %v4918_v26 }
0x11fd   :  { %v1795_v36 = vsel %vm48_vm0, %v5112_v40, 0.0 }
0x11fe   :  { %1796 = vadd.xlane.f32.xlu1 %v1795_v36 }
0x1271   :  { %v1797_v31 = vpop.xlane.xlu1 %1796 }
0x1272   :  { %v1801_v37 = vmul.f32 %v1797_v31, %v4335_v17 }
0x1274   :  { %v5118_v14 = vsub.f32 %v5112_v40, %v1801_v37 }
0x1275   :  { %v1680_v39 = vpop.f32.mrf.mxu0  ;;  %v1703_v41 = vpop.f32.mrf.mxu1 }
0x1276   :  { %v1681_v42 = vadd.f32 %v1680_v39, %v1652_v57  ;;  %v1704_v13 = vadd.f32 %v1703_v41, %v1653_v27  ;;  %v1805_v16 = vmul.f32 %v5118_v14, %v5118_v14  ;;  %v3797_v57 = vld [vmem:[%s6195_s2 + $0x118] sm:$0xff]  ;;  %v3794_v27 = vld [vmem:[%s6195_s2 + $0x100] sm:$0xff]  ;;  %v3820_v41 = vld [vmem:[%s6196_s3 + $0xb0] sm:$0xff] }
0x1277   :  { %1905 = vmatpush.msrb.mxu1 %v3797_v57  ;;  %1883 = vmatpush.msra.mxu0 %v3794_v27  ;;  %v3821_v39 = vld [vmem:[%s6196_s3 + $0xb8] sm:$0xff] }
0x1278   :  { %v1708_v43 = vmax.f32 %v1681_v42, 0.0  ;;  %v1709_v26 = vmax.f32 %v1704_v13, 0.0  ;;  %v1807_v44 = vsel %vm48_vm0, %v1805_v16, 0.0  ;;  %v3819_v42 = vld [vmem:[%s6196_s3 + $0xa8] sm:$0xff]  ;;  %v3818_v13 = vld [vmem:[%s6196_s3 + $0xa0] sm:$0xff]  ;;  %v3817_v16 = vld [vmem:[%s6196_s3 + $0x98] sm:$0xff] }
0x1279   :  { %1808 = vadd.xlane.f32.xlu2 %v1807_v44  ;;  %1906 = vmatpush.msrb.mxu1 %v3795_v7  ;;  %v3815_v44 = vld [vmem:[%s6196_s3 + $0x88] sm:$0xff] }
0x127a   :  { %1763 = vmatmul.f32.gmra.mxu2 %v1708_v43  ;;  %1786 = vmatmul.f32.gmra.mxu3 %v1709_v26  ;;  %v3816_v43 = vld [vmem:[%s6196_s3 + $0x90] sm:$0xff] }
0x127b   :  { %1931 = vmatpush.msrb.mxu0 %v3821_v39 }
0x127d   :  { %1932 = vmatpush.msrb.mxu0 %v3820_v41 }
0x127f   :  { %1933 = vmatpush.msrb.mxu0 %v3819_v42 }
0x1281   :  { %1934 = vmatpush.msrb.mxu0 %v3818_v13 }
0x1283   :  { %1935 = vmatpush.msrb.mxu0 %v3817_v16 }
0x1285   :  { %1936 = vmatpush.msrb.mxu0 %v3816_v43 }
0x1287   :  { %1937 = vmatpush.msrb.mxu0 %v3815_v44 }
0x1289   :  { %1938 = vmatpush.msrb.mxu0 %v3814_v46 }
0x12ec   :  { %v1809_v8 = vpop.xlane.xlu2 %1808 }
0x12ed   :  { %v1813_v59 = vmul.f32 %v1809_v8, %v4335_v17 }
0x12ef   :  { %v1815_v60 = vadd.f32 1e-05, %v1813_v59 }
0x12f1   :  { %4089 = vrsqrt.f32 %v1815_v60  ;;  %vm1823_vm1 = vweird.f32 %v1815_v60 }
0x12f7   :  { %v4090_v9 = vpop.eup %4089 }
0x12f8   :  { %v1818_v10 = vmul.f32 %v4090_v9, %v1815_v60  ;;  %vm1824_vm15 = vweird.f32 %v4090_v9 }
0x12f9   :  { %vm1825_vm2 = vmor %vm1823_vm1, %vm1824_vm15 }
0x12fa   :  { %v1819_v11 = vmul.f32 %v4090_v9, %v1818_v10 }
0x12fc   :  { %v1820_v12 = vmul.f32 0.5, %v1819_v11 }
0x12fd   :  { %v1764_v15 = vpop.f32.mrf.mxu2  ;;  %v1787_v19 = vpop.f32.mrf.mxu3 }
0x12fe   :  { %v1821_v18 = vsub.f32 1.5, %v1820_v12  ;;  %v1765_v6 = vadd.f32 %v1764_v15, %v1743_v28  ;;  %v3837_v12 = vld [vmem:[%s6197_s4 + $0xb0] sm:$0xff] }
0x1300   :  { %v1822_v20 = vmul.f32 %v4090_v9, %v1821_v18  ;;  %v1788_v21 = vadd.f32 %v1787_v19, %v1765_v6  ;;  %v3836_v18 = vld [vmem:[%s6197_s4 + $0xa8] sm:$0xff]  ;;  %v3835_v6 = vld [vmem:[%s6197_s4 + $0xa0] sm:$0xff] }
0x1302   :  { %v1826_v24 = vsel %vm1825_vm2, %v4090_v9, %v1822_v20  ;;  %v5181_v48 = vadd.f32 %v1788_v21, %v5028_v29  ;;  %v3838_v9 = vld [vmem:[%s6197_s4 + $0xb8] sm:$0xff] }
0x1303   :  { %v1837_v32 = vmul.f32 %v1826_v24, %v5118_v14 }
0x1304   :  { %v1798_v0 = vsel %vm48_vm0, %v5181_v48, 0.0 }
0x1305   :  { %v1840_v2 = vmul.f32 %v1839_v23, %v1837_v32  ;;  %1799 = vadd.xlane.f32.xlu0 %v1798_v0 }
0x1307   :  { %v1843_v28 = vadd.f32 %v1842_v34, %v1840_v2 }
0x1309   :  { %3810 = vmatmul.msk.f32.vlgmr.msra.gmra.mxu0 %vm48_vm0, %v1843_v28  ;;  %3812 = vmatmul.msk.f32.vlgmr.msrb.gmra.mxu1 %vm48_vm0, %v1843_v28 }
0x1378   :  { %v1800_v30 = vpop.xlane.xlu0 %1799 }
0x1379   :  { %v1802_v22 = vmul.f32 %v1800_v30, %v4335_v17 }
0x137b   :  { %v1804_v29 = vsub.f32 %v5181_v48, %v1802_v22 }
0x137d   :  { %v1806_v36 = vmul.f32 %v1804_v29, %v1804_v29 }
0x137f   :  { %v1810_v31 = vsel %vm48_vm0, %v1806_v36, 0.0 }
0x1380   :  { %1811 = vadd.xlane.f32.xlu1 %v1810_v31 }
0x1386   :  { %v5192_v37 = vpop.f32.mrf.mxu0  ;;  %v1908_v14 = vpop.f32.mrf.mxu1 }
0x1387   :  { %2039 = vmatpush.msrb.mxu2 %v1908_v14  ;;  %2053 = vrot.lane.b32.xlu2 %v5192_v37, %s4234_s12 }
0x138f   :  { %2049 = vrot.lane.b32.xlu2 %v5192_v37, %s4236_s16 }
0x1397   :  { %1949 = vrot.lane.b32.xlu2 %v5192_v37, %s4235_s15 }
0x13e1   :  { %v2054_v7 = vpop.permute.xlu2 %2053 }
0x13f3   :  { %v1812_v26 = vpop.xlane.xlu1 %1811 }
0x13f4   :  { %v1814_v45 = vmul.f32 %v1812_v26, %v4335_v17 }
0x13f6   :  { %v1816_v47 = vadd.f32 1e-05, %v1814_v45 }
0x13f8   :  { %4091 = vrsqrt.f32 %v1816_v47  ;;  %vm1833_vm4 = vweird.f32 %v1816_v47 }
0x13fe   :  { %v4092_v49 = vpop.eup %4091 }
0x13ff   :  { %v1828_v50 = vmul.f32 %v4092_v49, %v1816_v47  ;;  %vm1834_vm3 = vweird.f32 %v4092_v49 }
0x1400   :  { %vm1835_vm7 = vmor %vm1833_vm4, %vm1834_vm3 }
0x1401   :  { %v1829_v51 = vmul.f32 %v4092_v49, %v1828_v50 }
0x1403   :  { %v1830_v52 = vmul.f32 0.5, %v1829_v51 }
0x1405   :  { %v1831_v53 = vsub.f32 1.5, %v1830_v52 }
0x1407   :  { %v1832_v54 = vmul.f32 %v4092_v49, %v1831_v53 }
0x1409   :  { %v1836_v56 = vsel %vm1835_vm7, %v4092_v49, %v1832_v54 }
0x140a   :  { %v1838_v1 = vmul.f32 %v1836_v56, %v1804_v29  ;;  %v3830_v56 = vld [vmem:[%s6197_s4 + $0x98] sm:$0xff] }
0x140b   :  { %2194 = vmatpush.msra.mxu2 %v3830_v56 }
0x140c   :  { %v1841_v4 = vmul.f32 %v1839_v23, %v1838_v1  ;;  %v3829_v1 = vld [vmem:[%s6197_s4 + $0x90] sm:$0xff] }
0x140d   :  { %2195 = vmatpush.msra.mxu2 %v3829_v1 }
0x140e   :  { %v1844_v5 = vadd.f32 %v1842_v34, %v1841_v4  ;;  %v3828_v4 = vld [vmem:[%s6197_s4 + $0x88] sm:$0xff] }
0x140f   :  { %2196 = vmatpush.msra.mxu2 %v3828_v4 }
0x1410   :  { %3811 = vmatmul.msk.f32.gmra.mxu0 %vm48_vm0, %v1844_v5  ;;  %3813 = vmatmul.msk.f32.gmra.mxu1 %vm48_vm0, %v1844_v5  ;;  %v3827_v5 = vld [vmem:[%s6197_s4 + $0x80] sm:$0xff] }
0x1411   :  { %2197 = vmatpush.msra.mxu2 %v3827_v5 }
0x1418   :  { %3822 = vmatmul.msk.f32.vlgmr.msrb.gmra.mxu0 %vm48_vm0, %v4827_v58  ;;  %v2050_v58 = vpop.permute.xlu2 %2049 }
0x1420   :  { %v1950_v8 = vpop.permute.xlu2 %1949 }
0x148d   :  { %v1888_v57 = vpop.f32.mrf.mxu0  ;;  %v5262_v23 = vpop.f32.mrf.mxu1 }
0x1495   :  { %v5229_v27 = vpop.f32.mrf.mxu0 }
0x1496   :  { %1952 = vrot.lane.b32.xlu0 %v5229_v27, %s4236_s16  ;;  %2056 = vrot.lane.b32.xlu1 %v5229_v27, %s4235_s15  ;;  %v2052_v15 = vsel %vm209_vm5, %v2050_v58, %v5229_v27 }
0x149e   :  { %1944 = vrot.lane.b32.xlu0 %v5229_v27, %s4234_s12 }
0x14a6   :  { %2126 = vrot.lane.b32.xlu0 %v1908_v14, %s4236_s16 }
0x14ae   :  { %2304 = vrot.lane.b32.xlu0 %v1888_v57, %s4234_s12 }
0x14b6   :  { %2204 = vrot.lane.b32.xlu0 %v1888_v57, %s4235_s15 }
0x1508   :  { %v1953_v59 = vpop.permute.xlu0 %1952  ;;  %v2057_v60 = vpop.permute.xlu1 %2056 }
0x1509   :  { %v1955_v10 = vsel %vm209_vm5, %v1950_v8, %v1953_v59  ;;  %v2059_v11 = vsel %vm209_vm5, %v2054_v7, %v2057_v60 }
0x150a   :  { %3823 = vmatpush.xpose.msk.msra.mxu1 %vm48_vm0, %v1955_v10  ;;  %3831 = vmatpush.xpose.msk.msra.mxu3 %vm48_vm0, %v2059_v11 }
0x150d   :  { %3832 = vmatmul.msk.f32.vlgmr.msra.gmra.mxu3 %vm48_vm0, %v2052_v15 }
0x150e   :  { %2171 = vmatpush.msrb.mxu1 %v3838_v9 }
0x1510   :  { %2172 = vmatpush.msrb.mxu1 %v3837_v12  ;;  %v1945_v19 = vpop.permute.xlu0 %1944 }
0x1511   :  { %v1947_v20 = vsel %vm209_vm5, %v5192_v37, %v1945_v19  ;;  %v2202_v2 = vsel %vm209_vm5, %v1888_v57, %v1945_v19 }
0x1512   :  { %2173 = vmatpush.msrb.mxu1 %v3836_v18 }
0x1513   :  { %3824 = vmatmul.msk.f32.vlgmr.msra.gmra.mxu1 %vm48_vm0, %v1947_v20 }
0x1514   :  { %2174 = vmatpush.msrb.mxu1 %v3835_v6 }
0x1518   :  { %v2127_v21 = vpop.permute.xlu0 %2126 }
0x1519   :  { %2147 = vmatpush.msra.mxu0 %v2127_v21 }
0x151b   :  { %2291 = vmatpush.msrb.mxu0 %v5262_v23 }
0x1520   :  { %v2305_v24 = vpop.permute.xlu0 %2304 }
0x1521   :  { %v2307_v32 = vsel %vm209_vm5, %v2305_v24, %v2057_v60 }
0x1522   :  { %3849 = vmatpush.xpose.msk.msra.mxu1 %vm48_vm0, %v2307_v32 }
0x1528   :  { %v2205_v34 = vpop.permute.xlu0 %2204 }
0x1529   :  { %v2207_v0 = vsel %vm209_vm5, %v2205_v34, %v1953_v59 }
0x152a   :  { %3841 = vmatpush.xpose.msk.msrb.mxu3 %vm48_vm0, %v2207_v0  ;;  %v2452_v0 = vperm.slane %v5175_v61, 2 }
0x152d   :  { %3842 = vmatmul.msk.f32.vlgmr.msrb.gmra.mxu3 %vm48_vm0, %v2202_v2 }
0x152e   :  { %2419 = vmatpush.msra.mxu3 %v3838_v9 }
0x1530   :  { %2420 = vmatpush.msra.mxu3 %v3837_v12 }
0x1532   :  { %2421 = vmatpush.msra.mxu3 %v3836_v18 }
0x1534   :  { %2422 = vmatpush.msra.mxu3 %v3835_v6 }
0x1590   :  { %v2083_v28 = vpop.f32.mrf.mxu3  ;;  %v1979_v39 = vpop.f32.mrf.mxu1 }
0x1591   :  { %v2086_v30 = vmul.f32 0.17677669, %v2083_v28  ;;  %v1982_v41 = vmul.f32 0.17677669, %v1979_v39 }
0x1593   :  { %v2087_v22 = vsel %vm246_vm6, %v2086_v30, -inf  ;;  %v1983_v42 = vsel %vm246_vm6, %v1982_v41, -inf }
0x1594   :  { %2088 = vmax.xlane.f32.xlu1 %v2087_v22 }
0x15ad   :  { %2300 = vrot.lane.b32.xlu1 %v1888_v57, %s4236_s16 }
0x15b0   :  { %v2231_v8 = vpop.f32.mrf.mxu3 }
0x15b1   :  { %v2234_v59 = vmul.f32 0.17677669, %v2231_v8 }
0x15b3   :  { %v2235_v9 = vsel %vm246_vm6, %v2234_v59, -inf }
0x1607   :  { %v2089_v29 = vpop.xlane.xlu1 %2088 }
0x1608   :  { %v2090_v36 = vsub.f32 %v2086_v30, %v2089_v29 }
0x160a   :  { %v2091_v31 = vmul.f32 1.442695, %v2090_v36 }
0x160c   :  { %4093 = vpow2.f32 %v2091_v31 }
0x1612   :  { %v4094_v37 = vpop.eup %4093 }
0x1613   :  { %v2093_v14 = vsel %vm246_vm6, %v4094_v37, 0.0 }
0x1614   :  { %2094 = vadd.xlane.f32.xlu2 %v2093_v14 }
0x161c   :  { %1984 = vmax.xlane.f32.xlu2 %v1983_v42 }
0x161f   :  { %v2301_v51 = vpop.permute.xlu1 %2300 }
0x1620   :  { %v2303_v53 = vsel %vm209_vm5, %v2301_v51, %v5229_v27  ;;  %v3865_v51 = vld [vmem:[%s6198_s5 + $0x130] sm:$0xff] }
0x1687   :  { %v2095_v13 = vpop.xlane.xlu2 %2094 }
0x1688   :  { %4095 = vrcp.f32 %v2095_v13 }
0x168e   :  { %v4096_v16 = vpop.eup %4095 }
0x168f   :  { %v5275_v43 = vmul.f32 %v4096_v16, %v4094_v37  ;;  %v1985_v26 = vpop.xlane.xlu2 %1984  ;;  %v3873_v16 = vld [vmem:[%s6198_s5 + $0x170] sm:$0xff] }
0x1690   :  { %v1986_v44 = vsub.f32 %v1982_v41, %v1985_v26  ;;  %v3874_v26 = vld [vmem:[%s6198_s5 + $0x178] sm:$0xff] }
0x1691   :  { %3834 = vmatmul.msk.f32.vlgmr.msra.gmra.mxu0 %vm246_vm6, %v5275_v43 }
0x1692   :  { %v1987_v45 = vmul.f32 1.442695, %v1986_v44  ;;  %2442 = vmatpush.msra.mxu0 %v3830_v56  ;;  %v3871_v44 = vld [vmem:[%s6198_s5 + $0x160] sm:$0xff]  ;;  %v3864_v56 = vld [vmem:[%s6198_s5 + $0x128] sm:$0xff] }
0x1694   :  { %4097 = vpow2.f32 %v1987_v45  ;;  %2443 = vmatpush.msra.mxu0 %v3829_v1  ;;  %v3872_v45 = vld [vmem:[%s6198_s5 + $0x168] sm:$0xff]  ;;  %v3861_v1 = vld [vmem:[%s6198_s5 + $0x110] sm:$0xff] }
0x1696   :  { %2444 = vmatpush.msra.mxu0 %v3828_v4  ;;  %v3862_v4 = vld [vmem:[%s6198_s5 + $0x118] sm:$0xff] }
0x1698   :  { %2445 = vmatpush.msra.mxu0 %v3827_v5  ;;  %v3859_v5 = vld [vmem:[%s6198_s5 + $0x100] sm:$0xff] }
0x169a   :  { %v4098_v46 = vpop.eup %4097 }
0x169b   :  { %v1989_v47 = vsel %vm246_vm6, %v4098_v46, 0.0 }
0x169c   :  { %1990 = vadd.xlane.f32.xlu0 %v1989_v47  ;;  %v3870_v47 = vld [vmem:[%s6198_s5 + $0x158] sm:$0xff] }
0x170e   :  { %v2149_v49 = vpop.f32.mrf.mxu0 }
0x170f   :  { %3839 = vmatmul.msk.f32.vlgmr.msrb.gmra.mxu1 %vm209_vm5, %v2149_v49  ;;  %v1991_v50 = vpop.xlane.xlu0 %1990  ;;  %v3867_v49 = vld [vmem:[%s6198_s5 + $0x140] sm:$0xff] }
0x1710   :  { %4099 = vrcp.f32 %v1991_v50  ;;  %2538 = vmatpush.msrb.mxu1 %v3873_v16  ;;  %v3868_v50 = vld [vmem:[%s6198_s5 + $0x148] sm:$0xff]  ;;  %v3905_v16 = vld [vmem:[%s6199_s6 + $0x2d0] sm:$0xff] }
0x1712   :  { %2539 = vmatpush.msrb.mxu1 %v3871_v44  ;;  %v3904_v44 = vld [vmem:[%s6199_s6 + $0x2c8] sm:$0xff] }
0x1716   :  { %v4100_v52 = vpop.eup %4099 }
0x1717   :  { %v5283_v54 = vmul.f32 %v4100_v52, %v4098_v46  ;;  %3850 = vmatmul.msk.f32.vlgmr.msra.gmra.mxu1 %vm48_vm0, %v2303_v53  ;;  %v3869_v46 = vld [vmem:[%s6198_s5 + $0x150] sm:$0xff]  ;;  %v3866_v52 = vld [vmem:[%s6198_s5 + $0x138] sm:$0xff]  ;;  %v3863_v53 = vld [vmem:[%s6198_s5 + $0x120] sm:$0xff] }
0x1718   :  { %2540 = vmatpush.msrb.mxu1 %v3869_v46  ;;  %v3903_v46 = vld [vmem:[%s6199_s6 + $0x2c0] sm:$0xff] }
0x1719   :  { %3826 = vmatmul.msk.f32.vlgmr.msrb.gmra.mxu2 %vm246_vm6, %v5283_v54 }
0x171a   :  { %2541 = vmatpush.msrb.mxu1 %v3867_v49  ;;  %v3902_v49 = vld [vmem:[%s6199_s6 + $0x2b8] sm:$0xff] }
0x171c   :  { %2542 = vmatpush.msrb.mxu1 %v3865_v51  ;;  %v3901_v51 = vld [vmem:[%s6199_s6 + $0x2b0] sm:$0xff] }
0x171e   :  { %2543 = vmatpush.msrb.mxu1 %v3863_v53  ;;  %v3900_v53 = vld [vmem:[%s6199_s6 + $0x2a8] sm:$0xff] }
0x1720   :  { %2544 = vmatpush.msrb.mxu1 %v3861_v1  ;;  %v3899_v1 = vld [vmem:[%s6199_s6 + $0x2a0] sm:$0xff] }
0x1722   :  { %2545 = vmatpush.msrb.mxu1 %v3859_v5  ;;  %v3898_v5 = vld [vmem:[%s6199_s6 + $0x298] sm:$0xff] }
0x178c   :  { %v2176_v57 = vpop.f32.mrf.mxu1 }
0x1794   :  { %v2331_v27 = vpop.f32.mrf.mxu1 }
0x1795   :  { %v2334_v7 = vmul.f32 0.17677669, %v2331_v27  ;;  %v3894_v27 = vld [vmem:[%s6199_s6 + $0x278] sm:$0xff] }
0x1796   :  { %2614 = vmatpush.msrb.mxu3 %v3894_v27  ;;  %v3896_v27 = vld [vmem:[%s6199_s6 + $0x288] sm:$0xff] }
0x1797   :  { %v2335_v58 = vsel %vm246_vm6, %v2334_v7, -inf }
0x1798   :  { %2336 = vmax.xlane.f32.xlu2 %v2335_v58 }
0x179c   :  { %v2041_v60 = vpop.f32.mrf.mxu2 }
0x179d   :  { %3840 = vmatmul.msk.f32.vlgmr.msra.gmra.mxu2 %vm209_vm5, %v2041_v60 }
0x17a0   :  { %2236 = vmax.xlane.f32.xlu2 %v2235_v9 }
0x17b8   :  { %2374 = vrot.lane.b32.xlu2 %v5262_v23, %s4236_s16 }
0x180b   :  { %v2337_v10 = vpop.xlane.xlu2 %2336 }
0x180c   :  { %v2338_v11 = vsub.f32 %v2334_v7, %v2337_v10 }
0x180e   :  { %v2339_v12 = vmul.f32 1.442695, %v2338_v11 }
0x1810   :  { %4101 = vpow2.f32 %v2339_v12 }
0x1813   :  { %v2237_v15 = vpop.xlane.xlu2 %2236 }
0x1814   :  { %v2238_v18 = vsub.f32 %v2234_v59, %v2237_v15 }
0x1816   :  { %v4102_v6 = vpop.eup %4101  ;;  %v2239_v19 = vmul.f32 1.442695, %v2238_v18 }
0x1817   :  { %v2341_v20 = vsel %vm246_vm6, %v4102_v6, 0.0 }
0x1818   :  { %4103 = vpow2.f32 %v2239_v19  ;;  %2342 = vadd.xlane.f32.xlu1 %v2341_v20 }
0x181b   :  { %v2375_v21 = vpop.permute.xlu2 %2374 }
0x181c   :  { %2395 = vmatpush.msrb.mxu2 %v2375_v21  ;;  %v2502_v21 = vperm.slane %v5175_v61, 4 }
0x181e   :  { %v4104_v24 = vpop.eup %4103  ;;  %2561 = vmatpush.msra.mxu2 %v3874_v26  ;;  %v3885_v26 = vld [vmem:[%s6199_s6 + $0x230] sm:$0xff] }
0x181f   :  { %v2241_v32 = vsel %vm246_vm6, %v4104_v24, 0.0 }
0x1820   :  { %v2199_v34 = vpop.f32.mrf.mxu2  ;;  %2242 = vadd.xlane.f32.xlu0 %v2241_v32  ;;  %2562 = vmatpush.msra.mxu2 %v3872_v45  ;;  %v3884_v45 = vld [vmem:[%s6199_s6 + $0x228] sm:$0xff] }
0x1821   :  { %v2200_v23 = vadd.f32 %v2199_v34, %v2176_v57  ;;  %v3860_v57 = vld [vmem:[%s6198_s5 + $0x108] sm:$0xff]  ;;  %v3893_v34 = vld [vmem:[%s6199_s6 + $0x270] sm:$0xff] }
0x1822   :  { %2563 = vmatpush.msra.mxu2 %v3870_v47  ;;  %2615 = vmatpush.msrb.mxu3 %v3893_v34  ;;  %v3883_v47 = vld [vmem:[%s6199_s6 + $0x220] sm:$0xff] }
0x1823   :  { %v2450_v2 = vadd.f32 %v2200_v23, %v5112_v40  ;;  %v3892_v23 = vld [vmem:[%s6199_s6 + $0x268] sm:$0xff] }
0x1824   :  { %2564 = vmatpush.msra.mxu2 %v3868_v50  ;;  %2616 = vmatpush.msrb.mxu3 %v3892_v23  ;;  %v3882_v50 = vld [vmem:[%s6199_s6 + $0x218] sm:$0xff] }
0x1825   :  { %v5311_v28 = vadd.f32 %v2452_v0, %v2450_v2  ;;  %v3891_v2 = vld [vmem:[%s6199_s6 + $0x260] sm:$0xff] }
0x1826   :  { %2565 = vmatpush.msra.mxu2 %v3866_v52  ;;  %2617 = vmatpush.msrb.mxu3 %v3891_v2  ;;  %v3881_v52 = vld [vmem:[%s6199_s6 + $0x210] sm:$0xff] }
0x1827   :  { %v2455_v30 = vsel %vm48_vm0, %v5311_v28, 0.0 }
0x1828   :  { %2456 = vadd.xlane.f32.xlu2 %v2455_v30  ;;  %2566 = vmatpush.msra.mxu2 %v3864_v56  ;;  %v3910_v30 = vld [vmem:[%s6199_s6 + $0x2f8] sm:$0xff]  ;;  %v3880_v56 = vld [vmem:[%s6199_s6 + $0x208] sm:$0xff] }
0x182a   :  { %2567 = vmatpush.msra.mxu2 %v3862_v4  ;;  %v3879_v4 = vld [vmem:[%s6199_s6 + $0x200] sm:$0xff] }
0x182c   :  { %2568 = vmatpush.msra.mxu2 %v3860_v57  ;;  %v3897_v57 = vld [vmem:[%s6199_s6 + $0x290] sm:$0xff] }
0x188b   :  { %v2343_v22 = vpop.xlane.xlu1 %2342 }
0x188c   :  { %4105 = vrcp.f32 %v2343_v22  ;;  %v3890_v22 = vld [vmem:[%s6199_s6 + $0x258] sm:$0xff] }
0x188d   :  { %2618 = vmatpush.msrb.mxu3 %v3890_v22  ;;  %v2613_v22 = vperm.slane %v5175_v61, 5 }
0x1892   :  { %v4106_v29 = vpop.eup %4105 }
0x1893   :  { %v5315_v36 = vmul.f32 %v4106_v29, %v4102_v6  ;;  %v2243_v31 = vpop.xlane.xlu0 %2242  ;;  %v2499_v6 = vperm.slane %v5175_v61, 3  ;;  %v3909_v29 = vld [vmem:[%s6199_s6 + $0x2f0] sm:$0xff] }
0x1894   :  { %4107 = vrcp.f32 %v2243_v31  ;;  %v3889_v31 = vld [vmem:[%s6199_s6 + $0x250] sm:$0xff] }
0x1895   :  { %3852 = vmatmul.msk.f32.vlgmr.msrb.gmra.mxu2 %vm246_vm6, %v5315_v36  ;;  %2619 = vmatpush.msrb.mxu3 %v3889_v31 }
0x189a   :  { %v4108_v37 = vpop.eup %4107 }
0x189b   :  { %v5319_v40 = vmul.f32 %v4108_v37, %v4104_v24  ;;  %v2457_v14 = vpop.xlane.xlu2 %2456  ;;  %v3908_v37 = vld [vmem:[%s6199_s6 + $0x2e8] sm:$0xff] }
0x189c   :  { %v2461_v39 = vmul.f32 %v2457_v14, %v4335_v17  ;;  %v3888_v14 = vld [vmem:[%s6199_s6 + $0x248] sm:$0xff] }
0x189d   :  { %3844 = vmatmul.msk.f32.vlgmr.msrb.gmra.mxu0 %vm246_vm6, %v5319_v40  ;;  %2620 = vmatpush.msrb.mxu3 %v3888_v14 }
0x189e   :  { %v2463_v41 = vsub.f32 %v5311_v28, %v2461_v39  ;;  %2637 = vmatpush.msrb.mxu0 %v3910_v30  ;;  %v3907_v39 = vld [vmem:[%s6199_s6 + $0x2e0] sm:$0xff] }
0x18a0   :  { %v2465_v42 = vmul.f32 %v2463_v41, %v2463_v41  ;;  %2638 = vmatpush.msrb.mxu0 %v3909_v29 }
0x18a2   :  { %v2467_v13 = vsel %vm48_vm0, %v2465_v42, 0.0  ;;  %2639 = vmatpush.msrb.mxu0 %v3908_v37  ;;  %v3906_v42 = vld [vmem:[%s6199_s6 + $0x2d8] sm:$0xff] }
0x18a3   :  { %2468 = vadd.xlane.f32.xlu1 %v2467_v13  ;;  %v3886_v13 = vld [vmem:[%s6199_s6 + $0x238] sm:$0xff] }
0x18a4   :  { %2640 = vmatpush.msrb.mxu0 %v3907_v39 }
0x18a6   :  { %2641 = vmatpush.msrb.mxu0 %v3906_v42 }
0x18a8   :  { %2642 = vmatpush.msrb.mxu0 %v3905_v16 }
0x18aa   :  { %2643 = vmatpush.msrb.mxu0 %v3904_v44 }
0x18ac   :  { %2644 = vmatpush.msrb.mxu0 %v3903_v46 }
0x18ae   :  { %2645 = vmatpush.msrb.mxu0 %v3902_v49 }
0x18b0   :  { %2646 = vmatpush.msrb.mxu0 %v3901_v51 }
0x18b2   :  { %2647 = vmatpush.msrb.mxu0 %v3900_v53 }
0x18b4   :  { %2648 = vmatpush.msrb.mxu0 %v3899_v1 }
0x18b6   :  { %2649 = vmatpush.msrb.mxu0 %v3898_v5 }
0x18b8   :  { %2650 = vmatpush.msrb.mxu0 %v3897_v57  ;;  %v3925_v57 = vld [vmem:[%s6195_s2 + $0x1e0] sm:$0xff] }
0x18ba   :  { %2651 = vmatpush.msrb.mxu0 %v3896_v27  ;;  %v3926_v27 = vld [vmem:[%s6195_s2 + $0x1e8] sm:$0xff] }
0x1916   :  { %v2469_v7 = vpop.xlane.xlu1 %2468 }
0x1917   :  { %v2473_v58 = vmul.f32 %v2469_v7, %v4335_v17  ;;  %v3895_v7 = vld [vmem:[%s6199_s6 + $0x280] sm:$0xff] }
0x1918   :  { %v2397_v8 = vpop.f32.mrf.mxu2  ;;  %2652 = vmatpush.msrb.mxu0 %v3895_v7  ;;  %v3923_v7 = vld [vmem:[%s6195_s2 + $0x1d0] sm:$0xff] }
0x1919   :  { %v2475_v59 = vadd.f32 1e-05, %v2473_v58  ;;  %3857 = vmatmul.msk.f32.vlgmr.msra.gmra.mxu3 %vm209_vm5, %v2397_v8 }
0x191a   :  { %v2293_v60 = vpop.f32.mrf.mxu0 }
0x191b   :  { %4109 = vrsqrt.f32 %v2475_v59  ;;  %3858 = vmatmul.msk.f32.vlgmr.msra.gmra.mxu0 %vm209_vm5, %v2293_v60  ;;  %vm2483_vm9 = vweird.f32 %v2475_v59 }
0x1921   :  { %v4110_v9 = vpop.eup %4109 }
0x1922   :  { %v2478_v10 = vmul.f32 %v4110_v9, %v2475_v59  ;;  %vm2484_vm8 = vweird.f32 %v4110_v9 }
0x1923   :  { %vm2485_vm10 = vmor %vm2483_vm9, %vm2484_vm8 }
0x1924   :  { %v2479_v11 = vmul.f32 %v4110_v9, %v2478_v10 }
0x1926   :  { %v2480_v12 = vmul.f32 0.5, %v2479_v11  ;;  %v2522_v11 = vperm.slane %v5175_v61, 6 }
0x1928   :  { %v2481_v15 = vsub.f32 1.5, %v2480_v12 }
0x192a   :  { %v2482_v18 = vmul.f32 %v4110_v9, %v2481_v15  ;;  %v5492_v15 = vld [vmem:[%s6200_s7 + $0x28] sm:$0xff] }
0x192c   :  { %v2486_v19 = vsel %vm2485_vm10, %v4110_v9, %v2482_v18 }
0x192d   :  { %v2497_v20 = vmul.f32 %v2486_v19, %v2463_v41  ;;  %v3887_v41 = vld [vmem:[%s6199_s6 + $0x240] sm:$0xff]  ;;  %v2523_v19 = vperm.slane %v5492_v15, 6 }
0x192e   :  { %2621 = vmatpush.msrb.mxu3 %v3887_v41 }
0x192f   :  { %v2500_v24 = vmul.f32 %v2499_v6, %v2497_v20 }
0x1930   :  { %2622 = vmatpush.msrb.mxu3 %v3886_v13 }
0x1931   :  { %v2503_v32 = vadd.f32 %v2502_v21, %v2500_v24 }
0x1932   :  { %2623 = vmatpush.msrb.mxu3 %v3885_v26 }
0x1933   :  { %3875 = vmatmul.msk.f32.vlgmr.msrb.gmra.mxu1 %vm48_vm0, %v2503_v32  ;;  %3877 = vmatmul.msk.f32.vlgmr.msra.gmra.mxu2 %vm48_vm0, %v2503_v32 }
0x1934   :  { %2624 = vmatpush.msrb.mxu3 %v3884_v45 }
0x1936   :  { %2625 = vmatpush.msrb.mxu3 %v3883_v47 }
0x1938   :  { %2626 = vmatpush.msrb.mxu3 %v3882_v50 }
0x193a   :  { %2627 = vmatpush.msrb.mxu3 %v3881_v52 }
0x193c   :  { %2628 = vmatpush.msrb.mxu3 %v3880_v56 }
0x193e   :  { %2629 = vmatpush.msrb.mxu3 %v3879_v4 }
0x1998   :  { %v2447_v58 = vpop.f32.mrf.mxu0 }
0x199c   :  { %v2424_v8 = vpop.f32.mrf.mxu3 }
0x199d   :  { %v2448_v59 = vadd.f32 %v2447_v58, %v2424_v8  ;;  %v3924_v58 = vld [vmem:[%s6195_s2 + $0x1d8] sm:$0xff]  ;;  %v3921_v8 = vld [vmem:[%s6195_s2 + $0x1c0] sm:$0xff] }
0x199f   :  { %v2451_v60 = vadd.f32 %v2448_v59, %v5181_v48  ;;  %v3922_v59 = vld [vmem:[%s6195_s2 + $0x1c8] sm:$0xff] }
0x19a1   :  { %v5484_v9 = vadd.f32 %v2452_v0, %v2451_v60  ;;  %v3919_v60 = vld [vmem:[%s6195_s2 + $0x1b0] sm:$0xff] }
0x19a3   :  { %v2458_v10 = vsel %vm48_vm0, %v5484_v9, 0.0 }
0x19a4   :  { %2459 = vadd.xlane.f32.xlu0 %v2458_v10  ;;  %v3920_v10 = vld [vmem:[%s6195_s2 + $0x1b8] sm:$0xff] }
0x19b0   :  { %v2547_v12 = vpop.f32.mrf.mxu1 }
0x19b1   :  { %v2548_v18 = vadd.f32 %v2547_v12, %v2522_v11  ;;  %v3917_v12 = vld [vmem:[%s6195_s2 + $0x1a0] sm:$0xff] }
0x19b3   :  { %v2576_v48 = vmax.f32 %v2548_v18, 0.0  ;;  %v3918_v18 = vld [vmem:[%s6195_s2 + $0x1a8] sm:$0xff] }
0x19b5   :  { %2630 = vmatmul.f32.vlgmr.msrb.gmra.mxu3 %v2576_v48  ;;  %v3915_v48 = vld [vmem:[%s6195_s2 + $0x190] sm:$0xff] }
0x19b6   :  { %v2570_v0 = vpop.f32.mrf.mxu2 }
0x19b7   :  { %v2571_v20 = vadd.f32 %v2570_v0, %v2523_v19  ;;  %v3916_v0 = vld [vmem:[%s6195_s2 + $0x198] sm:$0xff] }
0x19b9   :  { %v2577_v24 = vmax.f32 %v2571_v20, 0.0  ;;  %v3913_v20 = vld [vmem:[%s6195_s2 + $0x180] sm:$0xff] }
0x19bb   :  { %2653 = vmatmul.f32.vlgmr.msrb.gmra.mxu0 %v2577_v24  ;;  %v3914_v24 = vld [vmem:[%s6195_s2 + $0x188] sm:$0xff] }
0x1a17   :  { %v2460_v32 = vpop.xlane.xlu0 %2459 }
0x1a18   :  { %v2462_v34 = vmul.f32 %v2460_v32, %v4335_v17 }
0x1a1a   :  { %v2464_v23 = vsub.f32 %v5484_v9, %v2462_v34 }
0x1a1c   :  { %v2466_v2 = vmul.f32 %v2464_v23, %v2464_v23 }
0x1a1e   :  { %v2470_v30 = vsel %vm48_vm0, %v2466_v2, 0.0 }
0x1a1f   :  { %2471 = vadd.xlane.f32.xlu0 %v2470_v30 }
0x1a38   :  { %v2631_v29 = vpop.f32.mrf.mxu3  ;;  %v2654_v37 = vpop.f32.mrf.mxu0 }
0x1a39   :  { %v2632_v31 = vadd.f32 %v2631_v29, %v2613_v22 }
0x1a3b   :  { %v2655_v14 = vadd.f32 %v2654_v37, %v2632_v31 }
0x1a3d   :  { %v5506_v39 = vadd.f32 %v2655_v14, %v5311_v28 }
0x1a3f   :  { %v2665_v41 = vsel %vm48_vm0, %v5506_v39, 0.0 }
0x1a40   :  { %2666 = vadd.xlane.f32.xlu1 %v2665_v41 }
0x1a92   :  { %v2472_v42 = vpop.xlane.xlu0 %2471 }
0x1a93   :  { %v2474_v13 = vmul.f32 %v2472_v42, %v4335_v17 }
0x1a95   :  { %v2476_v16 = vadd.f32 1e-05, %v2474_v13 }
0x1a97   :  { %4111 = vrsqrt.f32 %v2476_v16  ;;  %vm2493_vm12 = vweird.f32 %v2476_v16 }
0x1a9d   :  { %v4112_v26 = vpop.eup %4111 }
0x1a9e   :  { %v2488_v44 = vmul.f32 %v4112_v26, %v2476_v16  ;;  %vm2494_vm11 = vweird.f32 %v4112_v26 }
0x1a9f   :  { %vm2495_vm13 = vmor %vm2493_vm12, %vm2494_vm11 }
0x1aa0   :  { %v2489_v45 = vmul.f32 %v4112_v26, %v2488_v44 }
0x1aa2   :  { %v2490_v46 = vmul.f32 0.5, %v2489_v45 }
0x1aa4   :  { %v2491_v47 = vsub.f32 1.5, %v2490_v46 }
0x1aa6   :  { %v2492_v49 = vmul.f32 %v4112_v26, %v2491_v47 }
0x1aa8   :  { %v2496_v28 = vsel %vm2495_vm13, %v4112_v26, %v2492_v49 }
0x1aa9   :  { %v2498_v50 = vmul.f32 %v2496_v28, %v2464_v23 }
0x1aab   :  { %v2501_v51 = vmul.f32 %v2499_v6, %v2498_v50  ;;  %v3927_v6 = vld [vmem:[%s6195_s2 + $0x1f0] sm:$0xff] }
0x1aac   :  { %2746 = vmatpush.msra.mxu1 %v3927_v6 }
0x1aad   :  { %v2504_v52 = vadd.f32 %v2502_v21, %v2501_v51  ;;  %v3928_v21 = vld [vmem:[%s6195_s2 + $0x1f8] sm:$0xff] }
0x1aae   :  { %2769 = vmatpush.msrb.mxu2 %v3928_v21  ;;  %2747 = vmatpush.msra.mxu1 %v3925_v57  ;;  %v3940_v21 = vld [vmem:[%s6196_s3 + $0xf8] sm:$0xff]  ;;  %v3939_v57 = vld [vmem:[%s6196_s3 + $0xf0] sm:$0xff] }
0x1aaf   :  { %3876 = vmatmul.msk.f32.gmra.mxu1 %vm48_vm0, %v2504_v52  ;;  %3878 = vmatmul.msk.f32.gmra.mxu2 %vm48_vm0, %v2504_v52 }
0x1ab0   :  { %2770 = vmatpush.msrb.mxu2 %v3926_v27  ;;  %2748 = vmatpush.msra.mxu1 %v3923_v7  ;;  %v3938_v27 = vld [vmem:[%s6196_s3 + $0xe8] sm:$0xff]  ;;  %v3937_v7 = vld [vmem:[%s6196_s3 + $0xe0] sm:$0xff] }
0x1ab2   :  { %2771 = vmatpush.msrb.mxu2 %v3924_v58  ;;  %2749 = vmatpush.msra.mxu1 %v3921_v8  ;;  %v3936_v58 = vld [vmem:[%s6196_s3 + $0xd8] sm:$0xff]  ;;  %v3935_v8 = vld [vmem:[%s6196_s3 + $0xd0] sm:$0xff] }
0x1ab3   :  { %v2667_v53 = vpop.xlane.xlu1 %2666 }
0x1ab4   :  { %v2671_v56 = vmul.f32 %v2667_v53, %v4335_v17  ;;  %2772 = vmatpush.msrb.mxu2 %v3922_v59  ;;  %2750 = vmatpush.msra.mxu1 %v3919_v60  ;;  %v3934_v60 = vld [vmem:[%s6196_s3 + $0xc8] sm:$0xff] }
0x1ab6   :  { %v2673_v1 = vsub.f32 %v5506_v39, %v2671_v56  ;;  %2773 = vmatpush.msrb.mxu2 %v3920_v10  ;;  %2751 = vmatpush.msra.mxu1 %v3917_v12  ;;  %v3933_v12 = vld [vmem:[%s6196_s3 + $0xc0] sm:$0xff] }
0x1ab8   :  { %v2675_v4 = vmul.f32 %v2673_v1, %v2673_v1  ;;  %2774 = vmatpush.msrb.mxu2 %v3918_v18  ;;  %2752 = vmatpush.msra.mxu1 %v3915_v48 }
0x1aba   :  { %v2677_v5 = vsel %vm48_vm0, %v2675_v4, 0.0  ;;  %2775 = vmatpush.msrb.mxu2 %v3916_v0  ;;  %2753 = vmatpush.msra.mxu1 %v3913_v20 }
0x1abb   :  { %2678 = vadd.xlane.f32.xlu1 %v2677_v5 }
0x1abc   :  { %2776 = vmatpush.msrb.mxu2 %v3914_v24  ;;  %2801 = vmatpush.msrb.mxu1 %v3940_v21 }
0x1abe   :  { %2802 = vmatpush.msrb.mxu1 %v3939_v57 }
0x1ac0   :  { %2803 = vmatpush.msrb.mxu1 %v3938_v27 }
0x1ac2   :  { %2804 = vmatpush.msrb.mxu1 %v3937_v7 }
0x1ac4   :  { %2805 = vmatpush.msrb.mxu1 %v3936_v58 }
0x1ac6   :  { %2806 = vmatpush.msrb.mxu1 %v3935_v8 }
0x1ac8   :  { %2807 = vmatpush.msrb.mxu1 %v3934_v60 }
0x1aca   :  { %2808 = vmatpush.msrb.mxu1 %v3933_v12 }
0x1b2c   :  { %v2550_v32 = vpop.f32.mrf.mxu1 }
0x1b2d   :  { %v2551_v34 = vadd.f32 %v2550_v32, %v2522_v11  ;;  %v5576_v11 = vld [vmem:[%s6200_s7 + $0x30] sm:$0xff] }
0x1b2e   :  { %v2679_v23 = vpop.xlane.xlu1 %2678  ;;  %v2709_v45 = vperm.slane %v5576_v11, 0  ;;  %v2712_v46 = vperm.slane %v5576_v11, 1 }
0x1b2f   :  { %v2578_v2 = vmax.f32 %v2551_v34, 0.0  ;;  %v2683_v30 = vmul.f32 %v2679_v23, %v4335_v17 }
0x1b31   :  { %v2685_v29 = vadd.f32 1e-05, %v2683_v30  ;;  %2633 = vmatmul.f32.gmra.mxu3 %v2578_v2 }
0x1b32   :  { %v2573_v31 = vpop.f32.mrf.mxu2 }
0x1b33   :  { %4113 = vrsqrt.f32 %v2685_v29  ;;  %v2574_v37 = vadd.f32 %v2573_v31, %v2523_v19  ;;  %vm2693_vm15 = vweird.f32 %v2685_v29  ;;  %v4206_v31 = vld [vmem:[%s6194_s1] sm:$0xff] }
0x1b35   :  { %v2579_v14 = vmax.f32 %v2574_v37, 0.0 }
0x1b37   :  { %2656 = vmatmul.f32.gmra.mxu0 %v2579_v14 }
0x1b39   :  { %v4114_v41 = vpop.eup %4113 }
0x1b3a   :  { %v2688_v42 = vmul.f32 %v4114_v41, %v2685_v29  ;;  %vm2694_vm14 = vweird.f32 %v4114_v41 }
0x1b3b   :  { %vm2695_vm1 = vmor %vm2693_vm15, %vm2694_vm14 }
0x1b3c   :  { %v2689_v13 = vmul.f32 %v4114_v41, %v2688_v42 }
0x1b3e   :  { %v2690_v16 = vmul.f32 0.5, %v2689_v13 }
0x1b40   :  { %v2691_v26 = vsub.f32 1.5, %v2690_v16 }
0x1b42   :  { %v2692_v44 = vmul.f32 %v4114_v41, %v2691_v26  ;;  %v3957_v26 = vld [vmem:[%s6197_s4 + $0xf8] sm:$0xff] }
0x1b44   :  { %v2696_v15 = vsel %vm2695_vm1, %v4114_v41, %v2692_v44 }
0x1b45   :  { %v2707_v19 = vmul.f32 %v2696_v15, %v2673_v1  ;;  %v3955_v15 = vld [vmem:[%s6197_s4 + $0xe8] sm:$0xff] }
0x1b47   :  { %v2710_v47 = vmul.f32 %v2709_v45, %v2707_v19  ;;  %v3954_v19 = vld [vmem:[%s6197_s4 + $0xe0] sm:$0xff] }
0x1b49   :  { %v2713_v49 = vadd.f32 %v2712_v46, %v2710_v47 }
0x1b4b   :  { %3929 = vmatmul.msk.f32.vlgmr.msra.gmra.mxu1 %vm48_vm0, %v2713_v49  ;;  %3931 = vmatmul.msk.f32.vlgmr.msrb.gmra.mxu2 %vm48_vm0, %v2713_v49 }
0x1bb4   :  { %v2634_v28 = vpop.f32.mrf.mxu3  ;;  %v2657_v51 = vpop.f32.mrf.mxu0 }
0x1bb5   :  { %v2635_v50 = vadd.f32 %v2634_v28, %v2613_v22 }
0x1bb7   :  { %v2658_v52 = vadd.f32 %v2657_v51, %v2635_v50 }
0x1bb9   :  { %v5585_v53 = vadd.f32 %v2658_v52, %v5484_v9 }
0x1bbb   :  { %v2668_v56 = vsel %vm48_vm0, %v5585_v53, 0.0 }
0x1bbc   :  { %2669 = vadd.xlane.f32.xlu0 %v2668_v56 }
0x1bc8   :  { %v5589_v1 = vpop.f32.mrf.mxu1 }
0x1bc9   :  { %2919 = vrot.lane.b32.xlu2 %v5589_v1, %s4236_s16  ;;  %2923 = vrot.lane.b32.xlu1 %v5589_v1, %s4234_s12 }
0x1bce   :  { %v2778_v4 = vpop.f32.mrf.mxu2 }
0x1bcf   :  { %2909 = vmatpush.msra.mxu3 %v2778_v4 }
0x1bd1   :  { %2819 = vrot.lane.b32.xlu1 %v5589_v1, %s4235_s15 }
0x1c23   :  { %v2920_v42 = vpop.permute.xlu2 %2919 }
0x1c2f   :  { %v2670_v61 = vpop.xlane.xlu0 %2669 }
0x1c30   :  { %v2672_v9 = vmul.f32 %v2670_v61, %v4335_v17 }
0x1c32   :  { %v2674_v22 = vsub.f32 %v5585_v53, %v2672_v9 }
0x1c34   :  { %v2676_v5 = vmul.f32 %v2674_v22, %v2674_v22 }
0x1c36   :  { %v2680_v6 = vsel %vm48_vm0, %v2676_v5, 0.0 }
0x1c37   :  { %2681 = vadd.xlane.f32.xlu0 %v2680_v6 }
0x1c3b   :  { %v2924_v41 = vpop.permute.xlu1 %2923 }
0x1c43   :  { %v2820_v13 = vpop.permute.xlu1 %2819 }
0x1caa   :  { %v2682_v59 = vpop.xlane.xlu0 %2681 }
0x1cab   :  { %v2684_v10 = vmul.f32 %v2682_v59, %v4335_v17 }
0x1cad   :  { %v2686_v18 = vadd.f32 1e-05, %v2684_v10 }
0x1caf   :  { %4115 = vrsqrt.f32 %v2686_v18  ;;  %vm2703_vm3 = vweird.f32 %v2686_v18 }
0x1cb5   :  { %v4116_v48 = vpop.eup %4115 }
0x1cb6   :  { %v2698_v0 = vmul.f32 %v4116_v48, %v2686_v18  ;;  %vm2704_vm2 = vweird.f32 %v4116_v48 }
0x1cb7   :  { %vm2705_vm4 = vmor %vm2703_vm3, %vm2704_vm2 }
0x1cb8   :  { %v2699_v20 = vmul.f32 %v4116_v48, %v2698_v0 }
0x1cba   :  { %v2700_v24 = vmul.f32 0.5, %v2699_v20 }
0x1cbc   :  { %v2701_v32 = vsub.f32 1.5, %v2700_v24 }
0x1cbe   :  { %v2702_v34 = vmul.f32 %v4116_v48, %v2701_v32 }
0x1cc0   :  { %v2706_v23 = vsel %vm2705_vm4, %v4116_v48, %v2702_v34 }
0x1cc1   :  { %v2708_v2 = vmul.f32 %v2706_v23, %v2674_v22 }
0x1cc3   :  { %v2711_v30 = vmul.f32 %v2709_v45, %v2708_v2  ;;  %v3956_v45 = vld [vmem:[%s6197_s4 + $0xf0] sm:$0xff] }
0x1cc5   :  { %v2714_v29 = vadd.f32 %v2712_v46, %v2711_v30 }
0x1cc7   :  { %3930 = vmatmul.msk.f32.gmra.mxu1 %vm48_vm0, %v2714_v29  ;;  %3932 = vmatmul.msk.f32.gmra.mxu2 %vm48_vm0, %v2714_v29 }
0x1ccf   :  { %3941 = vmatmul.msk.f32.vlgmr.msrb.gmra.mxu1 %vm48_vm0, %v4206_v31 }
0x1d44   :  { %v5631_v37 = vpop.f32.mrf.mxu1 }
0x1d4a   :  { %v5663_v28 = vpop.f32.mrf.mxu2 }
0x1d4c   :  { %v5633_v14 = vpop.f32.mrf.mxu1 }
0x1d4d   :  { %2822 = vrot.lane.b32.xlu2 %v5633_v14, %s4236_s16  ;;  %2926 = vrot.lane.b32.xlu0 %v5633_v14, %s4235_s15 }
0x1d55   :  { %2814 = vrot.lane.b32.xlu2 %v5633_v14, %s4234_s12 }
0x1d5d   :  { %2996 = vrot.lane.b32.xlu2 %v2778_v4, %s4236_s16 }
0x1d65   :  { %3174 = vrot.lane.b32.xlu2 %v5631_v37, %s4234_s12 }
0x1d6d   :  { %3170 = vrot.lane.b32.xlu2 %v5631_v37, %s4236_s16 }
0x1da7   :  { %v2823_v16 = vpop.permute.xlu2 %2822 }
0x1da8   :  { %v2825_v44 = vsel %vm209_vm5, %v2820_v13, %v2823_v16  ;;  %v3947_v13 = vld [vmem:[%s6197_s4 + $0xc8] sm:$0xff] }
0x1da9   :  { %3942 = vmatpush.xpose.msk.msra.mxu2 %vm48_vm0, %v2825_v44 }
0x1dad   :  { %3041 = vmatpush.msrb.mxu2 %v3957_v26 }
0x1daf   :  { %3042 = vmatpush.msrb.mxu2 %v3956_v45  ;;  %v2815_v46 = vpop.permute.xlu2 %2814 }
0x1db0   :  { %v2817_v47 = vsel %vm209_vm5, %v5589_v1, %v2815_v46  ;;  %v2922_v1 = vsel %vm209_vm5, %v2920_v42, %v5633_v14  ;;  %v3072_v20 = vsel %vm209_vm5, %v5631_v37, %v2815_v46  ;;  %v3948_v42 = vld [vmem:[%s6197_s4 + $0xd0] sm:$0xff] }
0x1db1   :  { %3043 = vmatpush.msrb.mxu2 %v3955_v15 }
0x1db2   :  { %3943 = vmatmul.msk.f32.vlgmr.msra.gmra.mxu2 %vm48_vm0, %v2817_v47 }
0x1db3   :  { %3044 = vmatpush.msrb.mxu2 %v3954_v19 }
0x1db7   :  { %v2997_v49 = vpop.permute.xlu2 %2996 }
0x1db8   :  { %3017 = vmatpush.msra.mxu1 %v2997_v49 }
0x1dba   :  { %3161 = vmatpush.msrb.mxu1 %v5663_v28 }
0x1dbf   :  { %v3175_v50 = vpop.permute.xlu2 %3174  ;;  %v2927_v51 = vpop.permute.xlu0 %2926 }
0x1dc0   :  { %v2929_v52 = vsel %vm209_vm5, %v2924_v41, %v2927_v51  ;;  %v3177_v56 = vsel %vm209_vm5, %v3175_v50, %v2927_v51  ;;  %v3949_v41 = vld [vmem:[%s6197_s4 + $0xd8] sm:$0xff] }
0x1dc1   :  { %3950 = vmatpush.xpose.msk.msra.mxu0 %vm48_vm0, %v2929_v52  ;;  %3968 = vmatpush.xpose.msk.msra.mxu2 %vm48_vm0, %v3177_v56 }
0x1dc2   :  { %3064 = vmatpush.msrb.mxu3 %v3949_v41 }
0x1dc4   :  { %3951 = vmatmul.msk.f32.vlgmr.msra.gmra.mxu0 %vm48_vm0, %v2922_v1  ;;  %3065 = vmatpush.msrb.mxu3 %v3948_v42  ;;  %v3322_v1 = vperm.slane %v5576_v11, 2 }
0x1dc6   :  { %3066 = vmatpush.msrb.mxu3 %v3947_v13 }
0x1dc7   :  { %v3171_v21 = vpop.permute.xlu2 %3170 }
0x1dc8   :  { %v3173_v44 = vsel %vm209_vm5, %v3171_v21, %v5633_v14 }
0x1e35   :  { %v2849_v4 = vpop.f32.mrf.mxu2 }
0x1e36   :  { %v2852_v61 = vmul.f32 0.17677669, %v2849_v4 }
0x1e38   :  { %v2853_v9 = vsel %vm246_vm6, %v2852_v61, -inf }
0x1e39   :  { %2854 = vmax.xlane.f32.xlu2 %v2853_v9 }
0x1e41   :  { %v2953_v22 = vpop.f32.mrf.mxu0 }
0x1e42   :  { %v2956_v5 = vmul.f32 0.17677669, %v2953_v22 }
0x1e44   :  { %v2957_v6 = vsel %vm246_vm6, %v2956_v5, -inf }
0x1e45   :  { %2958 = vmax.xlane.f32.xlu0 %v2957_v6 }
0x1e59   :  { %3074 = vrot.lane.b32.xlu0 %v5631_v37, %s4235_s15 }
0x1eac   :  { %v2855_v57 = vpop.xlane.xlu2 %2854 }
0x1ead   :  { %v2856_v58 = vsub.f32 %v2852_v61, %v2855_v57 }
0x1eaf   :  { %v2857_v59 = vmul.f32 1.442695, %v2856_v58 }
0x1eb8   :  { %v2959_v27 = vpop.xlane.xlu0 %2958 }
0x1eb9   :  { %v2960_v7 = vsub.f32 %v2956_v5, %v2959_v27 }
0x1ebb   :  { %v2961_v8 = vmul.f32 1.442695, %v2960_v7 }
0x1ebd   :  { %4117 = vpow2.f32 %v2961_v8 }
0x1ebe   :  { %4119 = vpow2.f32 %v2857_v59 }
0x1ec3   :  { %v4118_v60 = vpop.eup %4117 }
0x1ec4   :  { %v2963_v10 = vsel %vm246_vm6, %v4118_v60, 0.0  ;;  %v4120_v12 = vpop.eup %4119 }
0x1ec5   :  { %2964 = vadd.xlane.f32.xlu1 %v2963_v10  ;;  %v2859_v0 = vsel %vm246_vm6, %v4120_v12, 0.0 }
0x1ecb   :  { %v3075_v18 = vpop.permute.xlu0 %3074 }
0x1ecc   :  { %v3077_v48 = vsel %vm209_vm5, %v3075_v18, %v2823_v16  ;;  %v3946_v16 = vld [vmem:[%s6197_s4 + $0xc0] sm:$0xff] }
0x1ecd   :  { %2860 = vadd.xlane.f32.xlu1 %v2859_v0  ;;  %3960 = vmatpush.xpose.msk.msrb.mxu0 %vm48_vm0, %v3077_v48 }
0x1ece   :  { %3067 = vmatpush.msrb.mxu3 %v3946_v16 }
0x1ed0   :  { %3961 = vmatmul.msk.f32.vlgmr.msrb.gmra.mxu0 %vm48_vm0, %v3072_v20 }
0x1ed1   :  { %3289 = vmatpush.msra.mxu0 %v3957_v26 }
0x1ed3   :  { %3290 = vmatpush.msra.mxu0 %v3956_v45 }
0x1ed5   :  { %3291 = vmatpush.msra.mxu0 %v3955_v15 }
0x1ed7   :  { %3292 = vmatpush.msra.mxu0 %v3954_v19 }
0x1f38   :  { %v2965_v24 = vpop.xlane.xlu1 %2964 }
0x1f39   :  { %4121 = vrcp.f32 %v2965_v24 }
0x1f3f   :  { %v4122_v32 = vpop.eup %4121 }
0x1f40   :  { %v5684_v34 = vmul.f32 %v4122_v32, %v4118_v60  ;;  %v2861_v23 = vpop.xlane.xlu1 %2860 }
0x1f41   :  { %4123 = vrcp.f32 %v2861_v23 }
0x1f42   :  { %3953 = vmatmul.msk.f32.vlgmr.msra.gmra.mxu1 %vm246_vm6, %v5684_v34 }
0x1f43   :  { %3312 = vmatpush.msra.mxu1 %v3949_v41  ;;  %v3992_v41 = vld [vmem:[%s6198_s5 + $0x1f0] sm:$0xff] }
0x1f45   :  { %3313 = vmatpush.msra.mxu1 %v3948_v42  ;;  %v3990_v42 = vld [vmem:[%s6198_s5 + $0x1e0] sm:$0xff] }
0x1f47   :  { %v4124_v2 = vpop.eup %4123  ;;  %3314 = vmatpush.msra.mxu1 %v3947_v13  ;;  %v3991_v13 = vld [vmem:[%s6198_s5 + $0x1e8] sm:$0xff] }
0x1f48   :  { %v5688_v30 = vmul.f32 %v4124_v2, %v4120_v12 }
0x1f49   :  { %3315 = vmatpush.msra.mxu1 %v3946_v16  ;;  %v3988_v16 = vld [vmem:[%s6198_s5 + $0x1d0] sm:$0xff] }
0x1f4a   :  { %3945 = vmatmul.msk.f32.vlgmr.msra.gmra.mxu3 %vm246_vm6, %v5688_v30 }
0x1f4d   :  { %v3101_v29 = vpop.f32.mrf.mxu0 }
0x1f4e   :  { %v3104_v31 = vmul.f32 0.17677669, %v3101_v29 }
0x1f50   :  { %v3105_v37 = vsel %vm246_vm6, %v3104_v31, -inf }
0x1f51   :  { %3106 = vmax.xlane.f32.xlu0 %v3105_v37 }
0x1fbf   :  { %v3019_v26 = vpop.f32.mrf.mxu1 }
0x1fc0   :  { %3958 = vmatmul.msk.f32.vlgmr.msrb.gmra.mxu2 %vm209_vm5, %v3019_v26  ;;  %v3989_v26 = vld [vmem:[%s6198_s5 + $0x1d8] sm:$0xff] }
0x1fc1   :  { %3408 = vmatpush.msrb.mxu2 %v3992_v41  ;;  %v4009_v41 = vld [vmem:[%s6199_s6 + $0x358] sm:$0xff] }
0x1fc3   :  { %3409 = vmatpush.msrb.mxu2 %v3990_v42  ;;  %v4008_v42 = vld [vmem:[%s6199_s6 + $0x350] sm:$0xff] }
0x1fc4   :  { %v3107_v15 = vpop.xlane.xlu0 %3106 }
0x1fc5   :  { %v3108_v46 = vsub.f32 %v3104_v31, %v3107_v15  ;;  %3410 = vmatpush.msrb.mxu2 %v3988_v16  ;;  %v3984_v15 = vld [vmem:[%s6198_s5 + $0x1b0] sm:$0xff]  ;;  %v4007_v16 = vld [vmem:[%s6199_s6 + $0x348] sm:$0xff] }
0x1fc7   :  { %v3109_v47 = vmul.f32 1.442695, %v3108_v46 }
0x1fc8   :  { %3969 = vmatmul.msk.f32.vlgmr.msra.gmra.mxu2 %vm48_vm0, %v3173_v44  ;;  %v3986_v44 = vld [vmem:[%s6198_s5 + $0x1c0] sm:$0xff] }
0x1fc9   :  { %4125 = vpow2.f32 %v3109_v47  ;;  %3411 = vmatpush.msrb.mxu2 %v3986_v44  ;;  %v3982_v47 = vld [vmem:[%s6198_s5 + $0x1a0] sm:$0xff] }
0x1fca   :  { %v4006_v44 = vld [vmem:[%s6199_s6 + $0x340] sm:$0xff] }
0x1fcb   :  { %3412 = vmatpush.msrb.mxu2 %v3984_v15 }
0x1fcd   :  { %v2911_v45 = vpop.f32.mrf.mxu3  ;;  %3413 = vmatpush.msrb.mxu2 %v3982_v47  ;;  %v4021_v47 = vld [vmem:[%s6199_s6 + $0x3b8] sm:$0xff] }
0x1fce   :  { %3959 = vmatmul.msk.f32.vlgmr.msrb.gmra.mxu3 %vm209_vm5, %v2911_v45  ;;  %v3987_v45 = vld [vmem:[%s6198_s5 + $0x1c8] sm:$0xff] }
0x1fcf   :  { %v4126_v14 = vpop.eup %4125 }
0x1fd0   :  { %v3111_v9 = vsel %vm246_vm6, %v4126_v14, 0.0 }
0x2043   :  { %v3046_v19 = vpop.f32.mrf.mxu2 }
0x204b   :  { %v3201_v49 = vpop.f32.mrf.mxu2 }
0x204c   :  { %v3204_v50 = vmul.f32 0.17677669, %v3201_v49  ;;  %v3983_v49 = vld [vmem:[%s6198_s5 + $0x1a8] sm:$0xff] }
0x204e   :  { %v3205_v51 = vsel %vm246_vm6, %v3204_v50, -inf }
0x204f   :  { %3206 = vmax.xlane.f32.xlu1 %v3205_v51  ;;  %v3980_v51 = vld [vmem:[%s6198_s5 + $0x190] sm:$0xff] }
0x2050   :  { %3414 = vmatpush.msrb.mxu2 %v3980_v51  ;;  %v4020_v51 = vld [vmem:[%s6199_s6 + $0x3b0] sm:$0xff] }
0x2051   :  { %v3069_v52 = vpop.f32.mrf.mxu3 }
0x2052   :  { %v3070_v56 = vadd.f32 %v3069_v52, %v3046_v19  ;;  %v3985_v19 = vld [vmem:[%s6198_s5 + $0x1b8] sm:$0xff] }
0x2053   :  { %v3981_v52 = vld [vmem:[%s6198_s5 + $0x198] sm:$0xff] }
0x2054   :  { %v3320_v4 = vadd.f32 %v3070_v56, %v5506_v39  ;;  %v3978_v56 = vld [vmem:[%s6198_s5 + $0x180] sm:$0xff] }
0x2055   :  { %3415 = vmatpush.msrb.mxu2 %v3978_v56  ;;  %v4019_v56 = vld [vmem:[%s6199_s6 + $0x3a8] sm:$0xff] }
0x2056   :  { %v5713_v61 = vadd.f32 %v3322_v1, %v3320_v4 }
0x2057   :  { %3112 = vadd.xlane.f32.xlu1 %v3111_v9 }
0x2058   :  { %v3325_v22 = vsel %vm48_vm0, %v5713_v61, 0.0 }
0x2059   :  { %3326 = vadd.xlane.f32.xlu2 %v3325_v22 }
0x20c2   :  { %v3207_v5 = vpop.xlane.xlu1 %3206 }
0x20c3   :  { %v3208_v6 = vsub.f32 %v3204_v50, %v3207_v5 }
0x20c5   :  { %v3209_v21 = vmul.f32 1.442695, %v3208_v6 }
0x20c7   :  { %4127 = vpow2.f32 %v3209_v21 }
0x20ca   :  { %v3113_v57 = vpop.xlane.xlu1 %3112 }
0x20cb   :  { %4129 = vrcp.f32 %v3113_v57 }
0x20cc   :  { %v3327_v48 = vpop.xlane.xlu2 %3326 }
0x20cd   :  { %v4128_v27 = vpop.eup %4127  ;;  %v3331_v24 = vmul.f32 %v3327_v48, %v4335_v17 }
0x20ce   :  { %v3211_v7 = vsel %vm246_vm6, %v4128_v27, 0.0 }
0x20cf   :  { %3212 = vadd.xlane.f32.xlu1 %v3211_v7  ;;  %v3333_v2 = vsub.f32 %v5713_v61, %v3331_v24  ;;  %v4012_v24 = vld [vmem:[%s6199_s6 + $0x370] sm:$0xff] }
0x20d1   :  { %v4130_v39 = vpop.eup %4129  ;;  %v3335_v31 = vmul.f32 %v3333_v2, %v3333_v2 }
0x20d2   :  { %v5719_v58 = vmul.f32 %v4130_v39, %v4126_v14 }
0x20d3   :  { %v3337_v37 = vsel %vm48_vm0, %v3335_v31, 0.0  ;;  %v4010_v31 = vld [vmem:[%s6199_s6 + $0x360] sm:$0xff] }
0x20d4   :  { %3963 = vmatmul.msk.f32.vlgmr.msrb.gmra.mxu1 %vm246_vm6, %v5719_v58 }
0x20e8   :  { %3244 = vrot.lane.b32.xlu1 %v5663_v28, %s4236_s16 }
0x2142   :  { %v3213_v8 = vpop.xlane.xlu1 %3212 }
0x2143   :  { %4131 = vrcp.f32 %v3213_v8 }
0x2149   :  { %v4132_v60 = vpop.eup %4131 }
0x214a   :  { %v5726_v10 = vmul.f32 %v4132_v60, %v4128_v27 }
0x2151   :  { %v3163_v59 = vpop.f32.mrf.mxu1 }
0x2152   :  { %3977 = vmatmul.msk.f32.vlgmr.msra.gmra.mxu1 %vm209_vm5, %v3163_v59  ;;  %v3369_v59 = vperm.slane %v5576_v11, 3 }
0x215a   :  { %v3245_v12 = vpop.permute.xlu1 %3244 }
0x215b   :  { %3265 = vmatpush.msra.mxu3 %v3245_v12 }
0x215c   :  { %3971 = vmatmul.msk.f32.vlgmr.msra.gmra.mxu3 %vm246_vm6, %v5726_v10 }
0x21cf   :  { %v3317_v0 = vpop.f32.mrf.mxu1 }
0x21df   :  { %v3267_v18 = vpop.f32.mrf.mxu3 }
0x21e0   :  { %3976 = vmatmul.msk.f32.vlgmr.msra.gmra.mxu0 %vm209_vm5, %v3267_v18  ;;  %v3372_v18 = vperm.slane %v5576_v11, 4 }
0x225d   :  { %v3294_v20 = vpop.f32.mrf.mxu0 }
0x225e   :  { %v3318_v28 = vadd.f32 %v3317_v0, %v3294_v20  ;;  %v4013_v20 = vld [vmem:[%s6199_s6 + $0x378] sm:$0xff] }
0x225f   :  { %3484 = vmatpush.msrb.mxu0 %v4013_v20 }
0x2260   :  { %v3321_v32 = vadd.f32 %v3318_v28, %v5585_v53  ;;  %v3993_v53 = vld [vmem:[%s6198_s5 + $0x1f8] sm:$0xff] }
0x2261   :  { %3431 = vmatpush.msrb.mxu3 %v3993_v53  ;;  %v4029_v28 = vld [vmem:[%s6199_s6 + $0x3f8] sm:$0xff]  ;;  %3485 = vmatpush.msrb.mxu0 %v4012_v24 }
0x2262   :  { %v5733_v23 = vadd.f32 %v3322_v1, %v3321_v32  ;;  %v3979_v1 = vld [vmem:[%s6198_s5 + $0x188] sm:$0xff]  ;;  %3507 = vmatpush.msrb.mxu1 %v4029_v28  ;;  %v4028_v32 = vld [vmem:[%s6199_s6 + $0x3f0] sm:$0xff]  ;;  %v4025_v53 = vld [vmem:[%s6199_s6 + $0x3d8] sm:$0xff]  ;;  %s4237_s5 = smov [#allocation2]  }
0x2263   :  { %3432 = vmatpush.msrb.mxu3 %v3991_v13  ;;  %v4024_v13 = vld [vmem:[%s6199_s6 + $0x3d0] sm:$0xff]  ;;  %s3627_s1 = sshll.u32 %s4237_s5, 4  ;;  %s3628_s1 = int_to_ptr.vmem [resolvable:$true] %s3627_s1 }
0x2264   :  { %v3328_v29 = vsel %vm48_vm0, %v5733_v23, 0.0  ;;  %3508 = vmatpush.msrb.mxu1 %v4028_v32 }
0x2265   :  { %3329 = vadd.xlane.f32.xlu2 %v3328_v29  ;;  %3433 = vmatpush.msrb.mxu3 %v3989_v26  ;;  %v4027_v29 = vld [vmem:[%s6199_s6 + $0x3e8] sm:$0xff] }
0x2266   :  { %3509 = vmatpush.msrb.mxu1 %v4027_v29  ;;  %v4023_v26 = vld [vmem:[%s6199_s6 + $0x3c8] sm:$0xff]  ;;  %v3392_v29 = vperm.slane %v5576_v11, 6 }
0x2267   :  { %3434 = vmatpush.msrb.mxu3 %v3987_v45  ;;  %v4022_v45 = vld [vmem:[%s6199_s6 + $0x3c0] sm:$0xff] }
0x2269   :  { %3435 = vmatpush.msrb.mxu3 %v3985_v19 }
0x226b   :  { %3436 = vmatpush.msrb.mxu3 %v3983_v49 }
0x226d   :  { %3338 = vadd.xlane.f32.xlu2 %v3337_v37  ;;  %3437 = vmatpush.msrb.mxu3 %v3981_v52  ;;  %v4026_v37 = vld [vmem:[%s6199_s6 + $0x3e0] sm:$0xff]  ;;  %v4003_v52 = vld [vmem:[%s6199_s6 + $0x328] sm:$0xff] }
0x226e   :  { %3510 = vmatpush.msrb.mxu1 %v4026_v37 }
0x226f   :  { %3438 = vmatpush.msrb.mxu3 %v3979_v1  ;;  %v4002_v1 = vld [vmem:[%s6199_s6 + $0x320] sm:$0xff] }
0x2270   :  { %3511 = vmatpush.msrb.mxu1 %v4025_v53 }
0x2272   :  { %3512 = vmatpush.msrb.mxu1 %v4024_v13 }
0x2274   :  { %3513 = vmatpush.msrb.mxu1 %v4023_v26 }
0x2276   :  { %3514 = vmatpush.msrb.mxu1 %v4022_v45 }
0x2278   :  { %3515 = vmatpush.msrb.mxu1 %v4021_v47 }
0x227a   :  { %3516 = vmatpush.msrb.mxu1 %v4020_v51 }
0x227c   :  { %3517 = vmatpush.msrb.mxu1 %v4019_v56 }
0x22d8   :  { %v3330_v46 = vpop.xlane.xlu2 %3329 }
0x22d9   :  { %v3332_v50 = vmul.f32 %v3330_v46, %v4335_v17  ;;  %v4005_v46 = vld [vmem:[%s6199_s6 + $0x338] sm:$0xff] }
0x22db   :  { %v5789_v14 = vsub.f32 %v5733_v23, %v3332_v50  ;;  %v4004_v50 = vld [vmem:[%s6199_s6 + $0x330] sm:$0xff] }
0x22dd   :  { %v3336_v4 = vmul.f32 %v5789_v14, %v5789_v14 }
0x22df   :  { %v3340_v9 = vsel %vm48_vm0, %v3336_v4, 0.0  ;;  %v4018_v4 = vld [vmem:[%s6199_s6 + $0x3a0] sm:$0xff] }
0x22e0   :  { %3341 = vadd.xlane.f32.xlu0 %v3340_v9  ;;  %v3339_v22 = vpop.xlane.xlu2 %3338  ;;  %v4001_v9 = vld [vmem:[%s6199_s6 + $0x318] sm:$0xff]  ;;  %3518 = vmatpush.msrb.mxu1 %v4018_v4 }
0x22e1   :  { %v3343_v5 = vmul.f32 %v3339_v22, %v4335_v17  ;;  %v4017_v22 = vld [vmem:[%s6199_s6 + $0x398] sm:$0xff] }
0x22e2   :  { %3519 = vmatpush.msrb.mxu1 %v4017_v22 }
0x22e3   :  { %v3345_v6 = vadd.f32 1e-05, %v3343_v5 }
0x22e5   :  { %4133 = vrsqrt.f32 %v3345_v6  ;;  %vm3353_vm7 = vweird.f32 %v3345_v6 }
0x22eb   :  { %v4134_v21 = vpop.eup %4133 }
0x22ec   :  { %v3348_v57 = vmul.f32 %v4134_v21, %v3345_v6  ;;  %vm3354_vm5 = vweird.f32 %v4134_v21 }
0x22ed   :  { %vm3355_vm8 = vmor %vm3353_vm7, %vm3354_vm5 }
0x22ee   :  { %v3349_v27 = vmul.f32 %v4134_v21, %v3348_v57  ;;  %v4016_v57 = vld [vmem:[%s6199_s6 + $0x390] sm:$0xff] }
0x22ef   :  { %3520 = vmatpush.msrb.mxu1 %v4016_v57 }
0x22f0   :  { %v3350_v7 = vmul.f32 0.5, %v3349_v27 }
0x22f2   :  { %v3351_v39 = vsub.f32 1.5, %v3350_v7  ;;  %v3999_v7 = vld [vmem:[%s6199_s6 + $0x308] sm:$0xff] }
0x22f4   :  { %v3352_v8 = vmul.f32 %v4134_v21, %v3351_v39  ;;  %v4015_v39 = vld [vmem:[%s6199_s6 + $0x388] sm:$0xff] }
0x22f5   :  { %3521 = vmatpush.msrb.mxu1 %v4015_v39 }
0x22f6   :  { %v3356_v60 = vsel %vm3355_vm8, %v4134_v21, %v3352_v8  ;;  %v4000_v21 = vld [vmem:[%s6199_s6 + $0x310] sm:$0xff] }
0x22f7   :  { %v3367_v12 = vmul.f32 %v3356_v60, %v3333_v2  ;;  %v4011_v2 = vld [vmem:[%s6199_s6 + $0x368] sm:$0xff]  ;;  %v3998_v60 = vld [vmem:[%s6199_s6 + $0x300] sm:$0xff] }
0x22f8   :  { %3486 = vmatpush.msrb.mxu0 %v4011_v2  ;;  %v3912_v2 = vld [vmem:[%s6200_s7 + $0x38] sm:$0xff] }
0x22f9   :  { %v3370_v48 = vmul.f32 %v3369_v59, %v3367_v12  ;;  %v4014_v12 = vld [vmem:[%s6199_s6 + $0x380] sm:$0xff] }
0x22fa   :  { %3487 = vmatpush.msrb.mxu0 %v4010_v31  ;;  %3522 = vmatpush.msrb.mxu1 %v4014_v12  ;;  %v3393_v31 = vperm.slane %v3912_v2, 6  ;;  %v3585_v2 = vld [vmem:[%s6201_s8 + $0x10] sm:$0xff] }
0x22fb   :  { %v3373_v0 = vadd.f32 %v3372_v18, %v3370_v48 }
0x22fc   :  { %3488 = vmatpush.msrb.mxu0 %v4009_v41 }
0x22fd   :  { %3994 = vmatmul.msk.f32.vlgmr.msrb.gmra.mxu2 %vm48_vm0, %v3373_v0  ;;  %3996 = vmatmul.msk.f32.vlgmr.msrb.gmra.mxu3 %vm48_vm0, %v3373_v0 }
0x22fe   :  { %3489 = vmatpush.msrb.mxu0 %v4008_v42 }
0x2300   :  { %3490 = vmatpush.msrb.mxu0 %v4007_v16 }
0x2302   :  { %3491 = vmatpush.msrb.mxu0 %v4006_v44 }
0x2304   :  { %3492 = vmatpush.msrb.mxu0 %v4005_v46 }
0x2306   :  { %3493 = vmatpush.msrb.mxu0 %v4004_v50 }
0x2308   :  { %3494 = vmatpush.msrb.mxu0 %v4003_v52 }
0x230a   :  { %3495 = vmatpush.msrb.mxu0 %v4002_v1 }
0x230c   :  { %3496 = vmatpush.msrb.mxu0 %v4001_v9 }
0x230e   :  { %3497 = vmatpush.msrb.mxu0 %v4000_v21 }
0x2310   :  { %3498 = vmatpush.msrb.mxu0 %v3999_v7 }
0x2312   :  { %3499 = vmatpush.msrb.mxu0 %v3998_v60 }
0x2353   :  { %v3342_v15 = vpop.xlane.xlu0 %3341 }
0x2354   :  { %v3344_v19 = vmul.f32 %v3342_v15, %v4335_v17  ;;  %v3483_v15 = vperm.slane %v5576_v11, 5 }
0x2356   :  { %v3346_v49 = vadd.f32 1e-05, %v3344_v19 }
0x2358   :  { %4135 = vrsqrt.f32 %v3346_v49  ;;  %vm3363_vm10 = vweird.f32 %v3346_v49 }
0x235e   :  { %v4136_v5 = vpop.eup %4135 }
0x235f   :  { %v3358_v6 = vmul.f32 %v4136_v5, %v3346_v49  ;;  %vm3364_vm9 = vweird.f32 %v4136_v5 }
0x2360   :  { %vm3365_vm11 = vmor %vm3363_vm10, %vm3364_vm9 }
0x2361   :  { %v3359_v27 = vmul.f32 %v4136_v5, %v3358_v6  ;;  %v41_v6 = vlaneseq }
0x2363   :  { %v3360_v8 = vmul.f32 0.5, %v3359_v27  ;;  %v42_v57 = vshrl.u32 %v41_v6, 7  ;;  %v44_v27 = vand.u32 127, %v41_v6 }
0x2365   :  { %v3361_v48 = vsub.f32 1.5, %v3360_v8  ;;  %vm5922_vm12 = vcmp.gt.s32.totalorder %v44_v27, %v42_v57 }
0x2366   :  { %v360_v60 = vsel %vm5922_vm12, -inf, %v4478_v62  ;;  %v3590_v62 = vld [vmem:[%s6201_s8 + $0x38] sm:$0xff] }
0x2367   :  { %v3362_v0 = vmul.f32 %v4136_v5, %v3361_v48  ;;  %v361_v12 = vsel %vm246_vm6, %v360_v60, -inf  ;;  %v508_v48 = vsel %vm5922_vm12, -inf, %v4511_v35  ;;  %3606 = vmatpush.msra.mxu2 %v3590_v62  ;;  %v3589_v35 = vld [vmem:[%s6201_s8 + $0x30] sm:$0xff] }
0x2369   :  { %v3366_v20 = vsel %vm3365_vm11, %v4136_v5, %v3362_v0  ;;  %v509_v0 = vsel %vm246_vm6, %v508_v48, -inf  ;;  %3607 = vmatpush.msra.mxu2 %v3589_v35  ;;  %v6012_v35 = vsel %vm5922_vm12, -inf, %v4871_v63 }
0x236a   :  { %v3368_v28 = vmul.f32 %v3366_v20, %v5789_v14 }
0x236c   :  { %v3371_v24 = vmul.f32 %v3369_v59, %v3368_v28  ;;  %v3588_v28 = vld [vmem:[%s6201_s8 + $0x28] sm:$0xff] }
0x236d   :  { %3608 = vmatpush.msra.mxu2 %v3588_v28  ;;  %v1229_v28 = vsel %vm246_vm6, %v6012_v35, -inf }
0x236e   :  { %v3374_v32 = vadd.f32 %v3372_v18, %v3371_v24  ;;  %v3586_v24 = vld [vmem:[%s6201_s8 + $0x18] sm:$0xff] }
0x2370   :  { %3995 = vmatmul.msk.f32.gmra.mxu2 %vm48_vm0, %v3374_v32  ;;  %3997 = vmatmul.msk.f32.gmra.mxu3 %vm48_vm0, %v3374_v32 }
0x2380   :  { %v3417_v37 = vpop.f32.mrf.mxu2  ;;  %v3440_v41 = vpop.f32.mrf.mxu3 }
0x2381   :  { %v3418_v14 = vadd.f32 %v3417_v37, %v3392_v29  ;;  %v3441_v53 = vadd.f32 %v3440_v41, %v3393_v31  ;;  %v3583_v41 = vld [vmem:[%s6201_s8] sm:$0xff] }
0x2383   :  { %v3446_v42 = vmax.f32 %v3418_v14, 0.0  ;;  %v3447_v59 = vmax.f32 %v3441_v53, 0.0 }
0x2385   :  { %3500 = vmatmul.f32.vlgmr.msrb.gmra.mxu0 %v3446_v42  ;;  %3523 = vmatmul.f32.vlgmr.msrb.gmra.mxu1 %v3447_v59 }
0x23f3   :  { %v3420_v18 = vpop.f32.mrf.mxu2  ;;  %v3443_v13 = vpop.f32.mrf.mxu3 }
0x23f4   :  { %v3421_v16 = vadd.f32 %v3420_v18, %v3392_v29  ;;  %v3444_v26 = vadd.f32 %v3443_v13, %v3393_v31  ;;  %v3584_v31 = vld [vmem:[%s6201_s8 + $0x8] sm:$0xff] }
0x23f6   :  { %v3448_v44 = vmax.f32 %v3421_v16, 0.0  ;;  %v3449_v45 = vmax.f32 %v3444_v26, 0.0 }
0x23f8   :  { %3503 = vmatmul.f32.gmra.mxu0 %v3448_v44  ;;  %3526 = vmatmul.f32.gmra.mxu1 %v3449_v45 }
0x2402   :  { %v3501_v19 = vpop.f32.mrf.mxu0  ;;  %v3524_v47 = vpop.f32.mrf.mxu1 }
0x2403   :  { %v3502_v46 = vadd.f32 %v3501_v19, %v3483_v15 }
0x2405   :  { %v3525_v49 = vadd.f32 %v3524_v47, %v3502_v46 }
0x2407   :  { %v3530_v50 = vadd.f32 %v3525_v49, %v5713_v61  ;;  %v5979_v49 = vld [vmem:[%s6202_s9] sm:$0xff]  ;;  %s4238_s9 = smov 128  }
0x2409   :  { %v3533_v51 = vsel %vm48_vm0, %v3530_v50, 0.0 }
0x240a   :  { %3534 = vadd.xlane.f32.xlu1 %v3533_v51 }
0x2475   :  { %v3504_v52 = vpop.f32.mrf.mxu0  ;;  %v3527_v1 = vpop.f32.mrf.mxu1 }
0x2476   :  { %v3505_v56 = vadd.f32 %v3504_v52, %v3483_v15 }
0x2478   :  { %v3528_v4 = vadd.f32 %v3527_v1, %v3505_v56 }
0x247a   :  { %v3531_v9 = vadd.f32 %v3528_v4, %v5733_v23  ;;  %v258_v23 = vsel %vm5922_vm12, -inf, %v4441_v33  ;;  %v5941_v33 = vsel %vm5922_vm12, -inf, %v4515_v38  ;;  %v3587_v38 = vld [vmem:[%s6201_s8 + $0x20] sm:$0xff]  ;;  %v3577_v4 = vperm.slane %v5979_v49, 0 }
0x247b   :  { %v259_v8 = vsel %vm246_vm6, %v258_v23, -inf  ;;  %v609_v20 = vsel %vm246_vm6, %v5941_v33, -inf  ;;  %3609 = vmatpush.msra.mxu2 %v3587_v38 }
0x247c   :  { %v3536_v22 = vsel %vm48_vm0, %v3531_v9, 0.0 }
0x247d   :  { %3537 = vadd.xlane.f32.xlu2 %v3536_v22  ;;  %v3535_v5 = vpop.xlane.xlu1 %3534  ;;  %3610 = vmatpush.msra.mxu2 %v3586_v24 }
0x247e   :  { %v3539_v11 = vmul.f32 %v3535_v5, %v4335_v17  ;;  %v3580_v5 = vperm.slane %v5979_v49, 1 }
0x247f   :  { %3611 = vmatpush.msra.mxu2 %v3585_v2 }
0x2480   :  { %v5917_v21 = vsub.f32 %v3530_v50, %v3539_v11 }
0x2481   :  { %3612 = vmatpush.msra.mxu2 %v3584_v31 }
0x2482   :  { %v3543_v61 = vmul.f32 %v5917_v21, %v5917_v21 }
0x2483   :  { %3613 = vmatpush.msra.mxu2 %v3583_v41 }
0x2484   :  { %v3545_v7 = vsel %vm48_vm0, %v3543_v61, 0.0 }
0x2485   :  { %3546 = vadd.xlane.f32.xlu0 %v3545_v7 }
0x248d   :  { %260 = vmax.xlane.f32.xlu0 %v259_v8 }
0x2495   :  { %362 = vmax.xlane.f32.xlu0 %v361_v12 }
0x249d   :  { %510 = vmax.xlane.f32.xlu0 %v509_v0  ;;  %v6001_v0 = vsel %vm5922_vm12, -inf, %v4886_v55 }
0x249e   :  { %v1125_v62 = vsel %vm246_vm6, %v6001_v0, -inf }
0x24a5   :  { %610 = vmax.xlane.f32.xlu0 %v609_v20 }
0x24f0   :  { %v3538_v32 = vpop.xlane.xlu2 %3537 }
0x24f1   :  { %v3540_v29 = vmul.f32 %v3538_v32, %v4335_v17 }
0x24f3   :  { %v5967_v37 = vsub.f32 %v3531_v9, %v3540_v29 }
0x24f5   :  { %v3544_v14 = vmul.f32 %v5967_v37, %v5967_v37 }
0x24f7   :  { %v3548_v53 = vsel %vm48_vm0, %v3544_v14, 0.0 }
0x24f8   :  { %3549 = vadd.xlane.f32.xlu2 %v3548_v53  ;;  %v3547_v42 = vpop.xlane.xlu0 %3546 }
0x24f9   :  { %v3551_v59 = vmul.f32 %v3547_v42, %v4335_v17 }
0x24fb   :  { %v3553_v18 = vadd.f32 1e-05, %v3551_v59 }
0x24fd   :  { %4137 = vrsqrt.f32 %v3553_v18  ;;  %vm3561_vm14 = vweird.f32 %v3553_v18 }
0x2500   :  { %v261_v13 = vpop.xlane.xlu0 %260 }
0x2501   :  { %v262_v16 = vsub.f32 %v258_v23, %v261_v13 }
0x2503   :  { %v4138_v26 = vpop.eup %4137  ;;  %v263_v44 = vmul.f32 1.442695, %v262_v16 }
0x2504   :  { %v3556_v45 = vmul.f32 %v4138_v26, %v3553_v18  ;;  %vm3562_vm13 = vweird.f32 %v4138_v26 }
0x2505   :  { %4139 = vpow2.f32 %v263_v44  ;;  %vm3563_vm15 = vmor %vm3561_vm14, %vm3562_vm13 }
0x2506   :  { %v3557_v15 = vmul.f32 %v4138_v26, %v3556_v45 }
0x2508   :  { %v3558_v19 = vmul.f32 0.5, %v3557_v15  ;;  %v363_v46 = vpop.xlane.xlu0 %362 }
0x2509   :  { %v364_v47 = vsub.f32 %v360_v60, %v363_v46 }
0x250a   :  { %v3559_v50 = vsub.f32 1.5, %v3558_v19 }
0x250b   :  { %v5981_v51 = vpop.eup %4139  ;;  %v365_v52 = vmul.f32 1.442695, %v364_v47 }
0x250c   :  { %v3560_v56 = vmul.f32 %v4138_v26, %v3559_v50  ;;  %v265_v1 = vsel %vm246_vm6, %v5981_v51, 0.0 }
0x250d   :  { %4141 = vpow2.f32 %v365_v52  ;;  %266 = vadd.xlane.f32.xlu2 %v265_v1 }
0x250e   :  { %v3564_v9 = vsel %vm3563_vm15, %v4138_v26, %v3560_v56 }
0x250f   :  { %v3575_v22 = vmul.f32 %v3564_v9, %v5917_v21 }
0x2510   :  { %v511_v11 = vpop.xlane.xlu0 %510 }
0x2511   :  { %v3578_v6 = vmul.f32 %v3577_v4, %v3575_v22  ;;  %v512_v61 = vsub.f32 %v508_v48, %v511_v11  ;;  %v3591_v11 = vperm.slane %v5979_v49, 2 }
0x2513   :  { %v5988_v57 = vpop.eup %4141  ;;  %v513_v27 = vmul.f32 1.442695, %v512_v61  ;;  %v3581_v7 = vadd.f32 %v3580_v5, %v3578_v6 }
0x2514   :  { %v367_v23 = vsel %vm246_vm6, %v5988_v57, 0.0 }
0x2515   :  { %4143 = vpow2.f32 %v513_v27  ;;  %4030 = vmatmul.msk.f32.vlgmr.msra.gmra.mxu2 %vm48_vm0, %v3581_v7  ;;  %368 = vadd.xlane.f32.xlu2 %v367_v23 }
0x2518   :  { %v611_v8 = vpop.xlane.xlu0 %610 }
0x2519   :  { %v612_v60 = vsub.f32 %v5941_v33, %v611_v8 }
0x251b   :  { %v5994_v21 = vpop.eup %4143  ;;  %v613_v12 = vmul.f32 1.442695, %v612_v60 }
0x251c   :  { %v515_v48 = vsel %vm246_vm6, %v5994_v21, 0.0 }
0x251d   :  { %4145 = vpow2.f32 %v613_v12  ;;  %516 = vadd.xlane.f32.xlu2 %v515_v48 }
0x2523   :  { %v6003_v20 = vpop.eup %4145 }
0x2524   :  { %v615_v33 = vsel %vm246_vm6, %v6003_v20, 0.0 }
0x2525   :  { %1126 = vmax.xlane.f32.xlu2 %v1125_v62  ;;  %616 = vadd.xlane.f32.xlu1 %v615_v33 }
0x252d   :  { %1230 = vmax.xlane.f32.xlu1 %v1229_v28 }
0x256b   :  { %v3550_v55 = vpop.xlane.xlu2 %3549 }
0x256c   :  { %v3552_v38 = vmul.f32 %v3550_v55, %v4335_v17 }
0x256e   :  { %v3554_v24 = vadd.f32 1e-05, %v3552_v38 }
0x2570   :  { %4147 = vrsqrt.f32 %v3554_v24  ;;  %vm3571_vm2 = vweird.f32 %v3554_v24 }
0x2576   :  { %v4148_v32 = vpop.eup %4147 }
0x2577   :  { %v3566_v2 = vmul.f32 %v4148_v32, %v3554_v24  ;;  %vm3572_vm1 = vweird.f32 %v4148_v32 }
0x2578   :  { %vm3573_vm3 = vmor %vm3571_vm2, %vm3572_vm1 }
0x2579   :  { %v3567_v29 = vmul.f32 %v4148_v32, %v3566_v2 }
0x257b   :  { %v3568_v31 = vmul.f32 0.5, %v3567_v29 }
0x257d   :  { %v3569_v41 = vsub.f32 1.5, %v3568_v31 }
0x257f   :  { %v3570_v14 = vmul.f32 %v4148_v32, %v3569_v41 }
0x2580   :  { %v267_v63 = vpop.xlane.xlu2 %266 }
0x2581   :  { %v3574_v53 = vsel %vm3573_vm3, %v4148_v32, %v3570_v14  ;;  %4149 = vrcp.f32 %v267_v63  ;;  %v279_v44 = vand.u32 2147483648, %v267_v63  ;;  %v277_v15 = vand.u32 2147483647, %v267_v63 }
0x2582   :  { %v3576_v42 = vmul.f32 %v3574_v53, %v5967_v37  ;;  %vm273_vm5 = vweird.f32 %v267_v63 }
0x2583   :  { %v280_v47 = vor.u32 1.1754944e-38, %v279_v44  ;;  %vm278_vm8 = vcmp.eq.f32.partialorder %v277_v15, 8.507059e+37 }
0x2584   :  { %v3579_v59 = vmul.f32 %v3577_v4, %v3576_v42 }
0x2586   :  { %v3582_v18 = vadd.f32 %v3580_v5, %v3579_v59 }
0x2587   :  { %v4150_v13 = vpop.eup %4149 }
0x2588   :  { %v269_v17 = vmul.f32 %v4150_v13, %v267_v63  ;;  %4031 = vmatmul.msk.f32.gmra.mxu2 %vm48_vm0, %v3582_v18  ;;  %v369_v16 = vpop.xlane.xlu2 %368  ;;  %vm274_vm4 = vweird.f32 %v4150_v13 }
0x2589   :  { %4151 = vrcp.f32 %v369_v16  ;;  %vm275_vm7 = vmor %vm273_vm5, %vm274_vm4  ;;  %v381_v9 = vand.u32 2147483648, %v369_v16  ;;  %v379_v5 = vand.u32 2147483647, %v369_v16  ;;  %vm375_vm9 = vweird.f32 %v369_v16 }
0x258a   :  { %v270_v26 = vsub.f32 1.0, %v269_v17 }
0x258b   :  { %v382_v27 = vor.u32 1.1754944e-38, %v381_v9  ;;  %vm380_vm11 = vcmp.eq.f32.partialorder %v379_v5, 8.507059e+37 }
0x258c   :  { %v271_v45 = vmul.f32 %v4150_v13, %v270_v26 }
0x258e   :  { %v272_v19 = vadd.f32 %v4150_v13, %v271_v45  ;;  %v1376_v45 = vsel %vm5922_vm12, -inf, %v4906_v3 }
0x258f   :  { %v4152_v46 = vpop.eup %4151 }
0x2590   :  { %v276_v50 = vsel %vm275_vm7, %v4150_v13, %v272_v19  ;;  %v371_v37 = vmul.f32 %v4152_v46, %v369_v16  ;;  %v517_v52 = vpop.xlane.xlu2 %516  ;;  %vm376_vm0 = vweird.f32 %v4152_v46 }
0x2591   :  { %v281_v56 = vsel %vm278_vm8, %v280_v47, %v276_v50  ;;  %4153 = vrcp.f32 %v517_v52  ;;  %vm377_vm10 = vmor %vm375_vm9, %vm376_vm0  ;;  %v529_v55 = vand.u32 2147483648, %v517_v52  ;;  %v527_v32 = vand.u32 2147483647, %v517_v52 }
0x2592   :  { %v282_v1 = vmul.f32 %v5981_v51, %v281_v56  ;;  %v372_v4 = vsub.f32 1.0, %v371_v37  ;;  %vm523_vm14 = vweird.f32 %v517_v52  ;;  %v1377_v47 = vsel %vm246_vm6, %v1376_v45, -inf }
0x2593   :  { %vm528_vm1 = vcmp.eq.f32.partialorder %v527_v32, 8.507059e+37  ;;  %v1476_v37 = vsel %vm5922_vm12, -inf, %v4914_v25 }
0x2594   :  { %283 = vst.msk [vmem:[%s6204_s11] sm:$0xff] %vm246_vm6, %v282_v1  ;;  %v373_v22 = vmul.f32 %v4152_v46, %v372_v4  ;;  %v1477_v3 = vsel %vm246_vm6, %v1476_v37, -inf }
0x2596   :  { %v374_v6 = vadd.f32 %v4152_v46, %v373_v22 }
0x2597   :  { %v4154_v61 = vpop.eup %4153 }
0x2598   :  { %v378_v7 = vsel %vm377_vm10, %v4152_v46, %v374_v6  ;;  %v519_v51 = vmul.f32 %v4154_v61, %v517_v52  ;;  %v3615_v23 = vpop.f32.mrf.mxu2  ;;  %v1127_v8 = vpop.xlane.xlu2 %1126  ;;  %vm524_vm13 = vweird.f32 %v4154_v61 }
0x2599   :  { %v383_v60 = vsel %vm380_vm11, %v382_v27, %v378_v7  ;;  %v3616_v12 = vadd.f32 %v3615_v23, %v3591_v11  ;;  %v1128_v48 = vsub.f32 %v6001_v0, %v1127_v8  ;;  %v617_v62 = vpop.xlane.xlu1 %616  ;;  %vm525_vm15 = vmor %vm523_vm14, %vm524_vm13  ;;  %v530_v0 = vor.u32 1.1754944e-38, %v529_v55 }
0x259a   :  { %v384_v33 = vmul.f32 %v5988_v57, %v383_v60  ;;  %v520_v28 = vsub.f32 1.0, %v519_v51  ;;  %4155 = vrcp.f32 %v617_v62  ;;  %v629_v18 = vand.u32 2147483648, %v617_v62 }
0x259b   :  { %3621 = vst [vmem:[#allocation2] sm:$0xff] %v3616_v12  ;;  %v1129_v38 = vmul.f32 1.442695, %v1128_v48  ;;  %v627_v26 = vand.u32 2147483647, %v617_v62  ;;  %vm623_vm3 = vweird.f32 %v617_v62 }
0x259c   :  { %3655 = vst.msk [vmem:[%s6204_s11 + $0x10] sm:$0xff] %vm246_vm6, %v384_v33  ;;  %v521_v24 = vmul.f32 %v4154_v61, %v520_v28 }
0x259d   :  { %4157 = vpow2.f32 %v1129_v38  ;;  %vm628_vm5 = vcmp.eq.f32.partialorder %v627_v26, 8.507059e+37 }
0x259e   :  { %v522_v2 = vadd.f32 %v4154_v61, %v521_v24 }
0x25a0   :  { %v4156_v29 = vpop.eup %4155  ;;  %v526_v57 = vsel %vm525_vm15, %v4154_v61, %v522_v2 }
0x25a1   :  { %v531_v31 = vsel %vm528_vm1, %v530_v0, %v526_v57  ;;  %v619_v41 = vmul.f32 %v4156_v29, %v617_v62  ;;  %v1231_v14 = vpop.xlane.xlu1 %1230  ;;  %vm624_vm2 = vweird.f32 %v4156_v29 }
0x25a2   :  { %v532_v63 = vmul.f32 %v5994_v21, %v531_v31  ;;  %v1232_v53 = vsub.f32 %v6012_v35, %v1231_v14  ;;  %vm625_vm4 = vmor %vm623_vm3, %vm624_vm2  ;;  %v630_v21 = vor.u32 1.1754944e-38, %v629_v18  ;;  %v1994_v31 = vsel %vm5922_vm12, -inf, %v5283_v54 }
0x25a3   :  { %v4158_v42 = vpop.eup %4157  ;;  %v620_v59 = vsub.f32 1.0, %v619_v41  ;;  %v2098_v54 = vsel %vm5922_vm12, -inf, %v5275_v43  ;;  %v2346_v18 = vsel %vm5922_vm12, -inf, %v5315_v36 }
0x25a4   :  { %3661 = vst.msk [vmem:[%s6204_s11 + $0x8] sm:$0xff] %vm246_vm6, %v532_v63  ;;  %v1233_v13 = vmul.f32 1.442695, %v1232_v53  ;;  %v1131_v17 = vsel %vm246_vm6, %v4158_v42, 0.0  ;;  %v1995_v53 = vsel %vm246_vm6, %v1994_v31, -inf }
0x25a5   :  { %v621_v16 = vmul.f32 %v4156_v29, %v620_v59  ;;  %1132 = vadd.xlane.f32.xlu0 %v1131_v17  ;;  %v2099_v59 = vsel %vm246_vm6, %v2098_v54, -inf  ;;  %v6084_v17 = vsel %vm5922_vm12, -inf, %v5719_v58 }
0x25a6   :  { %4159 = vpow2.f32 %v1233_v13  ;;  %v2347_v13 = vsel %vm246_vm6, %v2346_v18, -inf }
0x25a7   :  { %v622_v44 = vadd.f32 %v4156_v29, %v621_v16  ;;  %v3117_v16 = vsel %vm246_vm6, %v6084_v17, -inf }
0x25a9   :  { %v626_v35 = vsel %vm625_vm4, %v4156_v29, %v622_v44 }
0x25aa   :  { %v631_v15 = vsel %vm628_vm5, %v630_v21, %v626_v35 }
0x25ab   :  { %v632_v19 = vmul.f32 %v6003_v20, %v631_v15 }
0x25ac   :  { %v4160_v46 = vpop.eup %4159 }
0x25ad   :  { %3665 = vst.msk [vmem:[%s6204_s11 + $0x18] sm:$0xff] %vm246_vm6, %v632_v19  ;;  %1378 = vmax.xlane.f32.xlu0 %v1377_v47  ;;  %v1235_v50 = vsel %vm246_vm6, %v4160_v46, 0.0 }
0x25ae   :  { %1236 = vadd.xlane.f32.xlu2 %v1235_v50 }
0x25b6   :  { %1478 = vmax.xlane.f32.xlu2 %v1477_v3 }
0x260b   :  { %v3618_v20 = vpop.f32.mrf.mxu2 }
0x260c   :  { %v3619_v52 = vadd.f32 %v3618_v20, %v3591_v11 }
0x260e   :  { %3622 = vst [vmem:[#allocation2 + $0x8] sm:$0xff] %v3619_v52 }
0x260f   :  { %3635 = dma.vmem_to_hbm [thread:$0]  %s3628_s1, 256, %s3630_s20, [#allocation3], %s4238_s9, %s4238_s9, %s4239_s21  }
0x2618   :  { %v1133_v56 = vpop.xlane.xlu0 %1132 }
0x2619   :  { %4161 = vrcp.f32 %v1133_v56  ;;  %v1145_v61 = vand.u32 2147483648, %v1133_v56  ;;  %v1143_v7 = vand.u32 2147483647, %v1133_v56  ;;  %vm1139_vm8 = vweird.f32 %v1133_v56 }
0x261b   :  { %v1146_v49 = vor.u32 1.1754944e-38, %v1145_v61  ;;  %vm1144_vm9 = vcmp.eq.f32.partialorder %v1143_v7, 8.507059e+37 }
0x261f   :  { %v4162_v1 = vpop.eup %4161 }
0x2620   :  { %v1135_v4 = vmul.f32 %v4162_v1, %v1133_v56  ;;  %v1379_v9 = vpop.xlane.xlu0 %1378  ;;  %vm1140_vm7 = vweird.f32 %v4162_v1 }
0x2621   :  { %v1237_v22 = vpop.xlane.xlu2 %1236  ;;  %v1380_v5 = vsub.f32 %v1376_v45, %v1379_v9  ;;  %vm1141_vm0 = vmor %vm1139_vm8, %vm1140_vm7 }
0x2622   :  { %v1136_v6 = vsub.f32 1.0, %v1135_v4  ;;  %4163 = vrcp.f32 %v1237_v22  ;;  %v1249_v55 = vand.u32 2147483648, %v1237_v22  ;;  %v1247_v2 = vand.u32 2147483647, %v1237_v22 }
0x2623   :  { %v1381_v27 = vmul.f32 1.442695, %v1380_v5  ;;  %vm1243_vm11 = vweird.f32 %v1237_v22 }
0x2624   :  { %v1137_v25 = vmul.f32 %v4162_v1, %v1136_v6  ;;  %v1250_v29 = vor.u32 1.1754944e-38, %v1249_v55  ;;  %vm1248_vm14 = vcmp.eq.f32.partialorder %v1247_v2, 8.507059e+37  ;;  %v2968_v55 = vsel %vm5922_vm12, -inf, %v5684_v34 }
0x2625   :  { %4165 = vpow2.f32 %v1381_v27  ;;  %v6125_v34 = vsel %vm5922_vm12, -inf, %v5726_v10 }
0x2626   :  { %v1138_v51 = vadd.f32 %v4162_v1, %v1137_v25 }
0x2628   :  { %v4164_v11 = vpop.eup %4163  ;;  %v1142_v23 = vsel %vm1141_vm0, %v4162_v1, %v1138_v51 }
0x2629   :  { %v1147_v8 = vsel %vm1144_vm9, %v1146_v49, %v1142_v23  ;;  %v1239_v60 = vmul.f32 %v4164_v11, %v1237_v22  ;;  %v1479_v12 = vpop.xlane.xlu2 %1478  ;;  %vm1244_vm10 = vweird.f32 %v4164_v11  ;;  %v2246_v23 = vsel %vm5922_vm12, -inf, %v5319_v40 }
0x262a   :  { %v1148_v48 = vmul.f32 %v4158_v42, %v1147_v8  ;;  %v1480_v62 = vsub.f32 %v1476_v37, %v1479_v12  ;;  %vm1245_vm13 = vmor %vm1243_vm11, %vm1244_vm10 }
0x262b   :  { %v4166_v33 = vpop.eup %4165  ;;  %v1240_v28 = vsub.f32 1.0, %v1239_v60 }
0x262c   :  { %3706 = vst.msk [vmem:[%s6204_s11 + $0x20] sm:$0xff] %vm246_vm6, %v1148_v48  ;;  %v1481_v38 = vmul.f32 1.442695, %v1480_v62  ;;  %v1383_v24 = vsel %vm246_vm6, %v4166_v33, 0.0 }
0x262d   :  { %v1241_v32 = vmul.f32 %v4164_v11, %v1240_v28  ;;  %1384 = vadd.xlane.f32.xlu1 %v1383_v24  ;;  %v2864_v24 = vsel %vm5922_vm12, -inf, %v5688_v30 }
0x262e   :  { %4167 = vpow2.f32 %v1481_v38 }
0x262f   :  { %v1242_v0 = vadd.f32 %v4164_v11, %v1241_v32 }
0x2631   :  { %v1246_v57 = vsel %vm1245_vm13, %v4164_v11, %v1242_v0  ;;  %v2969_v0 = vsel %vm246_vm6, %v2968_v55, -inf }
0x2632   :  { %v1251_v41 = vsel %vm1248_vm14, %v1250_v29, %v1246_v57  ;;  %v2865_v29 = vsel %vm246_vm6, %v2864_v24, -inf }
0x2633   :  { %v1252_v14 = vmul.f32 %v4160_v46, %v1251_v41 }
0x2634   :  { %v6064_v63 = vpop.eup %4167 }
0x2635   :  { %3714 = vst.msk [vmem:[%s6204_s11 + $0x30] sm:$0xff] %vm246_vm6, %v1252_v14  ;;  %v1483_v42 = vsel %vm246_vm6, %v6064_v63, 0.0  ;;  %1996 = vmax.xlane.f32.xlu1 %v1995_v53 }
0x2636   :  { %1484 = vadd.xlane.f32.xlu0 %v1483_v42 }
0x263e   :  { %2100 = vmax.xlane.f32.xlu0 %v2099_v59 }
0x2646   :  { %2348 = vmax.xlane.f32.xlu0 %v2347_v13 }
0x264e   :  { %3118 = vmax.xlane.f32.xlu0 %v3117_v16 }
0x26a0   :  { %v1385_v43 = vpop.xlane.xlu1 %1384 }
0x26a1   :  { %4169 = vrcp.f32 %v1385_v43  ;;  %v1397_v15 = vand.u32 2147483648, %v1385_v43  ;;  %v1395_v47 = vand.u32 2147483647, %v1385_v43  ;;  %vm1391_vm1 = vweird.f32 %v1385_v43 }
0x26a3   :  { %v1398_v50 = vor.u32 1.1754944e-38, %v1397_v15  ;;  %vm1396_vm3 = vcmp.eq.f32.partialorder %v1395_v47, 8.507059e+37 }
0x26a7   :  { %v4170_v26 = vpop.eup %4169 }
0x26a8   :  { %v1387_v44 = vmul.f32 %v4170_v26, %v1385_v43  ;;  %v1997_v21 = vpop.xlane.xlu1 %1996  ;;  %vm1392_vm15 = vweird.f32 %v4170_v26 }
0x26a9   :  { %v1998_v35 = vsub.f32 %v1994_v31, %v1997_v21  ;;  %v1485_v45 = vpop.xlane.xlu0 %1484  ;;  %vm1393_vm2 = vmor %vm1391_vm1, %vm1392_vm15  ;;  %v3217_v31 = vsel %vm246_vm6, %v6125_v34, -inf }
0x26aa   :  { %v1388_v36 = vsub.f32 1.0, %v1387_v44  ;;  %4171 = vrcp.f32 %v1485_v45  ;;  %v1497_v5 = vand.u32 2147483648, %v1485_v45  ;;  %v1495_v25 = vand.u32 2147483647, %v1485_v45 }
0x26ab   :  { %v1999_v19 = vmul.f32 1.442695, %v1998_v35  ;;  %vm1491_vm5 = vweird.f32 %v1485_v45 }
0x26ac   :  { %v1389_v46 = vmul.f32 %v4170_v26, %v1388_v36  ;;  %v1498_v51 = vor.u32 1.1754944e-38, %v1497_v5  ;;  %vm1496_vm8 = vcmp.eq.f32.partialorder %v1495_v25, 8.507059e+37 }
0x26ad   :  { %4173 = vpow2.f32 %v1999_v19 }
0x26ae   :  { %v1390_v58 = vadd.f32 %v4170_v26, %v1389_v46 }
0x26b0   :  { %v4172_v37 = vpop.eup %4171  ;;  %v1394_v3 = vsel %vm1393_vm2, %v4170_v26, %v1390_v58 }
0x26b1   :  { %v1399_v20 = vsel %vm1396_vm3, %v1398_v50, %v1394_v3  ;;  %v1487_v52 = vmul.f32 %v4172_v37, %v1485_v45  ;;  %v2101_v56 = vpop.xlane.xlu0 %2100  ;;  %vm1492_vm4 = vweird.f32 %v4172_v37 }
0x26b2   :  { %v1400_v1 = vmul.f32 %v4166_v33, %v1399_v20  ;;  %v2102_v4 = vsub.f32 %v2098_v54, %v2101_v56  ;;  %vm1493_vm7 = vmor %vm1491_vm5, %vm1492_vm4  ;;  %v2247_v33 = vsel %vm246_vm6, %v2246_v23, -inf }
0x26b3   :  { %v6088_v9 = vpop.eup %4173  ;;  %v1488_v22 = vsub.f32 1.0, %v1487_v52 }
0x26b4   :  { %3724 = vst.msk [vmem:[%s6204_s11 + $0x28] sm:$0xff] %vm246_vm6, %v1400_v1  ;;  %v2103_v6 = vmul.f32 1.442695, %v2102_v4  ;;  %v2001_v61 = vsel %vm246_vm6, %v6088_v9, 0.0 }
0x26b5   :  { %v1489_v27 = vmul.f32 %v4172_v37, %v1488_v22  ;;  %2002 = vadd.xlane.f32.xlu2 %v2001_v61 }
0x26b6   :  { %4175 = vpow2.f32 %v2103_v6 }
0x26b7   :  { %v1490_v7 = vadd.f32 %v4172_v37, %v1489_v27 }
0x26b9   :  { %v1494_v49 = vsel %vm1493_vm7, %v4172_v37, %v1490_v7  ;;  %v2349_v11 = vpop.xlane.xlu0 %2348 }
0x26ba   :  { %v1499_v8 = vsel %vm1496_vm8, %v1498_v51, %v1494_v49  ;;  %v2350_v60 = vsub.f32 %v2346_v18, %v2349_v11 }
0x26bb   :  { %v1500_v12 = vmul.f32 %v6064_v63, %v1499_v8 }
0x26bc   :  { %v6100_v48 = vpop.eup %4175  ;;  %v2351_v62 = vmul.f32 1.442695, %v2350_v60 }
0x26bd   :  { %3732 = vst.msk [vmem:[%s6204_s11 + $0x38] sm:$0xff] %vm246_vm6, %v1500_v12  ;;  %2248 = vmax.xlane.f32.xlu2 %v2247_v33  ;;  %v2105_v28 = vsel %vm246_vm6, %v6100_v48, 0.0 }
0x26be   :  { %4177 = vpow2.f32 %v2351_v62  ;;  %2106 = vadd.xlane.f32.xlu1 %v2105_v28 }
0x26c1   :  { %v3119_v40 = vpop.xlane.xlu0 %3118 }
0x26c2   :  { %v3120_v38 = vsub.f32 %v6084_v17, %v3119_v40 }
0x26c4   :  { %v6116_v32 = vpop.eup %4177  ;;  %v3121_v2 = vmul.f32 1.442695, %v3120_v38 }
0x26c5   :  { %2970 = vmax.xlane.f32.xlu2 %v2969_v0  ;;  %v2353_v57 = vsel %vm246_vm6, %v6116_v32, 0.0 }
0x26c6   :  { %4179 = vpow2.f32 %v3121_v2  ;;  %2866 = vmax.xlane.f32.xlu1 %v2865_v29  ;;  %2354 = vadd.xlane.f32.xlu0 %v2353_v57 }
0x26cc   :  { %v6127_v30 = vpop.eup %4179 }
0x26cd   :  { %v3123_v41 = vsel %vm246_vm6, %v6127_v30, 0.0 }
0x26ce   :  { %3218 = vmax.xlane.f32.xlu1 %v3217_v31  ;;  %3124 = vadd.xlane.f32.xlu0 %v3123_v41 }
0x2728   :  { %v2003_v14 = vpop.xlane.xlu2 %2002 }
0x2729   :  { %4181 = vrcp.f32 %v2003_v14  ;;  %v2015_v10 = vand.u32 2147483648, %v2003_v14  ;;  %v2013_v17 = vand.u32 2147483647, %v2003_v14  ;;  %vm2009_vm0 = vweird.f32 %v2003_v14 }
0x272b   :  { %v2016_v43 = vor.u32 1.1754944e-38, %v2015_v10  ;;  %vm2014_vm10 = vcmp.eq.f32.partialorder %v2013_v17, 8.507059e+37 }
0x272f   :  { %v4182_v63 = vpop.eup %4181 }
0x2730   :  { %v2005_v53 = vmul.f32 %v4182_v63, %v2003_v14  ;;  %v2249_v42 = vpop.xlane.xlu2 %2248  ;;  %vm2010_vm12 = vweird.f32 %v4182_v63 }
0x2731   :  { %v2250_v54 = vsub.f32 %v2246_v23, %v2249_v42  ;;  %v2107_v59 = vpop.xlane.xlu1 %2106  ;;  %vm2011_vm9 = vmor %vm2009_vm0, %vm2010_vm12 }
0x2732   :  { %v2006_v39 = vsub.f32 1.0, %v2005_v53  ;;  %4183 = vrcp.f32 %v2107_v59  ;;  %v2119_v3 = vand.u32 2147483648, %v2107_v59  ;;  %v2117_v1 = vand.u32 2147483647, %v2107_v59 }
0x2733   :  { %v2251_v18 = vmul.f32 1.442695, %v2250_v54  ;;  %vm2113_vm13 = vweird.f32 %v2107_v59 }
0x2734   :  { %v2007_v13 = vmul.f32 %v4182_v63, %v2006_v39  ;;  %v2120_v22 = vor.u32 1.1754944e-38, %v2119_v3  ;;  %vm2118_vm15 = vcmp.eq.f32.partialorder %v2117_v1, 8.507059e+37 }
0x2735   :  { %4185 = vpow2.f32 %v2251_v18 }
0x2736   :  { %v2008_v16 = vadd.f32 %v4182_v63, %v2007_v13 }
0x2738   :  { %v4184_v26 = vpop.eup %4183  ;;  %v2012_v44 = vsel %vm2011_vm9, %v4182_v63, %v2008_v16  ;;  %v2971_v21 = vpop.xlane.xlu2 %2970 }
0x2739   :  { %v2017_v35 = vsel %vm2014_vm10, %v2016_v43, %v2012_v44  ;;  %v2109_v45 = vmul.f32 %v4184_v26, %v2107_v59  ;;  %v2972_v36 = vsub.f32 %v2968_v55, %v2971_v21  ;;  %v2867_v15 = vpop.xlane.xlu1 %2866  ;;  %v2355_v19 = vpop.xlane.xlu0 %2354  ;;  %vm2114_vm11 = vweird.f32 %v4184_v26 }
0x273a   :  { %v2018_v46 = vmul.f32 %v6088_v9, %v2017_v35  ;;  %v2868_v47 = vsub.f32 %v2864_v24, %v2867_v15  ;;  %4187 = vrcp.f32 %v2355_v19  ;;  %vm2115_vm14 = vmor %vm2113_vm13, %vm2114_vm11  ;;  %v2367_v8 = vand.u32 2147483648, %v2355_v19 }
0x273b   :  { %v6134_v58 = vpop.eup %4185  ;;  %v2110_v50 = vsub.f32 1.0, %v2109_v45  ;;  %v2973_v37 = vmul.f32 1.442695, %v2972_v36  ;;  %v2365_v33 = vand.u32 2147483647, %v2355_v19  ;;  %vm2361_vm2 = vweird.f32 %v2355_v19 }
0x273c   :  { %3825 = vst.msk [vmem:[%s6204_s11 + $0x40] sm:$0xff] %vm246_vm6, %v2018_v46  ;;  %v2869_v20 = vmul.f32 1.442695, %v2868_v47  ;;  %v2253_v52 = vsel %vm246_vm6, %v6134_v58, 0.0  ;;  %v2368_v55 = vor.u32 1.1754944e-38, %v2367_v8 }
0x273d   :  { %v2111_v56 = vmul.f32 %v4184_v26, %v2110_v50  ;;  %4189 = vpow2.f32 %v2973_v37  ;;  %2254 = vadd.xlane.f32.xlu2 %v2253_v52  ;;  %vm2366_vm4 = vcmp.eq.f32.partialorder %v2365_v33, 8.507059e+37 }
0x273e   :  { %4191 = vpow2.f32 %v2869_v20 }
0x273f   :  { %v2112_v4 = vadd.f32 %v4184_v26, %v2111_v56 }
0x2740   :  { %v4188_v9 = vpop.eup %4187 }
0x2741   :  { %v2116_v5 = vsel %vm2115_vm14, %v4184_v26, %v2112_v4  ;;  %v2357_v6 = vmul.f32 %v4188_v9, %v2355_v19  ;;  %v3219_v61 = vpop.xlane.xlu1 %3218  ;;  %v3125_v27 = vpop.xlane.xlu0 %3124  ;;  %vm2362_vm1 = vweird.f32 %v4188_v9 }
0x2742   :  { %v2121_v25 = vsel %vm2118_vm15, %v2120_v22, %v2116_v5  ;;  %v3220_v7 = vsub.f32 %v6125_v34, %v3219_v61  ;;  %4193 = vrcp.f32 %v3125_v27  ;;  %vm2363_vm3 = vmor %vm2361_vm2, %vm2362_vm1  ;;  %v3137_v34 = vand.u32 2147483648, %v3125_v27 }
0x2743   :  { %v6143_v51 = vpop.eup %4189  ;;  %v2122_v49 = vmul.f32 %v6100_v48, %v2121_v25  ;;  %v2358_v11 = vsub.f32 1.0, %v2357_v6  ;;  %v3135_v41 = vand.u32 2147483647, %v3125_v27  ;;  %vm3131_vm7 = vweird.f32 %v3125_v27 }
0x2744   :  { %v6146_v23 = vpop.eup %4191  ;;  %v3221_v60 = vmul.f32 1.442695, %v3220_v7  ;;  %v2975_v12 = vsel %vm246_vm6, %v6143_v51, 0.0 }
0x2745   :  { %3833 = vst.msk [vmem:[%s6204_s11 + $0x50] sm:$0xff] %vm246_vm6, %v2122_v49  ;;  %v2359_v62 = vmul.f32 %v4188_v9, %v2358_v11  ;;  %2976 = vadd.xlane.f32.xlu2 %v2975_v12  ;;  %v2871_v48 = vsel %vm246_vm6, %v6146_v23, 0.0  ;;  %vm3136_vm12 = vcmp.eq.f32.partialorder %v3135_v41, 8.507059e+37 }
0x2746   :  { %4195 = vpow2.f32 %v3221_v60  ;;  %2872 = vadd.xlane.f32.xlu1 %v2871_v48 }
0x2747   :  { %v2360_v28 = vadd.f32 %v4188_v9, %v2359_v62 }
0x2748   :  { %v4194_v40 = vpop.eup %4193 }
0x2749   :  { %v2364_v38 = vsel %vm2363_vm3, %v4188_v9, %v2360_v28  ;;  %v3127_v24 = vmul.f32 %v4194_v40, %v3125_v27  ;;  %vm3132_vm5 = vweird.f32 %v4194_v40 }
0x274a   :  { %v2369_v2 = vsel %vm2366_vm4, %v2368_v55, %v2364_v38  ;;  %vm3133_vm8 = vmor %vm3131_vm7, %vm3132_vm5 }
0x274b   :  { %v2370_v0 = vmul.f32 %v6116_v32, %v2369_v2  ;;  %v3128_v29 = vsub.f32 1.0, %v3127_v24  ;;  %v3138_v32 = vor.u32 1.1754944e-38, %v3137_v34 }
0x274c   :  { %v6157_v57 = vpop.eup %4195 }
0x274d   :  { %3851 = vst.msk [vmem:[%s6204_s11 + $0x58] sm:$0xff] %vm246_vm6, %v2370_v0  ;;  %v3129_v31 = vmul.f32 %v4194_v40, %v3128_v29  ;;  %v3223_v14 = vsel %vm246_vm6, %v6157_v57, 0.0 }
0x274e   :  { %3224 = vadd.xlane.f32.xlu1 %v3223_v14 }
0x274f   :  { %v3130_v63 = vadd.f32 %v4194_v40, %v3129_v31 }
0x2751   :  { %v3134_v53 = vsel %vm3133_vm8, %v4194_v40, %v3130_v63 }
0x2752   :  { %v3139_v42 = vsel %vm3136_vm12, %v3138_v32, %v3134_v53 }
0x2753   :  { %v3140_v54 = vmul.f32 %v6127_v30, %v3139_v42 }
0x2755   :  { %3962 = vst.msk [vmem:[%s6204_s11 + $0x68] sm:$0xff] %vm246_vm6, %v3140_v54 }
0x27b0   :  { %v2255_v59 = vpop.xlane.xlu2 %2254 }
0x27b1   :  { %4197 = vrcp.f32 %v2255_v59  ;;  %v2267_v17 = vand.u32 2147483648, %v2255_v59  ;;  %v2265_v43 = vand.u32 2147483647, %v2255_v59  ;;  %vm2261_vm9 = vweird.f32 %v2255_v59 }
0x27b3   :  { %v2268_v21 = vor.u32 1.1754944e-38, %v2267_v17  ;;  %vm2266_vm11 = vcmp.eq.f32.partialorder %v2265_v43, 8.507059e+37 }
0x27b7   :  { %v4198_v39 = vpop.eup %4197 }
0x27b8   :  { %v2257_v30 = vmul.f32 %v4198_v39, %v2255_v59  ;;  %v2977_v10 = vpop.xlane.xlu2 %2976  ;;  %vm2262_vm0 = vweird.f32 %v4198_v39 }
0x27b9   :  { %4199 = vrcp.f32 %v2977_v10  ;;  %v2873_v18 = vpop.xlane.xlu1 %2872  ;;  %vm2263_vm10 = vmor %vm2261_vm9, %vm2262_vm0  ;;  %v2989_v37 = vand.u32 2147483648, %v2977_v10  ;;  %v2987_v52 = vand.u32 2147483647, %v2977_v10  ;;  %vm2983_vm15 = vweird.f32 %v2977_v10 }
0x27ba   :  { %v2258_v13 = vsub.f32 1.0, %v2257_v30  ;;  %4201 = vrcp.f32 %v2873_v18  ;;  %v2885_v56 = vand.u32 2147483648, %v2873_v18  ;;  %v2883_v4 = vand.u32 2147483647, %v2873_v18 }
0x27bb   :  { %vm2879_vm2 = vweird.f32 %v2873_v18  ;;  %vm2988_vm3 = vcmp.eq.f32.partialorder %v2987_v52, 8.507059e+37 }
0x27bc   :  { %v2259_v16 = vmul.f32 %v4198_v39, %v2258_v13  ;;  %v2886_v61 = vor.u32 1.1754944e-38, %v2885_v56  ;;  %vm2884_vm5 = vcmp.eq.f32.partialorder %v2883_v4, 8.507059e+37 }
0x27be   :  { %v2260_v26 = vadd.f32 %v4198_v39, %v2259_v16 }
0x27bf   :  { %v4200_v44 = vpop.eup %4199 }
0x27c0   :  { %v4202_v35 = vpop.eup %4201  ;;  %v2264_v45 = vsel %vm2263_vm10, %v4198_v39, %v2260_v26  ;;  %v2979_v36 = vmul.f32 %v4200_v44, %v2977_v10  ;;  %vm2984_vm13 = vweird.f32 %v4200_v44 }
0x27c1   :  { %v2269_v15 = vsel %vm2266_vm11, %v2268_v21, %v2264_v45  ;;  %v2875_v19 = vmul.f32 %v4202_v35, %v2873_v18  ;;  %v3225_v46 = vpop.xlane.xlu1 %3224  ;;  %vm2880_vm14 = vweird.f32 %v4202_v35  ;;  %vm2985_vm1 = vmor %vm2983_vm15, %vm2984_vm13 }
0x27c2   :  { %v2270_v47 = vmul.f32 %v6134_v58, %v2269_v15  ;;  %v2980_v50 = vsub.f32 1.0, %v2979_v36  ;;  %4203 = vrcp.f32 %v3225_v46  ;;  %v2990_v58 = vor.u32 1.1754944e-38, %v2989_v37  ;;  %vm2881_vm4 = vmor %vm2879_vm2, %vm2880_vm14 }
0x27c3   :  { %v2876_v3 = vsub.f32 1.0, %v2875_v19  ;;  %v3237_v12 = vand.u32 2147483648, %v3225_v46  ;;  %v3235_v33 = vand.u32 2147483647, %v3225_v46  ;;  %vm3231_vm8 = vweird.f32 %v3225_v46 }
0x27c4   :  { %3843 = vst.msk [vmem:[%s6204_s11 + $0x48] sm:$0xff] %vm246_vm6, %v2270_v47  ;;  %v2981_v20 = vmul.f32 %v4200_v44, %v2980_v50 }
0x27c5   :  { %v2877_v1 = vmul.f32 %v4202_v35, %v2876_v3  ;;  %vm3236_vm0 = vcmp.eq.f32.partialorder %v3235_v33, 8.507059e+37 }
0x27c6   :  { %v2982_v9 = vadd.f32 %v4200_v44, %v2981_v20 }
0x27c7   :  { %v2878_v22 = vadd.f32 %v4202_v35, %v2877_v1 }
0x27c8   :  { %v4204_v5 = vpop.eup %4203  ;;  %v2986_v6 = vsel %vm2985_vm1, %v4200_v44, %v2982_v9 }
0x27c9   :  { %v2991_v27 = vsel %vm2988_vm3, %v2990_v58, %v2986_v6  ;;  %v2882_v25 = vsel %vm2881_vm4, %v4202_v35, %v2878_v22  ;;  %v3227_v7 = vmul.f32 %v4204_v5, %v3225_v46  ;;  %vm3232_vm7 = vweird.f32 %v4204_v5 }
0x27ca   :  { %v2992_v49 = vmul.f32 %v6143_v51, %v2991_v27  ;;  %v2887_v11 = vsel %vm2884_vm5, %v2886_v61, %v2882_v25  ;;  %vm3233_vm12 = vmor %vm3231_vm8, %vm3232_vm7  ;;  %v3238_v51 = vor.u32 1.1754944e-38, %v3237_v12 }
0x27cb   :  { %v2888_v8 = vmul.f32 %v6146_v23, %v2887_v11  ;;  %v3228_v60 = vsub.f32 1.0, %v3227_v7 }
0x27cc   :  { %3952 = vst.msk [vmem:[%s6204_s11 + $0x70] sm:$0xff] %vm246_vm6, %v2992_v49 }
0x27cd   :  { %3944 = vst.msk [vmem:[%s6204_s11 + $0x60] sm:$0xff] %vm246_vm6, %v2888_v8  ;;  %v3229_v62 = vmul.f32 %v4204_v5, %v3228_v60 }
0x27cf   :  { %v3230_v48 = vadd.f32 %v4204_v5, %v3229_v62 }
0x27d1   :  { %v3234_v23 = vsel %vm3233_vm12, %v4204_v5, %v3230_v48 }
0x27d2   :  { %v3239_v28 = vsel %vm3236_vm0, %v3238_v51, %v3234_v23 }
0x27d3   :  { %v3240_v40 = vmul.f32 %v6157_v57, %v3239_v28 }
0x27d5   :  { %3970 = vst.msk [vmem:[%s6204_s11 + $0x78] sm:$0xff] %vm246_vm6, %v3240_v40 }
0x27d6   :  { %4231 = dma.done.wait [#allocation3], 256  }
0x27d7   :  { %4232 = vsyncadd [#allocation3], 4294967040 }
0x27d8   :  { %3644 = vsyncpa [#allocation3], 1 }

</bundles_post_ra>
